<compile_context>
chip_gen: v7x
topology: tpu7x:2x2x1
jax: 0.10.0
libtpu: 0.0.40
codegen_flags: <defaults>
</compile_context>

<pallas_src>
import math
import jax
import jax.numpy as jnp
from jax.experimental import pallas as pl
from jax.experimental.pallas import tpu as pltpu

# ---- small synthetic CLIP-text config (lane-dense hidden/proj dims) ---------
B = 16         # batch (sequences)
Bt = 8         # sequences per grid step  -> M = Bt*S matmul rows per step
S = 8          # max_length (77 in the real model; pad to 80/128 there)
H = 128        # hidden size (768 in ViT-L/14 text tower); 128 -> lane-dense
NH = 2         # attention heads
DH = H // NH   # head dim (64, same as real CLIP)
FF = 4 * H     # MLP intermediate
P = 128        # text projection dim (768 in the real model); lane-dense
L = 2          # transformer layers (12 in the real model)
V = 64         # toy vocab size
EPS = 1e-5     # CLIP layer-norm eps
M = Bt * S     # flattened matmul rows per grid step

# MXU operand dtype.  Use jnp.bfloat16 for real CLIP-L dims (2-4x MXU rate,
# half the weight traffic); kept f32 here so the toy reference check is tight.
MATMUL_DTYPE = jnp.float32


# ---- in-kernel helpers ------------------------------------------------------
def _layer_norm(x, g, b):
    mu = jnp.mean(x, axis=-1, keepdims=True)
    var = jnp.mean((x - mu) ** 2, axis=-1, keepdims=True)
    return (x - mu) * jax.lax.rsqrt(var + EPS) * g + b


def _quick_gelu(x):
    # CLIP uses quick_gelu: x * sigmoid(1.702 * x)   (sigmoid -> EUP)
    return x * jax.nn.sigmoid(1.702 * x)


def _softmax_lastdim(s):
    m = jnp.max(s, axis=-1, keepdims=True)
    p = jnp.exp(s - m)
    d = jnp.sum(p, axis=-1, keepdims=True)
    r = pl.reciprocal(d, approx=True)          # EUP slot, not a VALU divide
    r = r * (2.0 - d * r)                      # one Newton step -> f32 accuracy
    return p * r


# ---- fused kernel: layer-streamed encoder + final LN + pool + projection ----
def clip_text_kernel(eos_ref,                  # SMEM scalar prefetch (B,) int32
                     x_ref,                    # (Bt, S, H) activations
                     wqkv_ref,                 # (1, 3*NH, H, DH) per-head QKV w
                     bqkv_ref,                 # (1, 3*NH, 1, DH) per-head QKV b
                     wo_ref,                   # (1, NH, DH, H)  per-head out proj
                     vecs_ref,                 # (1, 6, H): ln1_g ln1_b bo ln2_g ln2_b b2
                     w1_ref, b1_ref, w2_ref,   # (1,H,FF) (1,1,FF) (1,FF,H)
                     lnf_ref, wproj_ref,       # (2,H)  (H,P)
                     o_ref,                    # (Bt, P)
                     x_scr):                   # VMEM (M, H): residual stream,
                                               # persists across the layer axis
    i = pl.program_id(0)                       # batch-tile index
    l = pl.program_id(1)                       # layer index (streamed weights)

    @pl.when(l == 0)
    def _():                                   # load activations once per tile
        x_scr[...] = x_ref[...].reshape(M, H)

    xf = x_scr[...]                            # (M, H) f32 residual stream
    vv = vecs_ref[0]                           # (6, H)

    # hoisted additive causal mask (one vadd per score tile, no select per head)
    rr = jax.lax.broadcasted_iota(jnp.int32, (S, S), 0)
    cc = jax.lax.broadcasted_iota(jnp.int32, (S, S), 1)
    mask_add = jnp.where(cc <= rr, 0.0, -1e9).astype(jnp.float32)

    # --- pre-LN multi-head causal self-attention (per-head packed weights) ---
    h = _layer_norm(xf, vv[0:1], vv[1:2]).astype(MATMUL_DTYPE)
    attn = jnp.zeros((M, H), jnp.float32)
    for hh in range(NH):                       # static head loop, no lane slices
        q = jnp.dot(h, wqkv_ref[0, 0 * NH + hh],
                    preferred_element_type=jnp.float32) + bqkv_ref[0, 0 * NH + hh]
        k = jnp.dot(h, wqkv_ref[0, 1 * NH + hh],
                    preferred_element_type=jnp.float32) + bqkv_ref[0, 1 * NH + hh]
        v = jnp.dot(h, wqkv_ref[0, 2 * NH + hh],
                    preferred_element_type=jnp.float32) + bqkv_ref[0, 2 * NH + hh]
        # per-sequence attention: split rows (sublane axis) only
        q3 = q.reshape(Bt, S, DH).astype(MATMUL_DTYPE)
        k3 = k.reshape(Bt, S, DH).astype(MATMUL_DTYPE)
        v3 = v.reshape(Bt, S, DH).astype(MATMUL_DTYPE)
        s = jnp.einsum('bqd,bkd->bqk', q3, k3,
                       preferred_element_type=jnp.float32) + mask_add[None]
        p = _softmax_lastdim(s).astype(MATMUL_DTYPE)
        ctx = jnp.einsum('bqk,bkd->bqd', p, v3,
                         preferred_element_type=jnp.float32)
        # per-head output projection accumulates straight into f32 (M, H)
        attn = attn + jnp.dot(ctx.reshape(M, DH).astype(MATMUL_DTYPE),
                              wo_ref[0, hh], preferred_element_type=jnp.float32)
    x1 = xf + attn + vv[2:3]

    # --- pre-LN MLP with quick-GELU ------------------------------------------
    h2 = _layer_norm(x1, vv[3:4], vv[4:5]).astype(MATMUL_DTYPE)
    a1 = jnp.dot(h2, w1_ref[0], preferred_element_type=jnp.float32) + b1_ref[0]
    a1 = _quick_gelu(a1).astype(MATMUL_DTYPE)
    a2 = jnp.dot(a1, w2_ref[0], preferred_element_type=jnp.float32) + vv[5:6]
    x2 = x1 + a2
    x_scr[...] = x2                            # carry residual to next layer

    # --- final LN + EOS pooling + text projection on the last layer ----------
    @pl.when(l == L - 1)
    def _():
        rows = []
        for bb in range(Bt):                   # gather Bt pooled rows
            idx = eos_ref[i * Bt + bb]
            rows.append(x_scr[pl.ds(bb * S + idx, 1), :])
        pooled = jnp.concatenate(rows, axis=0)                 # (Bt, H)
        pooled = _layer_norm(pooled, lnf_ref[0:1, :], lnf_ref[1:2, :])
        o_ref[...] = jnp.dot(pooled.astype(MATMUL_DTYPE), wproj_ref[...],
                             preferred_element_type=jnp.float32)


# ---- one-time parameter packing (per-head weights, stacked layers) ----------
def pack_params(params):
    scale = 1.0 / math.sqrt(DH)                # power of two -> exact fold
    cdt = MATMUL_DTYPE
    wqkv_l, bqkv_l, wo_l, vecs_l, w1_l, b1_l, w2_l = [], [], [], [], [], [], []
    for lp in params["layers"]:
        heads = lambda w: w.reshape(H, NH, DH).transpose(1, 0, 2)   # (NH, H, DH)
        hbias = lambda b: b.reshape(NH, 1, DH)                      # (NH, 1, DH)
        wq, wk, wv = heads(lp["wq"]) * scale, heads(lp["wk"]), heads(lp["wv"])
        bq, bk, bv = hbias(lp["bq"]) * scale, hbias(lp["bk"]), hbias(lp["bv"])
        wqkv_l.append(jnp.concatenate([wq, wk, wv], axis=0))        # (3*NH,H,DH)
        bqkv_l.append(jnp.concatenate([bq, bk, bv], axis=0))        # (3*NH,1,DH)
        wo_l.append(lp["wo"].reshape(NH, DH, H))
        vecs_l.append(jnp.stack([lp["ln1_g"][0], lp["ln1_b"][0], lp["bo"][0],
                                 lp["ln2_g"][0], lp["ln2_b"][0], lp["b2"][0]]))
        w1_l.append(lp["w1"]); b1_l.append(lp["b1"]); w2_l.append(lp["w2"])
    return dict(
        tok_emb=params["tok_emb"], pos_emb=params["pos_emb"],
        wqkv=jnp.stack(wqkv_l).astype(cdt),                # (L, 3*NH, H, DH)
        bqkv=jnp.stack(bqkv_l).astype(jnp.float32),        # (L, 3*NH, 1, DH)
        wo=jnp.stack(wo_l).astype(cdt),                    # (L, NH, DH, H)
        vecs=jnp.stack(vecs_l).astype(jnp.float32),        # (L, 6, H)
        w1=jnp.stack(w1_l).astype(cdt),                    # (L, H, FF)
        b1=jnp.stack(b1_l).astype(jnp.float32),            # (L, 1, FF)
        w2=jnp.stack(w2_l).astype(cdt),                    # (L, FF, H)
        lnf=jnp.concatenate([params["lnf_g"], params["lnf_b"]], 0),  # (2, H)
        wproj=params["wproj"].astype(cdt),                 # (H, P)
    )


# ---- full forward -----------------------------------------------------------
def clip_text_features(tokens, packed):
    # TODO(synk): CLIPTokenizer (string -> token ids) is host-side text
    # processing; integer token ids are taken directly (embedding gather is
    # plain JAX glue feeding the kernel).
    x = (packed["tok_emb"][tokens] + packed["pos_emb"][None]).astype(jnp.float32)
    eos_idx = jnp.argmax(tokens, axis=-1).astype(jnp.int32)   # CLIP pooling rule

    in_specs = [
        pl.BlockSpec((Bt, S, H),          lambda i, l, eos: (i, 0, 0)),
        pl.BlockSpec((1, 3 * NH, H, DH),  lambda i, l, eos: (l, 0, 0, 0)),
        pl.BlockSpec((1, 3 * NH, 1, DH),  lambda i, l, eos: (l, 0, 0, 0)),
        pl.BlockSpec((1, NH, DH, H),      lambda i, l, eos: (l, 0, 0, 0)),
        pl.BlockSpec((1, 6, H),           lambda i, l, eos: (l, 0, 0)),
        pl.BlockSpec((1, H, FF),          lambda i, l, eos: (l, 0, 0)),
        pl.BlockSpec((1, 1, FF),          lambda i, l, eos: (l, 0, 0)),
        pl.BlockSpec((1, FF, H),          lambda i, l, eos: (l, 0, 0)),
        pl.BlockSpec((2, H),              lambda i, l, eos: (0, 0)),
        pl.BlockSpec((H, P),              lambda i, l, eos: (0, 0)),
    ]
    return pl.pallas_call(
        clip_text_kernel,
        out_shape=jax.ShapeDtypeStruct((B, P), jnp.float32),
        grid_spec=pltpu.PrefetchScalarGridSpec(
            num_scalar_prefetch=1,                # eos_idx -> SMEM
            grid=(B // Bt, L),                    # layer axis last: weight stream
            in_specs=in_specs,
            out_specs=pl.BlockSpec((Bt, P), lambda i, l, eos: (i, 0)),
            scratch_shapes=[pltpu.VMEM((M, H), jnp.float32)],
        ),
        compiler_params=pltpu.CompilerParams(
            dimension_semantics=("parallel", "arbitrary"),
            vmem_limit_bytes=64 * 1024 * 1024,
        ),
    )(eos_idx, x, packed["wqkv"], packed["bqkv"], packed["wo"], packed["vecs"],
      packed["w1"], packed["b1"], packed["w2"], packed["lnf"], packed["wproj"])


# ---- pure-JAX reference (for correctness check) -----------------------------
def ref_text_features(tokens, params):
    Bq, Sq = tokens.shape
    x = params["tok_emb"][tokens] + params["pos_emb"][None]
    mask = jnp.tril(jnp.ones((Sq, Sq), bool))
    for lp in params["layers"]:
        h = _layer_norm(x, lp["ln1_g"], lp["ln1_b"])
        q = h @ lp["wq"] + lp["bq"]
        k = h @ lp["wk"] + lp["bk"]
        v = h @ lp["wv"] + lp["bv"]
        qh = q.reshape(Bq, Sq, NH, DH)
        kh = k.reshape(Bq, Sq, NH, DH)
        vh = v.reshape(Bq, Sq, NH, DH)
        s = jnp.einsum("bqhd,bkhd->bhqk", qh, kh) / math.sqrt(DH)
        s = jnp.where(mask[None, None], s, -1e9)
        p = jax.nn.softmax(s, axis=-1)
        ctx = jnp.einsum("bhqk,bkhd->bqhd", p, vh).reshape(Bq, Sq, H)
        x = x + ctx @ lp["wo"] + lp["bo"]
        h2 = _layer_norm(x, lp["ln2_g"], lp["ln2_b"])
        h2 = _quick_gelu(h2 @ lp["w1"] + lp["b1"])
        x = x + h2 @ lp["w2"] + lp["b2"]
    eos_idx = jnp.argmax(tokens, axis=-1)
    pooled = x[jnp.arange(Bq), eos_idx]
    pooled = _layer_norm(pooled, params["lnf_g"], params["lnf_b"])
    return pooled @ params["wproj"]


# ---- deterministic parameter init -------------------------------------------
def init_params(key):
    def nrm(k, shape, scale=0.05):
        return (scale * jax.random.normal(k, shape)).astype(jnp.float32)

    keys = jax.random.split(key, 3 + L)
    params = {
        "tok_emb": nrm(keys[0], (V, H), 0.1),
        "pos_emb": nrm(keys[1], (S, H), 0.1),
        "lnf_g": jnp.ones((1, H), jnp.float32),
        "lnf_b": jnp.zeros((1, H), jnp.float32),
        "wproj": nrm(keys[2], (H, P)),
        "layers": [],
    }
    for li in range(L):
        lk = jax.random.split(keys[3 + li], 9)
        params["layers"].append({
            "ln1_g": jnp.ones((1, H), jnp.float32),
            "ln1_b": jnp.zeros((1, H), jnp.float32),
            "wq": nrm(lk[0], (H, H)), "bq": nrm(lk[1], (1, H), 0.01),
            "wk": nrm(lk[2], (H, H)), "bk": nrm(lk[3], (1, H), 0.01),
            "wv": nrm(lk[4], (H, H)), "bv": nrm(lk[5], (1, H), 0.01),
            "wo": nrm(lk[6], (H, H)), "bo": jnp.zeros((1, H), jnp.float32),
            "ln2_g": jnp.ones((1, H), jnp.float32),
            "ln2_b": jnp.zeros((1, H), jnp.float32),
            "w1": nrm(lk[7], (H, FF)), "b1": jnp.zeros((1, FF), jnp.float32),
            "w2": nrm(lk[8], (FF, H)), "b2": jnp.zeros((1, H), jnp.float32),
        })
    return params


if __name__ == "__main__":
    key = jax.random.PRNGKey(0)
    pkey, tkey = jax.random.split(key)
    params = init_params(pkey)
    packed = pack_params(params)   # one-time per-head packing + scale fold

    # deterministic "tokenized" batch: toy ids, EOS = V-1 (highest id so the
    # argmax pooling rule finds it), zero-padded to max_length
    # (mimics tokenizer padding='max_length').
    lengths = [int(n) for n in jax.random.randint(tkey, (B,), 2, S + 1)]
    body = jax.random.randint(jax.random.fold_in(tkey, 1), (B, S), 1, V - 1)
    rows = []
    for b in range(B):
        r = [int(body[b, i]) for i in range(lengths[b] - 1)] + [V - 1]
        r = r + [0] * (S - len(r))
        rows.append(r)
    tokens = jnp.array(rows, dtype=jnp.int32)                     # (B, S)

    fwd = jax.jit(clip_text_features)
    out = jax.block_until_ready(fwd(tokens, packed))
    assert out.shape == (B, P) and out.dtype == jnp.float32

    ref = ref_text_features(tokens, params)
    max_err = float(jnp.max(jnp.abs(out - ref)))
    assert jnp.allclose(out, ref, atol=1e-3, rtol=1e-3), f"mismatch vs reference ({max_err})"

    print("KERNEL_OK")
</pallas_src>

<mosaic_0001>
module attributes {stable_mosaic.version = 11 : i64} {
  func.func @clip_text_kernel(%arg0: i32, %arg1: i32, %arg2: memref<16xi32, #tpu.memory_space<smem>>, %arg3: memref<8x8x128xf32, #tpu.memory_space<vmem>>, %arg4: memref<1x6x128x64xf32, #tpu.memory_space<vmem>>, %arg5: memref<1x6x1x64xf32, #tpu.memory_space<vmem>>, %arg6: memref<1x2x64x128xf32, #tpu.memory_space<vmem>>, %arg7: memref<1x6x128xf32, #tpu.memory_space<vmem>>, %arg8: memref<1x128x512xf32, #tpu.memory_space<vmem>>, %arg9: memref<1x1x512xf32, #tpu.memory_space<vmem>>, %arg10: memref<1x512x128xf32, #tpu.memory_space<vmem>>, %arg11: memref<2x128xf32, #tpu.memory_space<vmem>>, %arg12: memref<128x128xf32, #tpu.memory_space<vmem>>, %arg13: memref<8x128xf32, #tpu.memory_space<vmem>>, %arg14: memref<64x128xf32, #tpu.memory_space<vmem>>) attributes {dimension_semantics = [#tpu.dimension_semantics<parallel>, #tpu.dimension_semantics<arbitrary>], iteration_bounds = array<i64: 2, 2>, scalar_prefetch = 1 : i64, scratch_operands = 1 : i64, tpu.core_type = #tpu.core_type<tc>, window_params = [{transform_indices = @transform_0, window_bounds = array<i64: 8, 8, 128>}, {transform_indices = @transform_1, window_bounds = array<i64: 1, 6, 128, 64>}, {transform_indices = @transform_2, window_bounds = array<i64: 1, 6, 1, 64>}, {transform_indices = @transform_3, window_bounds = array<i64: 1, 2, 64, 128>}, {transform_indices = @transform_4, window_bounds = array<i64: 1, 6, 128>}, {transform_indices = @transform_5, window_bounds = array<i64: 1, 128, 512>}, {transform_indices = @transform_6, window_bounds = array<i64: 1, 1, 512>}, {transform_indices = @transform_7, window_bounds = array<i64: 1, 512, 128>}, {pipeline_mode = #tpu.pipeline_mode<synchronous>, transform_indices = @transform_8, window_bounds = array<i64: 2, 128>}, {pipeline_mode = #tpu.pipeline_mode<synchronous>, transform_indices = @transform_9, window_bounds = array<i64: 128, 128>}, {transform_indices = @transform_10, window_bounds = array<i64: 8, 128>}]} {
    %c0_i32 = arith.constant 0 : i32
    %0 = arith.cmpi eq, %arg1, %c0_i32 : i32
    %1 = arith.extui %0 : i1 to i32
    %c0_i32_0 = arith.constant 0 : i32
    %2 = arith.cmpi ne, %1, %c0_i32_0 : i32
    scf.if %2 {
      %c0_102 = arith.constant 0 : index
      %c0_103 = arith.constant 0 : index
      %c0_104 = arith.constant 0 : index
      %187 = vector.load %arg3[%c0_102, %c0_103, %c0_104] : memref<8x8x128xf32, #tpu.memory_space<vmem>>, vector<8x8x128xf32>
      %188 = vector.shape_cast %187 : vector<8x8x128xf32> to vector<64x128xf32>
      %c0_105 = arith.constant 0 : index
      %c0_106 = arith.constant 0 : index
      %189 = vector.load %arg14[%c0_105, %c0_106] : memref<64x128xf32, #tpu.memory_space<vmem>>, vector<64x128xf32>
      tpu.vector_store %arg14[%c0_105, %c0_106], %188 {strides = array<i32>} : memref<64x128xf32, #tpu.memory_space<vmem>>, vector<64x128xf32>,
    } else {
    }
    %c0 = arith.constant 0 : index
    %c0_1 = arith.constant 0 : index
    %3 = vector.load %arg14[%c0, %c0_1] : memref<64x128xf32, #tpu.memory_space<vmem>>, vector<64x128xf32>
    %c0_2 = arith.constant 0 : index
    %c0_3 = arith.constant 0 : index
    %c0_4 = arith.constant 0 : index
    %4 = vector.load %arg7[%c0_2, %c0_3, %c0_4] : memref<1x6x128xf32, #tpu.memory_space<vmem>>, vector<1x6x128xf32>
    %5 = vector.shape_cast %4 : vector<1x6x128xf32> to vector<6x128xf32>
    %6 = tpu.iota {dimensions = array<i32: 0>} : vector<8x8xi32>
    %7 = tpu.iota {dimensions = array<i32: 1>} : vector<8x8xi32>
    %8 = arith.cmpi sle, %7, %6 : vector<8x8xi32>
    %cst = arith.constant 0.000000e+00 : f32
    %cst_5 = arith.constant -1.000000e+09 : f32
    %9 = vector.broadcast %cst : f32 to vector<8x8xf32>
    %10 = vector.broadcast %cst_5 : f32 to vector<8x8xf32>
    %11 = arith.select %8, %9, %10 : vector<8x8xi1>, vector<8x8xf32>
    %12 = vector.extract_strided_slice %5 {offsets = [0, 0], sizes = [1, 128], strides = [1, 1]} : vector<6x128xf32> to vector<1x128xf32>
    %13 = vector.extract_strided_slice %5 {offsets = [1, 0], sizes = [1, 128], strides = [1, 1]} : vector<6x128xf32> to vector<1x128xf32>
    %cst_6 = arith.constant dense<0.000000e+00> : vector<64xf32>
    %14 = vector.multi_reduction <add>, %3, %cst_6 [1] : vector<64x128xf32> to vector<64xf32>
    %15 = vector.shape_cast %14 : vector<64xf32> to vector<64x1xf32>
    %cst_7 = arith.constant 1.280000e+02 : f32
    %16 = vector.broadcast %cst_7 : f32 to vector<64x1xf32>
    %17 = arith.divf %15, %16 : vector<64x1xf32>
    %18 = vector.broadcast %17 : vector<64x1xf32> to vector<64x128xf32>
    %19 = arith.subf %3, %18 : vector<64x128xf32>
    %20 = arith.mulf %19, %19 : vector<64x128xf32>
    %cst_8 = arith.constant dense<0.000000e+00> : vector<64xf32>
    %21 = vector.multi_reduction <add>, %20, %cst_8 [1] : vector<64x128xf32> to vector<64xf32>
    %22 = vector.shape_cast %21 : vector<64xf32> to vector<64x1xf32>
    %cst_9 = arith.constant 1.280000e+02 : f32
    %23 = vector.broadcast %cst_9 : f32 to vector<64x1xf32>
    %24 = arith.divf %22, %23 : vector<64x1xf32>
    %25 = vector.broadcast %17 : vector<64x1xf32> to vector<64x128xf32>
    %26 = arith.subf %3, %25 : vector<64x128xf32>
    %cst_10 = arith.constant 9.99999974E-6 : f32
    %27 = vector.broadcast %cst_10 : f32 to vector<64x1xf32>
    %28 = arith.addf %24, %27 : vector<64x1xf32>
    %29 = math.rsqrt %28 : vector<64x1xf32>
    %30 = vector.broadcast %29 : vector<64x1xf32> to vector<64x128xf32>
    %31 = arith.mulf %26, %30 : vector<64x128xf32>
    %32 = vector.broadcast %12 : vector<1x128xf32> to vector<64x128xf32>
    %33 = arith.mulf %31, %32 : vector<64x128xf32>
    %34 = vector.broadcast %13 : vector<1x128xf32> to vector<64x128xf32>
    %35 = arith.addf %33, %34 : vector<64x128xf32>
    %cst_11 = arith.constant 0.000000e+00 : f32
    %36 = vector.broadcast %cst_11 : f32 to vector<64x128xf32>
    %c0_12 = arith.constant 0 : index
    %c0_13 = arith.constant 0 : index
    %c0_14 = arith.constant 0 : index
    %c0_15 = arith.constant 0 : index
    %37 = vector.load %arg4[%c0_12, %c0_13, %c0_14, %c0_15] : memref<1x6x128x64xf32, #tpu.memory_space<vmem>>, vector<1x1x128x64xf32>
    %38 = vector.shape_cast %37 : vector<1x1x128x64xf32> to vector<128x64xf32>
    %cst_16 = arith.constant dense<0.000000e+00> : vector<64x64xf32>
    %39 = tpu.matmul %35, %38, %cst_16 {dimension_numbers = #tpu.dot_dimension_numbers<[1], [0], [0], [1], [0, 0, 1, 1], [], []>} : vector<64x128xf32>, vector<128x64xf32>, vector<64x64xf32> -> vector<64x64xf32>
    %c0_17 = arith.constant 0 : index
    %c0_18 = arith.constant 0 : index
    %c0_19 = arith.constant 0 : index
    %c0_20 = arith.constant 0 : index
    %40 = vector.load %arg5[%c0_17, %c0_18, %c0_19, %c0_20] : memref<1x6x1x64xf32, #tpu.memory_space<vmem>>, vector<1x1x1x64xf32>
    %41 = vector.shape_cast %40 : vector<1x1x1x64xf32> to vector<1x64xf32>
    %42 = vector.broadcast %41 : vector<1x64xf32> to vector<64x64xf32>
    %43 = arith.addf %39, %42 : vector<64x64xf32>
    %c0_21 = arith.constant 0 : index
    %c2 = arith.constant 2 : index
    %c0_22 = arith.constant 0 : index
    %c0_23 = arith.constant 0 : index
    %44 = vector.load %arg4[%c0_21, %c2, %c0_22, %c0_23] : memref<1x6x128x64xf32, #tpu.memory_space<vmem>>, vector<1x1x128x64xf32>
    %45 = vector.shape_cast %44 : vector<1x1x128x64xf32> to vector<128x64xf32>
    %cst_24 = arith.constant dense<0.000000e+00> : vector<64x64xf32>
    %46 = tpu.matmul %35, %45, %cst_24 {dimension_numbers = #tpu.dot_dimension_numbers<[1], [0], [0], [1], [0, 0, 1, 1], [], []>} : vector<64x128xf32>, vector<128x64xf32>, vector<64x64xf32> -> vector<64x64xf32>
    %c0_25 = arith.constant 0 : index
    %c2_26 = arith.constant 2 : index
    %c0_27 = arith.constant 0 : index
    %c0_28 = arith.constant 0 : index
    %47 = vector.load %arg5[%c0_25, %c2_26, %c0_27, %c0_28] : memref<1x6x1x64xf32, #tpu.memory_space<vmem>>, vector<1x1x1x64xf32>
    %48 = vector.shape_cast %47 : vector<1x1x1x64xf32> to vector<1x64xf32>
    %49 = vector.broadcast %48 : vector<1x64xf32> to vector<64x64xf32>
    %50 = arith.addf %46, %49 : vector<64x64xf32>
    %c0_29 = arith.constant 0 : index
    %c4 = arith.constant 4 : index
    %c0_30 = arith.constant 0 : index
    %c0_31 = arith.constant 0 : index
    %51 = vector.load %arg4[%c0_29, %c4, %c0_30, %c0_31] : memref<1x6x128x64xf32, #tpu.memory_space<vmem>>, vector<1x1x128x64xf32>
    %52 = vector.shape_cast %51 : vector<1x1x128x64xf32> to vector<128x64xf32>
    %cst_32 = arith.constant dense<0.000000e+00> : vector<64x64xf32>
    %53 = tpu.matmul %35, %52, %cst_32 {dimension_numbers = #tpu.dot_dimension_numbers<[1], [0], [0], [1], [0, 0, 1, 1], [], []>} : vector<64x128xf32>, vector<128x64xf32>, vector<64x64xf32> -> vector<64x64xf32>
    %c0_33 = arith.constant 0 : index
    %c4_34 = arith.constant 4 : index
    %c0_35 = arith.constant 0 : index
    %c0_36 = arith.constant 0 : index
    %54 = vector.load %arg5[%c0_33, %c4_34, %c0_35, %c0_36] : memref<1x6x1x64xf32, #tpu.memory_space<vmem>>, vector<1x1x1x64xf32>
    %55 = vector.shape_cast %54 : vector<1x1x1x64xf32> to vector<1x64xf32>
    %56 = vector.broadcast %55 : vector<1x64xf32> to vector<64x64xf32>
    %57 = arith.addf %53, %56 : vector<64x64xf32>
    %58 = vector.shape_cast %43 : vector<64x64xf32> to vector<8x8x64xf32>
    %59 = vector.shape_cast %50 : vector<64x64xf32> to vector<8x8x64xf32>
    %60 = vector.shape_cast %57 : vector<64x64xf32> to vector<8x8x64xf32>
    "tpu.trace_start"() <{level = 10 : i32, message = "bqd,bkd->bqk"}> : () -> ()
    %cst_37 = arith.constant dense<0.000000e+00> : vector<8x8x8xf32>
    %61 = tpu.matmul %58, %59, %cst_37 {dimension_numbers = #tpu.dot_dimension_numbers<[2], [2], [1], [1], [0, 0, 0, 1, 1, 1], [0], [0]>} : vector<8x8x64xf32>, vector<8x8x64xf32>, vector<8x8x8xf32> -> vector<8x8x8xf32>
    "tpu.trace_stop"() : () -> ()
    %62 = vector.shape_cast %11 : vector<8x8xf32> to vector<1x8x8xf32>
    %63 = vector.broadcast %62 : vector<1x8x8xf32> to vector<8x8x8xf32>
    %64 = arith.addf %61, %63 : vector<8x8x8xf32>
    %cst_38 = arith.constant dense<0xFF800000> : vector<8x8xf32>
    %65 = vector.multi_reduction <maximumf>, %64, %cst_38 [2] : vector<8x8x8xf32> to vector<8x8xf32>
    %66 = vector.shape_cast %65 : vector<8x8xf32> to vector<8x8x1xf32>
    %67 = vector.broadcast %66 : vector<8x8x1xf32> to vector<8x8x8xf32>
    %68 = arith.subf %64, %67 : vector<8x8x8xf32>
    %69 = math.exp %68 : vector<8x8x8xf32>
    %cst_39 = arith.constant dense<0.000000e+00> : vector<8x8xf32>
    %70 = vector.multi_reduction <add>, %69, %cst_39 [2] : vector<8x8x8xf32> to vector<8x8xf32>
    %71 = vector.shape_cast %70 : vector<8x8xf32> to vector<8x8x1xf32>
    %72 = tpu.reciprocal %71 {approx = true} : vector<8x8x1xf32> -> vector<8x8x1xf32>
    %73 = arith.mulf %71, %72 : vector<8x8x1xf32>
    %cst_40 = arith.constant 2.000000e+00 : f32
    %74 = vector.broadcast %cst_40 : f32 to vector<8x8x1xf32>
    %75 = arith.subf %74, %73 : vector<8x8x1xf32>
    %76 = arith.mulf %72, %75 : vector<8x8x1xf32>
    %77 = vector.broadcast %76 : vector<8x8x1xf32> to vector<8x8x8xf32>
    %78 = arith.mulf %69, %77 : vector<8x8x8xf32>
    "tpu.trace_start"() <{level = 10 : i32, message = "bqk,bkd->bqd"}> : () -> ()
    %cst_41 = arith.constant dense<0.000000e+00> : vector<8x8x64xf32>
    %79 = tpu.matmul %78, %60, %cst_41 {dimension_numbers = #tpu.dot_dimension_numbers<[2], [1], [1], [2], [0, 0, 0, 1, 1, 2], [0], [0]>} : vector<8x8x8xf32>, vector<8x8x64xf32>, vector<8x8x64xf32> -> vector<8x8x64xf32>
    "tpu.trace_stop"() : () -> ()
    %80 = vector.shape_cast %79 : vector<8x8x64xf32> to vector<64x64xf32>
    %c0_42 = arith.constant 0 : index
    %c0_43 = arith.constant 0 : index
    %c0_44 = arith.constant 0 : index
    %c0_45 = arith.constant 0 : index
    %81 = vector.load %arg6[%c0_42, %c0_43, %c0_44, %c0_45] : memref<1x2x64x128xf32, #tpu.memory_space<vmem>>, vector<1x1x64x128xf32>
    %82 = vector.shape_cast %81 : vector<1x1x64x128xf32> to vector<64x128xf32>
    %cst_46 = arith.constant dense<0.000000e+00> : vector<64x128xf32>
    %83 = tpu.matmul %80, %82, %cst_46 {dimension_numbers = #tpu.dot_dimension_numbers<[1], [0], [0], [1], [0, 0, 1, 1], [], []>} : vector<64x64xf32>, vector<64x128xf32>, vector<64x128xf32> -> vector<64x128xf32>
    %84 = arith.addf %36, %83 : vector<64x128xf32>
    %c0_47 = arith.constant 0 : index
    %c1 = arith.constant 1 : index
    %c0_48 = arith.constant 0 : index
    %c0_49 = arith.constant 0 : index
    %85 = vector.load %arg4[%c0_47, %c1, %c0_48, %c0_49] : memref<1x6x128x64xf32, #tpu.memory_space<vmem>>, vector<1x1x128x64xf32>
    %86 = vector.shape_cast %85 : vector<1x1x128x64xf32> to vector<128x64xf32>
    %cst_50 = arith.constant dense<0.000000e+00> : vector<64x64xf32>
    %87 = tpu.matmul %35, %86, %cst_50 {dimension_numbers = #tpu.dot_dimension_numbers<[1], [0], [0], [1], [0, 0, 1, 1], [], []>} : vector<64x128xf32>, vector<128x64xf32>, vector<64x64xf32> -> vector<64x64xf32>
    %c0_51 = arith.constant 0 : index
    %c1_52 = arith.constant 1 : index
    %c0_53 = arith.constant 0 : index
    %c0_54 = arith.constant 0 : index
    %88 = vector.load %arg5[%c0_51, %c1_52, %c0_53, %c0_54] : memref<1x6x1x64xf32, #tpu.memory_space<vmem>>, vector<1x1x1x64xf32>
    %89 = vector.shape_cast %88 : vector<1x1x1x64xf32> to vector<1x64xf32>
    %90 = vector.broadcast %89 : vector<1x64xf32> to vector<64x64xf32>
    %91 = arith.addf %87, %90 : vector<64x64xf32>
    %c0_55 = arith.constant 0 : index
    %c3 = arith.constant 3 : index
    %c0_56 = arith.constant 0 : index
    %c0_57 = arith.constant 0 : index
    %92 = vector.load %arg4[%c0_55, %c3, %c0_56, %c0_57] : memref<1x6x128x64xf32, #tpu.memory_space<vmem>>, vector<1x1x128x64xf32>
    %93 = vector.shape_cast %92 : vector<1x1x128x64xf32> to vector<128x64xf32>
    %cst_58 = arith.constant dense<0.000000e+00> : vector<64x64xf32>
    %94 = tpu.matmul %35, %93, %cst_58 {dimension_numbers = #tpu.dot_dimension_numbers<[1], [0], [0], [1], [0, 0, 1, 1], [], []>} : vector<64x128xf32>, vector<128x64xf32>, vector<64x64xf32> -> vector<64x64xf32>
    %c0_59 = arith.constant 0 : index
    %c3_60 = arith.constant 3 : index
    %c0_61 = arith.constant 0 : index
    %c0_62 = arith.constant 0 : index
    %95 = vector.load %arg5[%c0_59, %c3_60, %c0_61, %c0_62] : memref<1x6x1x64xf32, #tpu.memory_space<vmem>>, vector<1x1x1x64xf32>
    %96 = vector.shape_cast %95 : vector<1x1x1x64xf32> to vector<1x64xf32>
    %97 = vector.broadcast %96 : vector<1x64xf32> to vector<64x64xf32>
    %98 = arith.addf %94, %97 : vector<64x64xf32>
    %c0_63 = arith.constant 0 : index
    %c5 = arith.constant 5 : index
    %c0_64 = arith.constant 0 : index
    %c0_65 = arith.constant 0 : index
    %99 = vector.load %arg4[%c0_63, %c5, %c0_64, %c0_65] : memref<1x6x128x64xf32, #tpu.memory_space<vmem>>, vector<1x1x128x64xf32>
    %100 = vector.shape_cast %99 : vector<1x1x128x64xf32> to vector<128x64xf32>
    %cst_66 = arith.constant dense<0.000000e+00> : vector<64x64xf32>
    %101 = tpu.matmul %35, %100, %cst_66 {dimension_numbers = #tpu.dot_dimension_numbers<[1], [0], [0], [1], [0, 0, 1, 1], [], []>} : vector<64x128xf32>, vector<128x64xf32>, vector<64x64xf32> -> vector<64x64xf32>
    %c0_67 = arith.constant 0 : index
    %c5_68 = arith.constant 5 : index
    %c0_69 = arith.constant 0 : index
    %c0_70 = arith.constant 0 : index
    %102 = vector.load %arg5[%c0_67, %c5_68, %c0_69, %c0_70] : memref<1x6x1x64xf32, #tpu.memory_space<vmem>>, vector<1x1x1x64xf32>
    %103 = vector.shape_cast %102 : vector<1x1x1x64xf32> to vector<1x64xf32>
    %104 = vector.broadcast %103 : vector<1x64xf32> to vector<64x64xf32>
    %105 = arith.addf %101, %104 : vector<64x64xf32>
    %106 = vector.shape_cast %91 : vector<64x64xf32> to vector<8x8x64xf32>
    %107 = vector.shape_cast %98 : vector<64x64xf32> to vector<8x8x64xf32>
    %108 = vector.shape_cast %105 : vector<64x64xf32> to vector<8x8x64xf32>
    "tpu.trace_start"() <{level = 10 : i32, message = "bqd,bkd->bqk"}> : () -> ()
    %cst_71 = arith.constant dense<0.000000e+00> : vector<8x8x8xf32>
    %109 = tpu.matmul %106, %107, %cst_71 {dimension_numbers = #tpu.dot_dimension_numbers<[2], [2], [1], [1], [0, 0, 0, 1, 1, 1], [0], [0]>} : vector<8x8x64xf32>, vector<8x8x64xf32>, vector<8x8x8xf32> -> vector<8x8x8xf32>
    "tpu.trace_stop"() : () -> ()
    %110 = vector.shape_cast %11 : vector<8x8xf32> to vector<1x8x8xf32>
    %111 = vector.broadcast %110 : vector<1x8x8xf32> to vector<8x8x8xf32>
    %112 = arith.addf %109, %111 : vector<8x8x8xf32>
    %cst_72 = arith.constant dense<0xFF800000> : vector<8x8xf32>
    %113 = vector.multi_reduction <maximumf>, %112, %cst_72 [2] : vector<8x8x8xf32> to vector<8x8xf32>
    %114 = vector.shape_cast %113 : vector<8x8xf32> to vector<8x8x1xf32>
    %115 = vector.broadcast %114 : vector<8x8x1xf32> to vector<8x8x8xf32>
    %116 = arith.subf %112, %115 : vector<8x8x8xf32>
    %117 = math.exp %116 : vector<8x8x8xf32>
    %cst_73 = arith.constant dense<0.000000e+00> : vector<8x8xf32>
    %118 = vector.multi_reduction <add>, %117, %cst_73 [2] : vector<8x8x8xf32> to vector<8x8xf32>
    %119 = vector.shape_cast %118 : vector<8x8xf32> to vector<8x8x1xf32>
    %120 = tpu.reciprocal %119 {approx = true} : vector<8x8x1xf32> -> vector<8x8x1xf32>
    %121 = arith.mulf %119, %120 : vector<8x8x1xf32>
    %cst_74 = arith.constant 2.000000e+00 : f32
    %122 = vector.broadcast %cst_74 : f32 to vector<8x8x1xf32>
    %123 = arith.subf %122, %121 : vector<8x8x1xf32>
    %124 = arith.mulf %120, %123 : vector<8x8x1xf32>
    %125 = vector.broadcast %124 : vector<8x8x1xf32> to vector<8x8x8xf32>
    %126 = arith.mulf %117, %125 : vector<8x8x8xf32>
    "tpu.trace_start"() <{level = 10 : i32, message = "bqk,bkd->bqd"}> : () -> ()
    %cst_75 = arith.constant dense<0.000000e+00> : vector<8x8x64xf32>
    %127 = tpu.matmul %126, %108, %cst_75 {dimension_numbers = #tpu.dot_dimension_numbers<[2], [1], [1], [2], [0, 0, 0, 1, 1, 2], [0], [0]>} : vector<8x8x8xf32>, vector<8x8x64xf32>, vector<8x8x64xf32> -> vector<8x8x64xf32>
    "tpu.trace_stop"() : () -> ()
    %128 = vector.shape_cast %127 : vector<8x8x64xf32> to vector<64x64xf32>
    %c0_76 = arith.constant 0 : index
    %c1_77 = arith.constant 1 : index
    %c0_78 = arith.constant 0 : index
    %c0_79 = arith.constant 0 : index
    %129 = vector.load %arg6[%c0_76, %c1_77, %c0_78, %c0_79] : memref<1x2x64x128xf32, #tpu.memory_space<vmem>>, vector<1x1x64x128xf32>
    %130 = vector.shape_cast %129 : vector<1x1x64x128xf32> to vector<64x128xf32>
    %cst_80 = arith.constant dense<0.000000e+00> : vector<64x128xf32>
    %131 = tpu.matmul %128, %130, %cst_80 {dimension_numbers = #tpu.dot_dimension_numbers<[1], [0], [0], [1], [0, 0, 1, 1], [], []>} : vector<64x64xf32>, vector<64x128xf32>, vector<64x128xf32> -> vector<64x128xf32>
    %132 = arith.addf %84, %131 : vector<64x128xf32>
    %133 = arith.addf %3, %132 : vector<64x128xf32>
    %134 = vector.extract_strided_slice %5 {offsets = [2, 0], sizes = [1, 128], strides = [1, 1]} : vector<6x128xf32> to vector<1x128xf32>
    %135 = vector.broadcast %134 : vector<1x128xf32> to vector<64x128xf32>
    %136 = arith.addf %133, %135 : vector<64x128xf32>
    %137 = vector.extract_strided_slice %5 {offsets = [3, 0], sizes = [1, 128], strides = [1, 1]} : vector<6x128xf32> to vector<1x128xf32>
    %138 = vector.extract_strided_slice %5 {offsets = [4, 0], sizes = [1, 128], strides = [1, 1]} : vector<6x128xf32> to vector<1x128xf32>
    %cst_81 = arith.constant dense<0.000000e+00> : vector<64xf32>
    %139 = vector.multi_reduction <add>, %136, %cst_81 [1] : vector<64x128xf32> to vector<64xf32>
    %140 = vector.shape_cast %139 : vector<64xf32> to vector<64x1xf32>
    %cst_82 = arith.constant 1.280000e+02 : f32
    %141 = vector.broadcast %cst_82 : f32 to vector<64x1xf32>
    %142 = arith.divf %140, %141 : vector<64x1xf32>
    %143 = vector.broadcast %142 : vector<64x1xf32> to vector<64x128xf32>
    %144 = arith.subf %136, %143 : vector<64x128xf32>
    %145 = arith.mulf %144, %144 : vector<64x128xf32>
    %cst_83 = arith.constant dense<0.000000e+00> : vector<64xf32>
    %146 = vector.multi_reduction <add>, %145, %cst_83 [1] : vector<64x128xf32> to vector<64xf32>
    %147 = vector.shape_cast %146 : vector<64xf32> to vector<64x1xf32>
    %cst_84 = arith.constant 1.280000e+02 : f32
    %148 = vector.broadcast %cst_84 : f32 to vector<64x1xf32>
    %149 = arith.divf %147, %148 : vector<64x1xf32>
    %150 = vector.broadcast %142 : vector<64x1xf32> to vector<64x128xf32>
    %151 = arith.subf %136, %150 : vector<64x128xf32>
    %cst_85 = arith.constant 9.99999974E-6 : f32
    %152 = vector.broadcast %cst_85 : f32 to vector<64x1xf32>
    %153 = arith.addf %149, %152 : vector<64x1xf32>
    %154 = math.rsqrt %153 : vector<64x1xf32>
    %155 = vector.broadcast %154 : vector<64x1xf32> to vector<64x128xf32>
    %156 = arith.mulf %151, %155 : vector<64x128xf32>
    %157 = vector.broadcast %137 : vector<1x128xf32> to vector<64x128xf32>
    %158 = arith.mulf %156, %157 : vector<64x128xf32>
    %159 = vector.broadcast %138 : vector<1x128xf32> to vector<64x128xf32>
    %160 = arith.addf %158, %159 : vector<64x128xf32>
    %c0_86 = arith.constant 0 : index
    %c0_87 = arith.constant 0 : index
    %c0_88 = arith.constant 0 : index
    %161 = vector.load %arg8[%c0_86, %c0_87, %c0_88] : memref<1x128x512xf32, #tpu.memory_space<vmem>>, vector<1x128x512xf32>
    %162 = vector.shape_cast %161 : vector<1x128x512xf32> to vector<128x512xf32>
    %cst_89 = arith.constant dense<0.000000e+00> : vector<64x512xf32>
    %163 = tpu.matmul %160, %162, %cst_89 {dimension_numbers = #tpu.dot_dimension_numbers<[1], [0], [0], [1], [0, 0, 1, 1], [], []>} : vector<64x128xf32>, vector<128x512xf32>, vector<64x512xf32> -> vector<64x512xf32>
    %c0_90 = arith.constant 0 : index
    %c0_91 = arith.constant 0 : index
    %c0_92 = arith.constant 0 : index
    %164 = vector.load %arg9[%c0_90, %c0_91, %c0_92] : memref<1x1x512xf32, #tpu.memory_space<vmem>>, vector<1x1x512xf32>
    %165 = vector.shape_cast %164 : vector<1x1x512xf32> to vector<1x512xf32>
    %166 = vector.broadcast %165 : vector<1x512xf32> to vector<64x512xf32>
    %167 = arith.addf %163, %166 : vector<64x512xf32>
    %cst_93 = arith.constant 1.702000e+00 : f32
    %168 = vector.broadcast %cst_93 : f32 to vector<64x512xf32>
    %169 = arith.mulf %168, %167 : vector<64x512xf32>
    %170 = arith.negf %169 : vector<64x512xf32>
    %171 = math.exp %170 : vector<64x512xf32>
    %cst_94 = arith.constant 1.000000e+00 : f32
    %172 = vector.broadcast %cst_94 : f32 to vector<64x512xf32>
    %173 = arith.addf %172, %171 : vector<64x512xf32>
    %174 = arith.divf %172, %173 : vector<64x512xf32>
    %175 = arith.mulf %167, %174 : vector<64x512xf32>
    %c0_95 = arith.constant 0 : index
    %c0_96 = arith.constant 0 : index
    %c0_97 = arith.constant 0 : index
    %176 = vector.load %arg10[%c0_95, %c0_96, %c0_97] : memref<1x512x128xf32, #tpu.memory_space<vmem>>, vector<1x512x128xf32>
    %177 = vector.shape_cast %176 : vector<1x512x128xf32> to vector<512x128xf32>
    %cst_98 = arith.constant dense<0.000000e+00> : vector<64x128xf32>
    %178 = tpu.matmul %175, %177, %cst_98 {dimension_numbers = #tpu.dot_dimension_numbers<[1], [0], [0], [1], [0, 0, 1, 1], [], []>} : vector<64x512xf32>, vector<512x128xf32>, vector<64x128xf32> -> vector<64x128xf32>
    %179 = vector.extract_strided_slice %5 {offsets = [5, 0], sizes = [1, 128], strides = [1, 1]} : vector<6x128xf32> to vector<1x128xf32>
    %180 = vector.broadcast %179 : vector<1x128xf32> to vector<64x128xf32>
    %181 = arith.addf %178, %180 : vector<64x128xf32>
    %182 = arith.addf %136, %181 : vector<64x128xf32>
    %c0_99 = arith.constant 0 : index
    %c0_100 = arith.constant 0 : index
    %183 = vector.load %arg14[%c0_99, %c0_100] : memref<64x128xf32, #tpu.memory_space<vmem>>, vector<64x128xf32>
    tpu.vector_store %arg14[%c0_99, %c0_100], %182 {strides = array<i32>} : memref<64x128xf32, #tpu.memory_space<vmem>>, vector<64x128xf32>,
    %c1_i32 = arith.constant 1 : i32
    %184 = arith.cmpi eq, %arg1, %c1_i32 : i32
    %185 = arith.extui %184 : i1 to i32
    %c0_i32_101 = arith.constant 0 : i32
    %186 = arith.cmpi ne, %185, %c0_i32_101 : i32
    scf.if %186 {
      %c8_i32 = arith.constant 8 : i32
      %187 = arith.muli %arg0, %c8_i32 : i32
      %c0_i32_102 = arith.constant 0 : i32
      %188 = arith.addi %187, %c0_i32_102 : i32
      %189 = arith.index_cast %188 : i32 to index
      %190 = memref.load %arg2[%189] : memref<16xi32, #tpu.memory_space<smem>>
      %c0_i32_103 = arith.constant 0 : i32
      %191 = arith.addi %c0_i32_103, %190 : i32
      %192 = arith.index_cast %191 : i32 to index
      %c0_104 = arith.constant 0 : index
      %193 = vector.load %arg14[%192, %c0_104] : memref<64x128xf32, #tpu.memory_space<vmem>>, vector<1x128xf32>
      %c8_i32_105 = arith.constant 8 : i32
      %194 = arith.muli %arg0, %c8_i32_105 : i32
      %c1_i32_106 = arith.constant 1 : i32
      %195 = arith.addi %194, %c1_i32_106 : i32
      %196 = arith.index_cast %195 : i32 to index
      %197 = memref.load %arg2[%196] : memref<16xi32, #tpu.memory_space<smem>>
      %c8_i32_107 = arith.constant 8 : i32
      %198 = arith.addi %c8_i32_107, %197 : i32
      %199 = arith.index_cast %198 : i32 to index
      %c0_108 = arith.constant 0 : index
      %200 = vector.load %arg14[%199, %c0_108] : memref<64x128xf32, #tpu.memory_space<vmem>>, vector<1x128xf32>
      %c8_i32_109 = arith.constant 8 : i32
      %201 = arith.muli %arg0, %c8_i32_109 : i32
      %c2_i32 = arith.constant 2 : i32
      %202 = arith.addi %201, %c2_i32 : i32
      %203 = arith.index_cast %202 : i32 to index
      %204 = memref.load %arg2[%203] : memref<16xi32, #tpu.memory_space<smem>>
      %c16_i32 = arith.constant 16 : i32
      %205 = arith.addi %c16_i32, %204 : i32
      %206 = arith.index_cast %205 : i32 to index
      %c0_110 = arith.constant 0 : index
      %207 = vector.load %arg14[%206, %c0_110] : memref<64x128xf32, #tpu.memory_space<vmem>>, vector<1x128xf32>
      %c8_i32_111 = arith.constant 8 : i32
      %208 = arith.muli %arg0, %c8_i32_111 : i32
      %c3_i32 = arith.constant 3 : i32
      %209 = arith.addi %208, %c3_i32 : i32
      %210 = arith.index_cast %209 : i32 to index
      %211 = memref.load %arg2[%210] : memref<16xi32, #tpu.memory_space<smem>>
      %c24_i32 = arith.constant 24 : i32
      %212 = arith.addi %c24_i32, %211 : i32
      %213 = arith.index_cast %212 : i32 to index
      %c0_112 = arith.constant 0 : index
      %214 = vector.load %arg14[%213, %c0_112] : memref<64x128xf32, #tpu.memory_space<vmem>>, vector<1x128xf32>
      %c8_i32_113 = arith.constant 8 : i32
      %215 = arith.muli %arg0, %c8_i32_113 : i32
      %c4_i32 = arith.constant 4 : i32
      %216 = arith.addi %215, %c4_i32 : i32
      %217 = arith.index_cast %216 : i32 to index
      %218 = memref.load %arg2[%217] : memref<16xi32, #tpu.memory_space<smem>>
      %c32_i32 = arith.constant 32 : i32
      %219 = arith.addi %c32_i32, %218 : i32
      %220 = arith.index_cast %219 : i32 to index
      %c0_114 = arith.constant 0 : index
      %221 = vector.load %arg14[%220, %c0_114] : memref<64x128xf32, #tpu.memory_space<vmem>>, vector<1x128xf32>
      %c8_i32_115 = arith.constant 8 : i32
      %222 = arith.muli %arg0, %c8_i32_115 : i32
      %c5_i32 = arith.constant 5 : i32
      %223 = arith.addi %222, %c5_i32 : i32
      %224 = arith.index_cast %223 : i32 to index
      %225 = memref.load %arg2[%224] : memref<16xi32, #tpu.memory_space<smem>>
      %c40_i32 = arith.constant 40 : i32
      %226 = arith.addi %c40_i32, %225 : i32
      %227 = arith.index_cast %226 : i32 to index
      %c0_116 = arith.constant 0 : index
      %228 = vector.load %arg14[%227, %c0_116] : memref<64x128xf32, #tpu.memory_space<vmem>>, vector<1x128xf32>
      %c8_i32_117 = arith.constant 8 : i32
      %229 = arith.muli %arg0, %c8_i32_117 : i32
      %c6_i32 = arith.constant 6 : i32
      %230 = arith.addi %229, %c6_i32 : i32
      %231 = arith.index_cast %230 : i32 to index
      %232 = memref.load %arg2[%231] : memref<16xi32, #tpu.memory_space<smem>>
      %c48_i32 = arith.constant 48 : i32
      %233 = arith.addi %c48_i32, %232 : i32
      %234 = arith.index_cast %233 : i32 to index
      %c0_118 = arith.constant 0 : index
      %235 = vector.load %arg14[%234, %c0_118] : memref<64x128xf32, #tpu.memory_space<vmem>>, vector<1x128xf32>
      %c8_i32_119 = arith.constant 8 : i32
      %236 = arith.muli %arg0, %c8_i32_119 : i32
      %c7_i32 = arith.constant 7 : i32
      %237 = arith.addi %236, %c7_i32 : i32
      %238 = arith.index_cast %237 : i32 to index
      %239 = memref.load %arg2[%238] : memref<16xi32, #tpu.memory_space<smem>>
      %c56_i32 = arith.constant 56 : i32
      %240 = arith.addi %c56_i32, %239 : i32
      %241 = arith.index_cast %240 : i32 to index
      %c0_120 = arith.constant 0 : index
      %242 = vector.load %arg14[%241, %c0_120] : memref<64x128xf32, #tpu.memory_space<vmem>>, vector<1x128xf32>
      %243 = tpu.concatenate %193, %200, %207, %214, %221, %228, %235, %242 in 0 : vector<1x128xf32>, vector<1x128xf32>, vector<1x128xf32>, vector<1x128xf32>, vector<1x128xf32>, vector<1x128xf32>, vector<1x128xf32>, vector<1x128xf32> -> vector<8x128xf32>
      %c0_121 = arith.constant 0 : index
      %c0_122 = arith.constant 0 : index
      %244 = vector.load %arg11[%c0_121, %c0_122] : memref<2x128xf32, #tpu.memory_space<vmem>>, vector<1x128xf32>
      %c1_123 = arith.constant 1 : index
      %c0_124 = arith.constant 0 : index
      %245 = vector.load %arg11[%c1_123, %c0_124] : memref<2x128xf32, #tpu.memory_space<vmem>>, vector<1x128xf32>
      %cst_125 = arith.constant dense<0.000000e+00> : vector<8xf32>
      %246 = vector.multi_reduction <add>, %243, %cst_125 [1] : vector<8x128xf32> to vector<8xf32>
      %247 = vector.shape_cast %246 : vector<8xf32> to vector<8x1xf32>
      %cst_126 = arith.constant 1.280000e+02 : f32
      %248 = vector.broadcast %cst_126 : f32 to vector<8x1xf32>
      %249 = arith.divf %247, %248 : vector<8x1xf32>
      %250 = vector.broadcast %249 : vector<8x1xf32> to vector<8x128xf32>
      %251 = arith.subf %243, %250 : vector<8x128xf32>
      %252 = arith.mulf %251, %251 : vector<8x128xf32>
      %cst_127 = arith.constant dense<0.000000e+00> : vector<8xf32>
      %253 = vector.multi_reduction <add>, %252, %cst_127 [1] : vector<8x128xf32> to vector<8xf32>
      %254 = vector.shape_cast %253 : vector<8xf32> to vector<8x1xf32>
      %cst_128 = arith.constant 1.280000e+02 : f32
      %255 = vector.broadcast %cst_128 : f32 to vector<8x1xf32>
      %256 = arith.divf %254, %255 : vector<8x1xf32>
      %257 = vector.broadcast %249 : vector<8x1xf32> to vector<8x128xf32>
      %258 = arith.subf %243, %257 : vector<8x128xf32>
      %cst_129 = arith.constant 9.99999974E-6 : f32
      %259 = vector.broadcast %cst_129 : f32 to vector<8x1xf32>
      %260 = arith.addf %256, %259 : vector<8x1xf32>
      %261 = math.rsqrt %260 : vector<8x1xf32>
      %262 = vector.broadcast %261 : vector<8x1xf32> to vector<8x128xf32>
      %263 = arith.mulf %258, %262 : vector<8x128xf32>
      %264 = vector.broadcast %244 : vector<1x128xf32> to vector<8x128xf32>
      %265 = arith.mulf %263, %264 : vector<8x128xf32>
      %266 = vector.broadcast %245 : vector<1x128xf32> to vector<8x128xf32>
      %267 = arith.addf %265, %266 : vector<8x128xf32>
      %c0_130 = arith.constant 0 : index
      %c0_131 = arith.constant 0 : index
      %268 = vector.load %arg12[%c0_130, %c0_131] : memref<128x128xf32, #tpu.memory_space<vmem>>, vector<128x128xf32>
      %cst_132 = arith.constant dense<0.000000e+00> : vector<8x128xf32>
      %269 = tpu.matmul %267, %268, %cst_132 {dimension_numbers = #tpu.dot_dimension_numbers<[1], [0], [0], [1], [0, 0, 1, 1], [], []>} : vector<8x128xf32>, vector<128x128xf32>, vector<8x128xf32> -> vector<8x128xf32>
      %c0_133 = arith.constant 0 : index
      %c0_134 = arith.constant 0 : index
      %270 = vector.load %arg13[%c0_133, %c0_134] : memref<8x128xf32, #tpu.memory_space<vmem>>, vector<8x128xf32>
      tpu.vector_store %arg13[%c0_133, %c0_134], %269 {strides = array<i32>} : memref<8x128xf32, #tpu.memory_space<vmem>>, vector<8x128xf32>,
    } else {
    }
    return
  }
  func.func @transform_0(%arg0: i32, %arg1: i32, %arg2: memref<16xi32, #tpu.memory_space<smem>>) -> (i32, i32, i32) {
    %c0_i32 = arith.constant 0 : i32
    %c0_i32_0 = arith.constant 0 : i32
    %c0_i32_1 = arith.constant 0 : i32
    return %arg0, %c0_i32, %c0_i32_0 : i32, i32, i32
  }
  func.func @transform_1(%arg0: i32, %arg1: i32, %arg2: memref<16xi32, #tpu.memory_space<smem>>) -> (i32, i32, i32, i32) {
    %c0_i32 = arith.constant 0 : i32
    %c0_i32_0 = arith.constant 0 : i32
    %c0_i32_1 = arith.constant 0 : i32
    %c0_i32_2 = arith.constant 0 : i32
    return %arg1, %c0_i32, %c0_i32_0, %c0_i32_1 : i32, i32, i32, i32
  }
  func.func @transform_2(%arg0: i32, %arg1: i32, %arg2: memref<16xi32, #tpu.memory_space<smem>>) -> (i32, i32, i32, i32) {
    %c0_i32 = arith.constant 0 : i32
    %c0_i32_0 = arith.constant 0 : i32
    %c0_i32_1 = arith.constant 0 : i32
    %c0_i32_2 = arith.constant 0 : i32
    return %arg1, %c0_i32, %c0_i32_0, %c0_i32_1 : i32, i32, i32, i32
  }
  func.func @transform_3(%arg0: i32, %arg1: i32, %arg2: memref<16xi32, #tpu.memory_space<smem>>) -> (i32, i32, i32, i32) {
    %c0_i32 = arith.constant 0 : i32
    %c0_i32_0 = arith.constant 0 : i32
    %c0_i32_1 = arith.constant 0 : i32
    %c0_i32_2 = arith.constant 0 : i32
    return %arg1, %c0_i32, %c0_i32_0, %c0_i32_1 : i32, i32, i32, i32
  }
  func.func @transform_4(%arg0: i32, %arg1: i32, %arg2: memref<16xi32, #tpu.memory_space<smem>>) -> (i32, i32, i32) {
    %c0_i32 = arith.constant 0 : i32
    %c0_i32_0 = arith.constant 0 : i32
    %c0_i32_1 = arith.constant 0 : i32
    return %arg1, %c0_i32, %c0_i32_0 : i32, i32, i32
  }
  func.func @transform_5(%arg0: i32, %arg1: i32, %arg2: memref<16xi32, #tpu.memory_space<smem>>) -> (i32, i32, i32) {
    %c0_i32 = arith.constant 0 : i32
    %c0_i32_0 = arith.constant 0 : i32
    %c0_i32_1 = arith.constant 0 : i32
    return %arg1, %c0_i32, %c0_i32_0 : i32, i32, i32
  }
  func.func @transform_6(%arg0: i32, %arg1: i32, %arg2: memref<16xi32, #tpu.memory_space<smem>>) -> (i32, i32, i32) {
    %c0_i32 = arith.constant 0 : i32
    %c0_i32_0 = arith.constant 0 : i32
    %c0_i32_1 = arith.constant 0 : i32
    return %arg1, %c0_i32, %c0_i32_0 : i32, i32, i32
  }
  func.func @transform_7(%arg0: i32, %arg1: i32, %arg2: memref<16xi32, #tpu.memory_space<smem>>) -> (i32, i32, i32) {
    %c0_i32 = arith.constant 0 : i32
    %c0_i32_0 = arith.constant 0 : i32
    %c0_i32_1 = arith.constant 0 : i32
    return %arg1, %c0_i32, %c0_i32_0 : i32, i32, i32
  }
  func.func @transform_8(%arg0: i32, %arg1: i32, %arg2: memref<16xi32, #tpu.memory_space<smem>>) -> (i32, i32) {
    %c0_i32 = arith.constant 0 : i32
    %c0_i32_0 = arith.constant 0 : i32
    %c0_i32_1 = arith.constant 0 : i32
    return %c0_i32, %c0_i32_0 : i32, i32
  }
  func.func @transform_9(%arg0: i32, %arg1: i32, %arg2: memref<16xi32, #tpu.memory_space<smem>>) -> (i32, i32) {
    %c0_i32 = arith.constant 0 : i32
    %c0_i32_0 = arith.constant 0 : i32
    %c0_i32_1 = arith.constant 0 : i32
    return %c0_i32, %c0_i32_0 : i32, i32
  }
  func.func @transform_10(%arg0: i32, %arg1: i32, %arg2: memref<16xi32, #tpu.memory_space<smem>>) -> (i32, i32) {
    %c0_i32 = arith.constant 0 : i32
    %c0_i32_0 = arith.constant 0 : i32
    return %arg0, %c0_i32 : i32, i32
  }
}

</mosaic_0001>

<bundles_post_ra>
// kernel: clip_text_features.1
= control target key start
LH: loop header
LB: loop body
LE: loop exit
PB: predicated region body
PF: predicated region fallthrough
CT: control target
= control target key end

     0   :  { %s10103_s0 = inlined_call_operand.hbm [shape: s32[16], index: 0, kind: input, shape index: {}]   ;;  %s10104_s1 = inlined_call_operand.hbm [shape: f32[16,8,128], index: 1, kind: input, shape index: {}]   ;;  %s10105_s2 = inlined_call_operand.hbm [shape: f32[2,6,128,64], index: 2, kind: input, shape index: {}]   ;;  %s10106_s3 = inlined_call_operand.hbm [shape: f32[2,6,1,64], index: 3, kind: input, shape index: {}]   ;;  %s10107_s4 = inlined_call_operand.hbm [shape: f32[2,2,64,128], index: 4, kind: input, shape index: {}]   ;;  %s10108_s5 = inlined_call_operand.hbm [shape: f32[2,6,128], index: 5, kind: input, shape index: {}]   ;;  %s10109_s6 = inlined_call_operand.hbm [shape: f32[2,128,512], index: 6, kind: input, shape index: {}]   ;;  %s10110_s7 = inlined_call_operand.hbm [shape: f32[2,1,512], index: 7, kind: input, shape index: {}]   ;;  %s10111_s8 = inlined_call_operand.hbm [shape: f32[2,512,128], index: 8, kind: input, shape index: {}]   ;;  %s10112_s9 = inlined_call_operand.hbm [shape: f32[2,128], index: 9, kind: input, shape index: {}]   ;;  %s10113_s10 = inlined_call_operand.hbm [shape: f32[128,128], index: 10, kind: input, shape index: {}]   ;;  %s10114_s11 = inlined_call_operand.hbm [shape: f32[16,128], index: 11, kind: output, shape index: {}]  }
   0x1   :  { %10163 = sst [smem:[#allocation53_spill]] %s10104_s1  ;;  %s7895_s19 = scalar_lea.hbm %s10103_s0, 16 }
   0x2   :  { %10164 = sst [smem:[#allocation54_spill]] %s10105_s2  ;;  %p7896_p0 = scmp.ne.s32.totalorder %s10103_s0, %s7895_s19 }
   0x3   :  { %10165 = sst [smem:[#allocation55_spill]] %s10106_s3  ;;  %p7899_p1 = scmp.lt.u32.totalorder %s7895_s19, %s10103_s0 }
   0x4   :  { %10166 = sst [smem:[#allocation56_spill]] %s10107_s4 }
   0x5   :  { %10167 = sst [smem:[#allocation57_spill]] %s10108_s5  ;;  %p7901_p2 = pnand %p7899_p1, %p7896_p0 }
   0x6   :  { %10168 = sst [smem:[#allocation58_spill]] %s10109_s6 }
   0x7   :  { %10169 = sst [smem:[#allocation59_spill]] %s10110_s7 }
   0x8   :  { %10170 = sst [smem:[#allocation60_spill]] %s10112_s9 }
   0x9   :  { %10171 = sst [smem:[#allocation61_spill]] %s10113_s10 }
   0xa   :  { %10172 = sst [smem:[#allocation62_spill]] %s10114_s11 }
   0xb   :  { %7904 = shalt.err (!%p7901_p2)  }
   0xc   :  { %s8351_s24 = smov [#allocation4]  }
   0xd   :  { %17 = dma.hbm_to_smem %s10103_s0, 16, %s8351_s24, [#allocation3] }
   0xe   :  { %8273 = dma.done.wait [#allocation3], 16 }
   0xf   :  { %8274 = vsyncadd [#allocation3], 4294967280 }
  0x10   :  { %19 = sfence }
  0x11   :  { %20 = vsyncpa [#allocation6], 0 }
  0x12   :  { %22 = vsyncpa [#allocation6 + $0x1], 0 }
  0x13   :  { %23 = vsyncpa [#allocation9], 0 }
  0x14   :  { %25 = vsyncpa [#allocation9 + $0x1], 0 }
  0x15   :  { %26 = vsyncpa [#allocation12], 0 }
  0x16   :  { %28 = vsyncpa [#allocation12 + $0x1], 0 }
  0x17   :  { %29 = vsyncpa [#allocation15], 0 }
  0x18   :  { %31 = vsyncpa [#allocation15 + $0x1], 0 }
  0x19   :  { %32 = vsyncpa [#allocation18], 0 }
  0x1a   :  { %34 = vsyncpa [#allocation18 + $0x1], 0 }
  0x1b   :  { %35 = vsyncpa [#allocation21], 0 }
  0x1c   :  { %36 = vsyncpa [#allocation7], 0 }
  0x1d   :  { %38 = vsyncpa [#allocation7 + $0x1], 0  ;;  %s8447_s27 = smov 0   ;;  %s8449_s28 = smov 0  }
  0x1e   :  { %s8451_s0 = smov 0   ;;  %s8453_s29 = smov 0  }
  0x1f   :  { %s8455_s30 = smov 0   ;;  %s8457_s12 = smov 0  }
  0x20   :  { %s8459_s13 = smov 0   ;;  %s8461_s14 = smov 0  }
  0x21   :  { %s8463_s15 = smov 0   ;;  %s8465_s16 = smov 0  }
  0x22   :  { %s8467_s17 = smov 0  }
  0x23 LB: > { %10173 = sst [smem:[#allocation32_spill]] %s8313_s28  ;;  %s8501_s18 = sadd.s32 4294967295, %s8349_s17   ;;  %s8349_s17 = sphi %s8467_s17, %s44_s17   ;;  %s8345_s16 = sphi %s8465_s16, %s10266_s16   ;;  %s8341_s15 = sphi %s8463_s15, %s10270_s15   ;;  %s8337_s14 = sphi %s8461_s14, %s10264_s14   ;;  %s8333_s13 = sphi %s8459_s13, %s10269_s13   ;;  %s8329_s12 = sphi %s8457_s12, %s10263_s12   ;;  %s8325_s30 = sphi %s8455_s30, %s10268_s30   ;;  %s8321_s29 = sphi %s8453_s29, %s10267_s29   ;;  %s8317_s0 = sphi %s8451_s0, %s10261_s0   ;;  %s8313_s28 = sphi %s8449_s28, %s10260_s28   ;;  %s8309_s27 = sphi %s8447_s27, %s10259_s27  }
  0x24   : > { %10174 = sst [smem:[#allocation33_spill]] %s8317_s0  ;;  %s5964_s19 = sadd.s32 4294967294, %s8349_s17  }
  0x25   : > { %10175 = sst [smem:[#allocation34_spill]] %s8321_s29  ;;  %p10122_p3 = scmp.eq.s32.totalorder %s8349_s17, 0 }
  0x26   : > { %10176 = sst [smem:[#allocation35_spill]] %s8329_s12  ;;  %p76_p4 = scmp.ne.s32.totalorder %s8325_s30, %s8321_s29 }
  0x27   : > { %10177 = sst [smem:[#allocation36_spill]] %s8333_s13  ;;  %p10118_p5 = scmp.eq.s32.totalorder %s8501_s18, 0 }
  0x28   : > { %10178 = sst [smem:[#allocation37_spill]] %s8337_s14  ;;  %p96_p6 = scmp.ne.s32.totalorder %s8317_s0, %s8313_s28 }
  0x29   : > { %10179 = sst [smem:[#allocation38_spill]] %s8345_s16  ;;  %p102_p7 = scmp.ne.s32.totalorder %s8313_s28, %s8309_s27 }
  0x2a   : > { %p8514_p8 = por %p10118_p5, %p76_p4  ;;  %p8521_p10 = por %p96_p6, %p10122_p3 }
  0x2b   : > { %p8527_p11 = por %p102_p7, %p10118_p5  ;;  %p330_p12 = scmp.eq.s32.totalorder %s5964_s19, 3 }
  0x2c   : > { %s10180_s21 = scalar_select %p8514_p8, 1, 0 }
  0x2d   : > { %s10183_s23 = scalar_select %p8527_p11, 1, 0 }
  0x2e   : > { %10181 = sst [smem:[#allocation39_spill]] %s10180_s21  ;;  %p5965_p13 = scmp.ge.s32.totalorder %s8349_s17, 1 }
  0x2f   : > { %10184 = sst [smem:[#allocation40_spill]] %s10183_s23  ;;  %p337_p0 = scmp.lt.s32.totalorder %s8349_s17, 5 }
  0x30   : > { %p8533_p1 = por %p330_p12, %p76_p4  ;;  %s8352_s26 = smov [#allocation19]  }
  0x31   : > { %p8537_p2 = pnand %p5965_p13, %p337_p0  ;;  %s350_s27 = sshll.u32 %s8352_s26, 4  ;;  %s351_s27 = int_to_ptr.vmem [resolvable:$true] %s350_s27 }
  0x32   : > { %s10185_s24 = scalar_select %p8533_p1, 1, 0 }
  0x33   : > { %s10187_s25 = scalar_select %p8537_p2, 1, 0 }
  0x34   : > { %10186 = sst [smem:[#allocation41_spill]] %s10185_s24  ;;  %p7514_p6 = pneg %p8537_p2 }
  0x35   : > { %10188 = sst [smem:[#allocation42_spill]] %s10187_s25  ;;  %p10121_p7 = scmp.lt.s32.totalorder %s8349_s17, 4 }
  0x36   : > { %p8546_p9 = pnand %p7514_p6, %p10118_p5  ;;  %s10192_s9 = sld [smem:[#allocation60_spill]] }
  0x37   : > { %p8554_p4 = pnand %p10121_p7, %p8521_p10 }
  0x38   : > { %s10189_s19 = scalar_select %p8546_p9, 1, 0 }
  0x39   : > { %s10190_s20 = scalar_select %p8554_p4, 1, 0 }
  0x3a   : > { %p10131_p13 = pneg %p8546_p9 }
  0x3b   : > { %10191 = sst [smem:[#allocation43_spill]] %s10190_s20 }
  0x3c   : > { %s7905_s26 = scalar_lea.hbm %s10192_s9, 32 }
  0x3d   : > { %p7906_p12 = scmp.ne.s32.totalorder %s10192_s9, %s7905_s26  ;;  %p7912_p10 = scmp.lt.u32.totalorder %s7905_s26, %s10192_s9 }
  0x3f   : > { %p7908_p0 = pnand %p10131_p13, %p7906_p12 }
  0x41   : > { %p7909_p6 = pneg %p7908_p0 }
  0x43   : > { %p7914_p5 = pnand %p7912_p10, %p7909_p6 }
  0x45   : > { %7917 = shalt.err (!%p7914_p5)
}
  0x46   : > { %s7918_s23 = scalar_lea.vmem %s351_s27, 32  ;;  %p7926_p11 = scmp.lt.s32.totalorder %s351_s27, %s351_s27 }
  0x47   : > { %p7919_p7 = scmp.ne.s32.totalorder %s351_s27, %s7918_s23  ;;  %p7927_p8 = scmp.lt.s32.totalorder %s7918_s23, %s7918_s23 }
  0x49   : > { %p7921_p3 = pnand %p7919_p7, %p10131_p13  ;;  %p7928_p2 = por %p7927_p8, %p7926_p11 }
  0x4b   : > { %p7922_p1 = pneg %p7921_p3 }
  0x4d   : > { %p7929_p4 = pnand %p7928_p2, %p7922_p1 }
  0x4f   : > { %7932 = shalt.err (!%p7929_p4)
}
  0x50   : > { %7517 = dma.hbm_to_vmem [thread:$0]  (!%p8546_p9), %s10192_s9, 32, %s351_s27, [#allocation18]  }
  0x51   : > { %s8581_s13 = sand.u32 1, %s8349_s17   ;;  %s8584_s14 = sand.u32 1, %s8317_s0  }
  0x52   : > { %10193 = sst [smem:[#allocation44_spill]] %s8581_s13  ;;  %s7482_s23 = smul.u32 768, %s8584_s14 }
  0x53   : > { %s7483_s24 = smul.u32 12288, %s8341_s15  ;;  %s10194_s2 = sld [smem:[#allocation54_spill]] }
  0x54   : > { %s399_s27 = scalar_lea.vmem [#allocation8], %s7482_s23  ;;  %s10137_s29 = scalar_lea.sflag [#allocation9], %s8581_s13 }
  0x55   : > { %s406_s11 = sshll.u32 %s399_s27, 4  ;;  %p10195_p5 = scmp.ne.s32.totalorder %s10190_s20, 0  ;;  %s8594_s11 = int_to_ptr.vmem [resolvable:$true] %s406_s11 }
  0x57   : > { %p8601_p8 = pneg %p10195_p5 }
  0x59   : > { %s8592_s21 = scalar_lea.hbm %s10194_s2, %s7483_s24  ;;  %s7938_s22 = scalar_lea.hbm %s10194_s2, 24576 }
  0x5a   : > { %s7933_s9 = scalar_lea.hbm %s8592_s21, 12288  ;;  %p7939_p2 = scmp.lt.u32.totalorder %s8592_s21, %s10194_s2 }
  0x5b   : > { %p7934_p3 = scmp.ne.s32.totalorder %s8592_s21, %s7933_s9  ;;  %p7940_p7 = scmp.lt.u32.totalorder %s7938_s22, %s7933_s9 }
  0x5c   : > { %s10196_s25 = scalar_select %p8601_p8, 1, 0 }
  0x5d   : > { %p7936_p11 = pnand %p8601_p8, %p7934_p3  ;;  %p7941_p4 = por %p7940_p7, %p7939_p2 }
  0x5e   : > { %p7942_p12 = scmp.lt.u32.totalorder %s7933_s9, %s8592_s21 }
  0x5f   : > { %p7937_p1 = pneg %p7936_p11 }
  0x60   : > { %p7943_p0 = por %p7942_p12, %p7941_p4 }
  0x62   : > { %p7944_p6 = pnand %p7943_p0, %p7937_p1 }
  0x64   : > { %7947 = shalt.err (!%p7944_p6)
}
  0x65   : > { %s7948_s26 = scalar_lea.vmem %s8594_s11, 12288  ;;  %s8353_s28 = smov [#allocation8]  }
  0x66   : > { %p7949_p10 = scmp.ne.s32.totalorder %s8594_s11, %s7948_s26  ;;  %s7953_s24 = sshll.u32 %s8353_s28, 4  ;;  %s7954_s24 = int_to_ptr.vmem [resolvable:$false] %s7953_s24 }
  0x67   : > { %s7955_s23 = scalar_lea.vmem %s7954_s24, 24576  ;;  %p7956_p13 = scmp.lt.s32.totalorder %s8594_s11, %s7954_s24 }
  0x68   : > { %p7951_p3 = pnand %p7949_p10, %p8601_p8  ;;  %p7957_p9 = scmp.lt.s32.totalorder %s7955_s23, %s7948_s26 }
  0x6a   : > { %p7952_p11 = pneg %p7951_p3  ;;  %p7958_p2 = por %p7957_p9, %p7956_p13 }
  0x6c   : > { %p7959_p7 = pnand %p7958_p2, %p7952_p11 }
  0x6e   : > { %7962 = shalt.err (!%p7959_p7)
}
  0x6f   : > { %s10139_s9 = smov 128   ;;  %s10141_s22 = smov 8  }
  0x70   : > { %7527 = dma.hbm_to_vmem [thread:$0]  (!%p10195_p5), %s8592_s21, 12288, %s8594_s11, %s10137_s29, %s10139_s9, %s10139_s9, %s10141_s22  }
  0x71   : > { %s6210_s26 = sshll.u32 %s8341_s15, 11  ;;  %s10197_s27 = sshll.u32 %s8584_s14, 7 }
  0x72   : > { %s441_s28 = scalar_lea.vmem [#allocation11], %s10197_s27  ;;  %s10198_s4 = sld [smem:[#allocation56_spill]] }
  0x73   : > { %s448_s24 = sshll.u32 %s441_s28, 4  ;;  %s10138_s5 = scalar_lea.sflag [#allocation12], %s8581_s13  ;;  %s8637_s24 = int_to_ptr.vmem [resolvable:$true] %s448_s24 }
  0x78   : > { %s8635_s7 = scalar_lea.hbm %s10198_s4, %s6210_s26  ;;  %s7968_s27 = scalar_lea.hbm %s10198_s4, 4096 }
  0x79   : > { %s7963_s3 = scalar_lea.hbm %s8635_s7, 2048  ;;  %p7969_p4 = scmp.lt.u32.totalorder %s8635_s7, %s10198_s4 }
  0x7a   : > { %p7964_p9 = scmp.ne.s32.totalorder %s8635_s7, %s7963_s3  ;;  %p7970_p12 = scmp.lt.u32.totalorder %s7968_s27, %s7963_s3 }
  0x7b   : > { %p7972_p6 = scmp.lt.u32.totalorder %s7963_s3, %s8635_s7 }
  0x7c   : > { %p7966_p13 = pnand %p7964_p9, %p8601_p8  ;;  %p7971_p0 = por %p7970_p12, %p7969_p4 }
  0x7e   : > { %p7967_p1 = pneg %p7966_p13  ;;  %p7973_p10 = por %p7972_p6, %p7971_p0 }
  0x80   : > { %p7974_p3 = pnand %p7973_p10, %p7967_p1 }
  0x82   : > { %7977 = shalt.err (!%p7974_p3)
}
  0x83   : > { %s7978_s26 = scalar_lea.vmem %s8637_s24, 2048  ;;  %s8356_s23 = smov [#allocation11]  }
  0x84   : > { %p7979_p11 = scmp.ne.s32.totalorder %s8637_s24, %s7978_s26  ;;  %s7983_s21 = sshll.u32 %s8356_s23, 4  ;;  %s7984_s21 = int_to_ptr.vmem [resolvable:$false] %s7983_s21 }
  0x85   : > { %s7985_s11 = scalar_lea.vmem %s7984_s21, 4096  ;;  %p7986_p9 = scmp.lt.s32.totalorder %s8637_s24, %s7984_s21 }
  0x86   : > { %p7981_p2 = pnand %p7979_p11, %p8601_p8  ;;  %p7987_p13 = scmp.lt.s32.totalorder %s7985_s11, %s7978_s26 }
  0x88   : > { %p7982_p7 = pneg %p7981_p2  ;;  %p7988_p4 = por %p7987_p13, %p7986_p9 }
  0x8a   : > { %p7989_p12 = pnand %p7988_p4, %p7982_p7 }
  0x8c   : > { %7992 = shalt.err (!%p7989_p12)
}
  0x8d   : > { %7533 = dma.hbm_to_vmem [thread:$0]  (!%p10195_p5), %s8635_s7, 2048, %s8637_s24, %s10138_s5, %s10139_s9, %s10139_s9, %s10141_s22  }
  0x8e   : > { %s5979_s3 = sshll.u32 %s8584_s14, 9  ;;  %s6211_s27 = sshll.u32 %s8341_s15, 13 }
  0x8f   : > { %s10199_s6 = sld [smem:[#allocation58_spill]]  ;;  %s480_s23 = scalar_lea.vmem [#allocation14], %s5979_s3 }
  0x90   : > { %s487_s21 = sshll.u32 %s480_s23, 4  ;;  %s10150_s11 = scalar_lea.sflag [#allocation15], %s8581_s13  ;;  %s8677_s21 = int_to_ptr.vmem [resolvable:$true] %s487_s21 }
  0x95   : > { %s8673_s26 = scalar_lea.hbm %s10199_s6, %s6211_s27  ;;  %s7998_s28 = scalar_lea.hbm %s10199_s6, 16384 }
  0x96   : > { %s7993_s29 = scalar_lea.hbm %s8673_s26, 8192  ;;  %p7999_p10 = scmp.lt.u32.totalorder %s8673_s26, %s10199_s6 }
  0x97   : > { %p7994_p1 = scmp.ne.s32.totalorder %s8673_s26, %s7993_s29  ;;  %p8000_p3 = scmp.lt.u32.totalorder %s7998_s28, %s7993_s29 }
  0x98   : > { %p8002_p2 = scmp.lt.u32.totalorder %s7993_s29, %s8673_s26 }
  0x99   : > { %p7996_p0 = pnand %p7994_p1, %p8601_p8  ;;  %p8001_p11 = por %p8000_p3, %p7999_p10 }
  0x9b   : > { %p7997_p6 = pneg %p7996_p0  ;;  %p8003_p7 = por %p8002_p2, %p8001_p11 }
  0x9d   : > { %p8004_p9 = pnand %p8003_p7, %p7997_p6 }
  0x9f   : > { %8007 = shalt.err (!%p8004_p9)
}
  0xa0   : > { %s8008_s23 = scalar_lea.vmem %s8677_s21, 8192  ;;  %s8357_s7 = smov [#allocation14]  }
  0xa1   : > { %p8009_p13 = scmp.ne.s32.totalorder %s8677_s21, %s8008_s23  ;;  %s8013_s24 = sshll.u32 %s8357_s7, 4  ;;  %s8014_s24 = int_to_ptr.vmem [resolvable:$false] %s8013_s24 }
  0xa2   : > { %s8015_s5 = scalar_lea.vmem %s8014_s24, 16384  ;;  %p8016_p1 = scmp.lt.s32.totalorder %s8677_s21, %s8014_s24 }
  0xa3   : > { %p8011_p4 = pnand %p8009_p13, %p8601_p8  ;;  %p8017_p0 = scmp.lt.s32.totalorder %s8015_s5, %s8008_s23 }
  0xa5   : > { %p8012_p12 = pneg %p8011_p4  ;;  %p8018_p10 = por %p8017_p0, %p8016_p1 }
  0xa7   : > { %p8019_p3 = pnand %p8018_p10, %p8012_p12 }
  0xa9   : > { %8022 = shalt.err (!%p8019_p3)
}
  0xaa   : > { %s8358_s29 = smov 512   ;;  %s8359_s28 = smov 32  }
  0xab   : > { %7539 = dma.hbm_to_vmem [thread:$0]  (!%p10195_p5), %s8673_s26, 8192, %s8677_s21, %s10150_s11, %s8358_s29, %s8358_s29, %s8359_s28  }
  0xac   : > { %s8708_s23 = scalar_lea.hbm %s10111_s8, %s6211_s27  ;;  %s520_s24 = scalar_lea.vmem [#allocation17], %s5979_s3 }
  0xad   : > { %s527_s5 = sshll.u32 %s520_s24, 4  ;;  %s8360_s9 = smov [#allocation20]   ;;  %s8712_s5 = int_to_ptr.vmem [resolvable:$true] %s527_s5 }
  0xae   : > { %s360_s22 = sshll.u32 %s8360_s9, 4  ;;  %s10200_s10 = sld [smem:[#allocation61_spill]]  ;;  %s361_s22 = int_to_ptr.vmem [resolvable:$true] %s360_s22 }
  0xaf   : > { %p10201_p11 = scmp.ne.s32.totalorder %s10189_s19, 0 }
  0xb1   : > { %p10202_p2 = pneg %p10201_p11 }
  0xb4   : > { %s8023_s20 = scalar_lea.hbm %s10200_s10, 2048 }
  0xb5   : > { %p8024_p6 = scmp.ne.s32.totalorder %s10200_s10, %s8023_s20  ;;  %p8030_p13 = scmp.lt.u32.totalorder %s8023_s20, %s10200_s10 }
  0xb7   : > { %p8026_p7 = pnand %p8024_p6, %p10202_p2 }
  0xb9   : > { %p8027_p9 = pneg %p8026_p7 }
  0xbb   : > { %p8032_p4 = pnand %p8030_p13, %p8027_p9 }
  0xbd   : > { %8035 = shalt.err (!%p8032_p4)
}
  0xbe   : > { %s8036_s9 = scalar_lea.vmem %s361_s22, 2048  ;;  %p10203_p1 = pmov %p10202_p2 }
  0xbf   : > { %p8037_p12 = scmp.ne.s32.totalorder %s361_s22, %s8036_s9  ;;  %p8044_p3 = scmp.lt.s32.totalorder %s361_s22, %s361_s22 }
  0xc0   : > { %p8045_p5 = scmp.lt.s32.totalorder %s8036_s9, %s8036_s9 }
  0xc1   : > { %p8039_p0 = pnand %p8037_p12, %p10203_p1 }
  0xc2   : > { %p8046_p8 = por %p8045_p5, %p8044_p3 }
  0xc3   : > { %p8040_p10 = pneg %p8039_p0 }
  0xc5   : > { %p8047_p2 = pnand %p8046_p8, %p8040_p10 }
  0xc7   : > { %8050 = shalt.err (!%p8047_p2)
}
  0xc8   : > { %s10204_s4 = smov 8   ;;  %s10205_s6 = smov 128  }
  0xc9   : > { %7520 = dma.hbm_to_vmem [thread:$0]  (!%p10201_p11), %s10200_s10, 2048, %s361_s22, [#allocation21], %s10205_s6, %s10205_s6, %s10204_s4  }
  0xca   : > { %s53_s19 = sadd.s32 1, %s8341_s15  ;;  %s56_s21 = sadd.s32 1, %s8345_s16 }
  0xcb   : > { %p54_p5 = scmp.ge.s32.totalorder %s53_s19, 2  ;;  %s63_s29 = sadd.s32 1, %s8329_s12 }
  0xcc   : > { %p70_p8 = scmp.ne.s32.totalorder %s8329_s12, %s8325_s30  ;;  %s374_s28 = sand.u32 1, %s8329_s12  }
  0xcd   : > { %s10272_s19 = smov (%p54_p5, %s53_s19), 0  ;;  %s10274_s21 = smov (!%p54_p5, %s56_s21), %s8345_s16 }
  0xce   : > { %10206 = sst [smem:[#allocation45_spill]] %s10272_s19  ;;  %p10207_p6 = scmp.eq.s32.totalorder %s8349_s17, 0 }
  0xcf   : > { %s86_s22 = ssub.s32 %s8341_s15, %s10272_s19  ;;  %p58_p11 = scmp.ge.s32.totalorder %s10274_s21, 2 }
  0xd0   : > { %p8748_p7 = por %p10207_p6, %p70_p8  ;;  %p87_p9 = scmp.eq.s32.totalorder %s86_s22, 0 }
  0xd1   : > { %p10209_p13 = scmp.eq.s32.totalorder %s8501_s18, 3  ;;  %s10276_s21 = smov (%p58_p11, %s10274_s21), 0 }
  0xd2   : > { %10211 = sst [smem:[#allocation46_spill]] %s10276_s21  ;;  %s10212_s24 = sadd.s32 1, %s8317_s0 }
  0xd3   : > { %p8756_p4 = por %p10209_p13, %p70_p8  ;;  %s60_s27 = ssub.s32 %s8345_s16, %s10276_s21 }
  0xd4   : > { %s8765_s26 = scalar_select %p87_p9, %s8317_s0, %s10212_s24  }
  0xd5   : > { %s10210_s7 = scalar_select %p8756_p4, 1, 0 }
  0xd6   : > { %10213 = sst [smem:[#allocation47_spill]] %s8765_s26  ;;  %s5969_s3 = sshll.u32 %s374_s28, 6 }
  0xd7   : > { %p61_p12 = scmp.eq.s32.totalorder %s60_s27, 0  ;;  %s6209_s9 = sshll.u32 %s8345_s16, 10 }
  0xd8   : > { %s378_s20 = scalar_lea.vmem [#allocation5], %s5969_s3  ;;  %s10215_s1 = sld [smem:[#allocation53_spill]] }
  0xd9   : > { %s385_s13 = sshll.u32 %s378_s20, 4  ;;  %p10216_p1 = scmp.lt.s32.totalorder %s8349_s17, 4  ;;  %s8778_s13 = int_to_ptr.vmem [resolvable:$true] %s385_s13 }
  0xda   : > { %s8771_s11 = scalar_select %p61_p12, %s8329_s12, %s63_s29  }
  0xdb   : > { %p8784_p0 = pnand %p10216_p1, %p8748_p7  ;;  %s7484_s29 = smul.u32 6, %s8584_s14 }
  0xdc   : > { %10214 = sst [smem:[#allocation48_spill]] %s8771_s11  ;;  %s7485_s27 = smul.u32 96, %s8341_s15 }
  0xdd   : > { %s8790_s3 = scalar_lea.sflag [#allocation6], %s374_s28  ;;  %p8053_p3 = pneg %p8784_p0 }
  0xde   : > { %s8776_s19 = scalar_lea.hbm %s10215_s1, %s6209_s9  ;;  %s8056_s20 = scalar_lea.hbm %s10215_s1, 2048 }
  0xdf   : > { %s8051_s10 = scalar_lea.hbm %s8776_s19, 1024  ;;  %p8057_p8 = scmp.lt.u32.totalorder %s8776_s19, %s10215_s1 }
  0xe0   : > { %p8052_p10 = scmp.ne.s32.totalorder %s8776_s19, %s8051_s10  ;;  %p8058_p6 = scmp.lt.u32.totalorder %s8056_s20, %s8051_s10 }
  0xe1   : > { %p8060_p11 = scmp.lt.u32.totalorder %s8051_s10, %s8776_s19 }
  0xe2   : > { %p8054_p2 = pnand %p8053_p3, %p8052_p10  ;;  %p8059_p7 = por %p8058_p6, %p8057_p8 }
  0xe4   : > { %p8055_p5 = pneg %p8054_p2  ;;  %p8061_p9 = por %p8060_p11, %p8059_p7 }
  0xe6   : > { %p8062_p13 = pnand %p8061_p9, %p8055_p5 }
  0xe8   : > { %8065 = shalt.err (!%p8062_p13)
}
  0xe9   : > { %s8066_s28 = scalar_lea.vmem %s8778_s13, 1024  ;;  %s8361_s2 = smov [#allocation5]  }
  0xea   : > { %p8067_p12 = scmp.ne.s32.totalorder %s8778_s13, %s8066_s28  ;;  %s8071_s9 = sshll.u32 %s8361_s2, 4  ;;  %s8072_s9 = int_to_ptr.vmem [resolvable:$false] %s8071_s9 }
  0xeb   : > { %s8073_s21 = scalar_lea.vmem %s8072_s9, 2048  ;;  %p8074_p2 = scmp.lt.s32.totalorder %s8778_s13, %s8072_s9 }
  0xec   : > { %p8069_p1 = pnand %p8067_p12, %p8053_p3  ;;  %p8075_p8 = scmp.lt.s32.totalorder %s8073_s21, %s8066_s28 }
  0xee   : > { %p8070_p10 = pneg %p8069_p1  ;;  %p8076_p6 = por %p8075_p8, %p8074_p2 }
  0xf0   : > { %p8077_p7 = pnand %p8076_p6, %p8070_p10 }
  0xf2   : > { %8080 = shalt.err (!%p8077_p7)
}
  0xf3   : > { %7524 = dma.hbm_to_vmem [thread:$0]  (!%p8784_p0), %s8776_s19, 1024, %s8778_s13, %s8790_s3, %s10205_s6, %s10205_s6, %s10204_s4  }
  0xf4   : > { %s10218_s22 = sld [smem:[#allocation55_spill]]  ;;  %s420_s24 = scalar_lea.vmem [#allocation10], %s7484_s29 }
  0xf5   : > { %s427_s2 = sshll.u32 %s420_s24, 4  ;;  %p10219_p5 = scmp.ne.s32.totalorder %s10196_s25, 0  ;;  %s8830_s2 = int_to_ptr.vmem [resolvable:$true] %s427_s2 }
  0xfa   : > { %s8826_s28 = scalar_lea.hbm %s10218_s22, %s7485_s27  ;;  %s8086_s3 = scalar_lea.hbm %s10218_s22, 192 }
  0xfb   : > { %s8081_s9 = scalar_lea.hbm %s8826_s28, 96  ;;  %p8087_p9 = scmp.lt.u32.totalorder %s8826_s28, %s10218_s22 }
  0xfc   : > { %p8082_p3 = scmp.ne.s32.totalorder %s8826_s28, %s8081_s9  ;;  %p8088_p13 = scmp.lt.u32.totalorder %s8086_s3, %s8081_s9 }
  0xfd   : > { %p8090_p1 = scmp.lt.u32.totalorder %s8081_s9, %s8826_s28 }
  0xfe   : > { %p8084_p11 = pnand %p8082_p3, %p10219_p5  ;;  %p8089_p12 = por %p8088_p13, %p8087_p9 }
 0x100   : > { %p8085_p0 = pneg %p8084_p11  ;;  %p8091_p10 = por %p8090_p1, %p8089_p12 }
 0x102   : > { %p8092_p2 = pnand %p8091_p10, %p8085_p0 }
 0x104   : > { %8095 = shalt.err (!%p8092_p2)
}
 0x105   : > { %s8096_s29 = scalar_lea.vmem %s8830_s2, 96  ;;  %s8362_s10 = smov [#allocation10]  }
 0x106   : > { %p8097_p8 = scmp.ne.s32.totalorder %s8830_s2, %s8096_s29  ;;  %s8101_s20 = sshll.u32 %s8362_s10, 4  ;;  %s8102_s20 = int_to_ptr.vmem [resolvable:$false] %s8101_s20 }
 0x107   : > { %s8103_s24 = scalar_lea.vmem %s8102_s20, 192  ;;  %p8104_p3 = scmp.lt.s32.totalorder %s8830_s2, %s8102_s20 }
 0x108   : > { %p8099_p6 = pnand %p8097_p8, %p10219_p5  ;;  %p8105_p11 = scmp.lt.s32.totalorder %s8103_s24, %s8096_s29 }
 0x10a   : > { %p8100_p7 = pneg %p8099_p6  ;;  %p8106_p9 = por %p8105_p11, %p8104_p3 }
 0x10c   : > { %p8107_p13 = pnand %p8106_p9, %p8100_p7 }
 0x10e   : > { %8110 = shalt.err (!%p8107_p13)
}
 0x10f   : > { %s8363_s9 = smov 16   ;;  %s10220_s19 = sld [smem:[#allocation43_spill]] }
 0x110   : > { %s10221_s13 = sld [smem:[#allocation44_spill]]  ;;  %s8364_s3 = smov 1  }
 0x111   : > { %s5977_s21 = sshll.u32 %s8584_s14, 3  ;;  %s5978_s10 = sshll.u32 %s8341_s15, 7 }
 0x112   : > { %s10224_s24 = sld [smem:[#allocation57_spill]]  ;;  %s462_s22 = scalar_lea.vmem [#allocation13], %s5977_s21 }
 0x113   : > { %s469_s16 = sshll.u32 %s462_s22, 4  ;;  %s5982_s11 = sshll.u32 %s8584_s14, 2  ;;  %s470_s16 = int_to_ptr.vmem [resolvable:$true] %s469_s16 }
 0x115   : > { %p10222_p0 = scmp.ne.s32.totalorder %s10220_s19, 0 }
 0x116   : > { %s10223_s27 = scalar_lea.sflag [#allocation9], %s10221_s13 }
 0x117   : > { %7530 = dma.hbm_to_vmem [thread:$0]  (!%p10222_p0), %s8826_s28, 96, %s8830_s2, %s10223_s27, %s8363_s9, %s8363_s9, %s8364_s3  }
 0x118   : > { %s8860_s1 = scalar_lea.hbm %s10224_s24, %s5978_s10  ;;  %s8116_s9 = scalar_lea.hbm %s10224_s24, 256 }
 0x119   : > { %s8111_s12 = scalar_lea.hbm %s8860_s1, 128  ;;  %p8117_p2 = scmp.lt.u32.totalorder %s8860_s1, %s10224_s24 }
 0x11a   : > { %p8112_p12 = scmp.ne.s32.totalorder %s8860_s1, %s8111_s12  ;;  %p8118_p8 = scmp.lt.u32.totalorder %s8116_s9, %s8111_s12 }
 0x11b   : > { %p8120_p7 = scmp.lt.u32.totalorder %s8111_s12, %s8860_s1 }
 0x11c   : > { %p8114_p1 = pnand %p8112_p12, %p10219_p5  ;;  %p8119_p6 = por %p8118_p8, %p8117_p2 }
 0x11e   : > { %p8115_p10 = pneg %p8114_p1  ;;  %p8121_p3 = por %p8120_p7, %p8119_p6 }
 0x120   : > { %p8122_p11 = pnand %p8121_p3, %p8115_p10 }
 0x122   : > { %8125 = shalt.err (!%p8122_p11)
}
 0x123   : > { %s8126_s22 = scalar_lea.vmem %s470_s16, 128  ;;  %s8365_s21 = smov [#allocation13]  }
 0x124   : > { %p8127_p9 = scmp.ne.s32.totalorder %s470_s16, %s8126_s22  ;;  %s8131_s10 = sshll.u32 %s8365_s21, 4  ;;  %s8132_s10 = int_to_ptr.vmem [resolvable:$false] %s8131_s10 }
 0x125   : > { %s8133_s20 = scalar_lea.vmem %s8132_s10, 256  ;;  %p8134_p1 = scmp.lt.s32.totalorder %s470_s16, %s8132_s10 }
 0x126   : > { %p8129_p13 = pnand %p8127_p9, %p10219_p5  ;;  %p8135_p4 = scmp.lt.s32.totalorder %s8133_s20, %s8126_s22 }
 0x128   : > { %p8130_p12 = pneg %p8129_p13  ;;  %p8136_p0 = por %p8135_p4, %p8134_p1 }
 0x12a   : > { %p8137_p2 = pnand %p8136_p0, %p8130_p12 }
 0x12c   : > { %8140 = shalt.err (!%p8137_p2)
}
 0x12d   : > { %p10225_p8 = scmp.ne.s32.totalorder %s10220_s19, 0  ;;  %s10226_s12 = scalar_lea.sflag [#allocation12], %s10221_s13 }
 0x12e   : > { %s6212_s29 = sshll.u32 %s8341_s15, 6  ;;  %s501_s28 = scalar_lea.vmem [#allocation16], %s5982_s11 }
 0x12f   : > { %7536 = dma.hbm_to_vmem [thread:$0]  (!%p10225_p8), %s8860_s1, 128, %s470_s16, %s10226_s12  }
 0x130   : > { %s509_s2 = sshll.u32 %s501_s28, 4  ;;  %s10227_s27 = sld [smem:[#allocation59_spill]]  ;;  %s510_s2 = int_to_ptr.vmem [resolvable:$true] %s509_s2 }
 0x136   : > { %s10228_s21 = smov %s10227_s27  ;;  %s507_s22 = scalar_lea.hbm %s10227_s27, %s6212_s29 }
 0x137   : > { %s8141_s10 = scalar_lea.hbm %s507_s22, 64  ;;  %s8146_s26 = scalar_lea.hbm %s10228_s21, 128 }
 0x138   : > { %p8142_p4 = scmp.ne.s32.totalorder %s507_s22, %s8141_s10  ;;  %p8147_p6 = scmp.lt.u32.totalorder %s507_s22, %s10228_s21 }
 0x139   : > { %p8148_p7 = scmp.lt.u32.totalorder %s8146_s26, %s8141_s10  ;;  %p8150_p11 = scmp.lt.u32.totalorder %s8141_s10, %s507_s22 }
 0x13a   : > { %p8144_p0 = pnand %p8142_p4, %p10219_p5 }
 0x13b   : > { %p8149_p3 = por %p8148_p7, %p8147_p6 }
 0x13c   : > { %p8145_p10 = pneg %p8144_p0 }
 0x13d   : > { %p8151_p9 = por %p8150_p11, %p8149_p3 }
 0x13f   : > { %p8152_p13 = pnand %p8151_p9, %p8145_p10 }
 0x141   : > { %8155 = shalt.err (!%p8152_p13)
}
 0x142   : > { %s8156_s16 = scalar_lea.vmem %s510_s2, 64  ;;  %s8366_s14 = smov [#allocation16]  }
 0x143   : > { %p8157_p12 = scmp.ne.s32.totalorder %s510_s2, %s8156_s16  ;;  %s8161_s11 = sshll.u32 %s8366_s14, 4  ;;  %s8162_s11 = int_to_ptr.vmem [resolvable:$false] %s8161_s11 }
 0x144   : > { %s8163_s24 = scalar_lea.vmem %s8162_s11, 128  ;;  %p8164_p4 = scmp.lt.s32.totalorder %s510_s2, %s8162_s11 }
 0x145   : > { %p8159_p1 = pnand %p8157_p12, %p10219_p5  ;;  %p8165_p0 = scmp.lt.s32.totalorder %s8163_s24, %s8156_s16 }
 0x147   : > { %p8160_p2 = pneg %p8159_p1  ;;  %p8166_p8 = por %p8165_p0, %p8164_p4 }
 0x149   : > { %p8167_p6 = pnand %p8166_p8, %p8160_p2 }
 0x14b   : > { %8170 = shalt.err (!%p8167_p6)
}
 0x14c   : > { %p10229_p7 = scmp.ne.s32.totalorder %s10220_s19, 0  ;;  %s10230_s0 = scalar_lea.sflag [#allocation15], %s10221_s13 }
 0x14d   : > { %s517_s26 = scalar_lea.sflag [#allocation18], %s10221_s13  ;;  %s8171_s12 = scalar_lea.hbm %s8708_s23, 8192 }
 0x14e   : > { %7542 = dma.hbm_to_vmem [thread:$0]  (!%p10229_p7), %s507_s22, 64, %s510_s2, %s10230_s0  }
 0x14f   : > { %p8172_p10 = scmp.ne.s32.totalorder %s8708_s23, %s8171_s12  ;;  %s8176_s9 = scalar_lea.hbm %s10111_s8, 16384 }
 0x150   : > { %p8177_p8 = scmp.lt.u32.totalorder %s8708_s23, %s10111_s8  ;;  %p8178_p9 = scmp.lt.u32.totalorder %s8176_s9, %s8171_s12 }
 0x151   : > { %p8174_p3 = pnand %p8172_p10, %p10219_p5  ;;  %p8180_p12 = scmp.lt.u32.totalorder %s8171_s12, %s8708_s23 }
 0x152   : > { %p8179_p13 = por %p8178_p9, %p8177_p8 }
 0x153   : > { %p8175_p11 = pneg %p8174_p3 }
 0x154   : > { %p8181_p1 = por %p8180_p12, %p8179_p13 }
 0x156   : > { %p8182_p2 = pnand %p8181_p1, %p8175_p11 }
 0x158   : > { %8185 = shalt.err (!%p8182_p2)
}
 0x159   : > { %s8186_s2 = scalar_lea.vmem %s8712_s5, 8192  ;;  %s8367_s22 = smov [#allocation17]  }
 0x15a   : > { %p8187_p4 = scmp.ne.s32.totalorder %s8712_s5, %s8186_s2  ;;  %s8191_s10 = sshll.u32 %s8367_s22, 4  ;;  %s8192_s10 = int_to_ptr.vmem [resolvable:$false] %s8191_s10 }
 0x15b   : > { %s8193_s20 = scalar_lea.vmem %s8192_s10, 16384  ;;  %p8194_p10 = scmp.lt.s32.totalorder %s8712_s5, %s8192_s10 }
 0x15c   : > { %p8189_p0 = pnand %p8187_p4, %p10219_p5  ;;  %p8195_p3 = scmp.lt.s32.totalorder %s8193_s20, %s8186_s2 }
 0x15e   : > { %p8190_p6 = pneg %p8189_p0  ;;  %p8196_p8 = por %p8195_p3, %p8194_p10 }
 0x160   : > { %p8197_p9 = pnand %p8196_p8, %p8190_p6 }
 0x162   : > { %8200 = shalt.err (!%p8197_p9)
}
 0x163   : > { %7545 = dma.hbm_to_vmem [thread:$0]  (!%p10229_p7), %s8708_s23, 8192, %s8712_s5, %s517_s26, %s10205_s6, %s10205_s6, %s10204_s4  }
 0x164   : > { %s10231_s25 = sld [smem:[#allocation42_spill]] }
 0x16a   : > { %p10232_p5 = scmp.ne.s32.totalorder %s10231_s25, 0 }
 0x16c   : > { %539 = sbr.rel (%p10232_p5) target bundleno = 4140 (0x102c), region = 60 }
 0x173   : > { %s10233_s1 = sld [smem:[#allocation39_spill]]  ;;  %s8932_s16 = sand.u32 1, %s8325_s30  }
 0x174   : > { %s5989_s14 = sshll.u32 %s8932_s16, 6  ;;  %s542_s11 = scalar_lea.sflag [#allocation6], %s8932_s16 }
 0x175   : > { %s8936_s19 = scalar_lea.vmem [#allocation5], %s5989_s14 }
 0x179   : > { %p10234_p11 = scmp.ne.s32.totalorder %s10233_s1, 0 }
 0x17b   : > { %8276 = dma.done.wait (%p10234_p11), %s542_s11, 1024  }
 0x17c   : > { %8278 = vsyncadd (%p10234_p11), %s542_s11, 4294966272  ;;  %s10235_s23 = sld [smem:[#allocation32_spill]]  ;;  %s10236_s5 = sld [smem:[#allocation40_spill]] }
 0x17d   : > { %s550_s4 = sand.u32 1, %s8501_s18  }
 0x17e   : > { %s551_s24 = scalar_lea.sflag [#allocation9], %s550_s4 }
 0x182   : > { %s552_s6 = sand.u32 1, %s10235_s23   ;;  %p10237_p7 = scmp.ne.s32.totalorder %s10236_s5, 0 }
 0x183   : > { %s7486_s13 = smul.u32 768, %s552_s6 }
 0x185   : > { %s8944_s0 = scalar_lea.vmem [#allocation8], %s7486_s13 }
 0x186   : > { %8280 = dma.done.wait (%p10237_p7), %s551_s24, 12384  }
 0x187   : > { %8282 = vsyncadd (%p10237_p7), %s551_s24, 4294954912  ;;  %s7487_s26 = smul.u32 6, %s552_s6  ;;  %s5990_s12 = sshll.u32 %s552_s6, 7 }
 0x188   : > { %s569_s28 = scalar_lea.sflag [#allocation12], %s550_s4  ;;  %s8952_s9 = scalar_lea.vmem [#allocation11], %s5990_s12 }
 0x189   : > { %s8950_s29 = scalar_lea.vmem [#allocation10], %s7487_s26 }
 0x18a   : > { %8284 = dma.done.wait (%p10237_p7), %s569_s28, 2176  }
 0x18b   : > { %8286 = vsyncadd (%p10237_p7), %s569_s28, 4294965120  ;;  %s5991_s3 = sshll.u32 %s552_s6, 3  ;;  %s5992_s27 = sshll.u32 %s552_s6, 9 }
 0x18c   : > { %s8958_s2 = scalar_lea.vmem [#allocation13], %s5991_s3  ;;  %s587_s22 = scalar_lea.sflag [#allocation15], %s550_s4 }
 0x18d   : > { %s8960_s10 = scalar_lea.vmem [#allocation14], %s5992_s27 }
 0x18e   : > { %8288 = dma.done.wait (%p10237_p7), %s587_s22, 8256  }
 0x18f   : > { %8290 = vsyncadd (%p10237_p7), %s587_s22, 4294959040  ;;  %s5993_s20 = sshll.u32 %s552_s6, 2  ;;  %s605_s1 = scalar_lea.sflag [#allocation18], %s550_s4 }
 0x190   : > { %s8966_s25 = scalar_lea.vmem [#allocation16], %s5993_s20  ;;  %s8968_s14 = scalar_lea.vmem [#allocation17], %s5992_s27 }
 0x191   : > { %8292 = dma.done.wait (%p10237_p7), %s605_s1, 8192  }
 0x192   : > { %8294 = vsyncadd (%p10237_p7), %s605_s1, 4294959104  ;;  %p10238_p13 = scmp.eq.s32.totalorder %s8501_s18, 0 }
 0x194   : > { %8296 = dma.done.wait (%p10238_p13), [#allocation18], 32   ;;  %p10239_p12 = pmov %p10238_p13 }
 0x196   : > { %8298 = vsyncadd (%p10239_p12), [#allocation18], 4294967264  ;;  %p10240_p1 = pmov %p10239_p12 }
 0x198   : > { %8300 = dma.done.wait (%p10240_p1), [#allocation21], 2048   ;;  %p10241_p2 = pmov %p10240_p1 }
 0x199   : > { %s5997_s11 = sshll.u32 %s8932_s16, 3  ;;  %s10242_s4 = sld [smem:[#allocation36_spill]] }
 0x19a   : > { %8302 = vsyncadd (%p10241_p2), [#allocation21], 4294965248  ;;  %s8983_s23 = scalar_lea.vmem [#allocation22], %s5997_s11 }
 0x19f   : > { %p5998_p4 = scmp.ne.s32.totalorder %s10242_s4, 0 }
 0x1a0   : > { %v693_v0 = vld [vmem:[%s8936_s19] sm:$0xff] (!%p5998_p4)  ;;  %v694_v1 = vld [vmem:[%s8936_s19 + $0x8] sm:$0xff] (!%p5998_p4)  ;;  %v695_v2 = vld [vmem:[%s8936_s19 + $0x10] sm:$0xff] (!%p5998_p4) }
 0x1a1   : > { %692 = sbr.rel (%p5998_p4) target bundleno = 424 (0x1a8), region = 104  ;;  %701 = vst [vmem:[#allocation2] sm:$0xff] (!%p5998_p4), %v693_v0  ;;  %702 = vst [vmem:[#allocation2 + $0x8] sm:$0xff] (!%p5998_p4), %v694_v1  ;;  %v696_v3 = vld [vmem:[%s8936_s19 + $0x18] sm:$0xff] (!%p5998_p4)  ;;  %v697_v4 = vld [vmem:[%s8936_s19 + $0x20] sm:$0xff] (!%p5998_p4) }
 0x1a2   : > { %703 = vst [vmem:[#allocation2 + $0x10] sm:$0xff] (!%p5998_p4), %v695_v2  ;;  %v698_v5 = vld [vmem:[%s8936_s19 + $0x28] sm:$0xff] (!%p5998_p4)  ;;  %704 = vst [vmem:[#allocation2 + $0x18] sm:$0xff] (!%p5998_p4), %v696_v3  ;;  %v699_v6 = vld [vmem:[%s8936_s19 + $0x30] sm:$0xff] (!%p5998_p4) }
 0x1a3   : > { %705 = vst [vmem:[#allocation2 + $0x20] sm:$0xff] (!%p5998_p4), %v697_v4  ;;  %706 = vst [vmem:[#allocation2 + $0x28] sm:$0xff] (!%p5998_p4), %v698_v5  ;;  %v700_v7 = vld [vmem:[%s8936_s19 + $0x38] sm:$0xff] (!%p5998_p4) }
 0x1a4   : > { %707 = vst [vmem:[#allocation2 + $0x30] sm:$0xff] (!%p5998_p4), %v699_v6  ;;  %708 = vst [vmem:[#allocation2 + $0x38] sm:$0xff] (!%p5998_p4), %v700_v7 }
 0x1a8 PF: > { %v709_v8 = vld [vmem:[#allocation2] sm:$0xff]  ;;  %v710_v10 = vld [vmem:[#allocation2 + $0x8] sm:$0xff]  ;;  %v839_v21 = vld [vmem:[%s8944_s0 + $0x10] sm:$0xff]  ;;  %vm8369_vm0 = vmmov 0   ;;  %vm1225_vm1 = vcmask 523264   ;;  %vm1834_vm3 = vcmask 64512  }
 0x1a9   : > { %v711_v9 = vld [vmem:[#allocation2 + $0x10] sm:$0xff]  ;;  %724 = vadd.xlane.f32.xlu0 %v709_v8  ;;  %v712_v11 = vld [vmem:[#allocation2 + $0x18] sm:$0xff]  ;;  %v837_v16 = vld [vmem:[%s8944_s0] sm:$0xff]  ;;  %s10251_s18 = sld [smem:[#allocation36_spill]] }
 0x1aa   : > { %728 = vadd.xlane.f32.xlu1 %v711_v9  ;;  %v713_v12 = vld [vmem:[#allocation2 + $0x20] sm:$0xff]  ;;  %v714_v13 = vld [vmem:[#allocation2 + $0x28] sm:$0xff]  ;;  %v840_v22 = vld [vmem:[%s8944_s0 + $0x18] sm:$0xff] }
 0x1ab   : > { %v715_v14 = vld [vmem:[#allocation2 + $0x30] sm:$0xff]  ;;  %v716_v15 = vld [vmem:[#allocation2 + $0x38] sm:$0xff]  ;;  %v838_v17 = vld [vmem:[%s8944_s0 + $0x8] sm:$0xff]  ;;  %v7102_v24 = vpack.c.bf16 %v840_v22, %v839_v21 }
 0x1ac   : > { %v6000_v18 = vld [vmem:[%s8944_s0 + $0x100] sm:$0xff]  ;;  %v7098_v19 = vpack.c.bf16 %v838_v17, %v837_v16  ;;  %v6001_v20 = vld [vmem:[%s8944_s0 + $0x108] sm:$0xff]  ;;  %v6002_v25 = vld [vmem:[%s8944_s0 + $0x110] sm:$0xff] }
 0x1ad   : > { %726 = vadd.xlane.f32.xlu0 %v710_v10  ;;  %v7130_v23 = vpack.c.bf16 %v6001_v20, %v6000_v18  ;;  %v6003_v26 = vld [vmem:[%s8944_s0 + $0x118] sm:$0xff]  ;;  %v841_v59 = vld [vmem:[%s8944_s0 + $0x20] sm:$0xff]  ;;  %v842_v60 = vld [vmem:[%s8944_s0 + $0x28] sm:$0xff] }
 0x1ae   : > { %730 = vadd.xlane.f32.xlu1 %v712_v11  ;;  %7099 = vmatprep.subr.bf16.mxu0 %v7098_v19  ;;  %v7134_v27 = vpack.c.bf16 %v6003_v26, %v6002_v25  ;;  %v7106_v62 = vpack.c.bf16 %v842_v60, %v841_v59  ;;  %v6004_v63 = vld [vmem:[%s8944_s0 + $0x120] sm:$0xff]  ;;  %v6005_v0 = vld [vmem:[%s8944_s0 + $0x128] sm:$0xff]  ;;  %v843_v2 = vld [vmem:[%s8944_s0 + $0x30] sm:$0xff] }
 0x1af   : > { %7101 = vmatpush3.bf16.msra.mxu0 %v7098_v19  ;;  %7131 = vmatprep.subr.bf16.mxu1 %v7130_v23  ;;  %v7138_v1 = vpack.c.bf16 %v6005_v0, %v6004_v63  ;;  %v844_v3 = vld [vmem:[%s8944_s0 + $0x38] sm:$0xff]  ;;  %v6006_v5 = vld [vmem:[%s8944_s0 + $0x130] sm:$0xff]  ;;  %v849_v20 = vld [vmem:[%s8944_s0 + $0x60] sm:$0xff]  ;;  %p6194_p0 = scmp.ne.s32.totalorder %s10251_s18, 1 }
 0x1b0   : > { %7133 = vmatpush3.bf16.msra.mxu1 %v7130_v23  ;;  %7103 = vmatprep.subr.bf16.mxu0 %v7102_v24  ;;  %v7110_v4 = vpack.c.bf16 %v844_v3, %v843_v2  ;;  %v6007_v6 = vld [vmem:[%s8944_s0 + $0x138] sm:$0xff]  ;;  %v6010_v17 = vld [vmem:[%s8944_s0 + $0x150] sm:$0xff]  ;;  %v850_v21 = vld [vmem:[%s8944_s0 + $0x68] sm:$0xff]  ;;  %s10252_s19 = sld [smem:[#allocation37_spill]] (!%p6194_p0)  ;;  %vm5558_vm4 = vcmask (!%p6194_p0), 1040384   ;;  %vm5560_vm5 = vcmask (!%p6194_p0), 1041408  }
 0x1b1   : > { %732 = vadd.xlane.f32.xlu0 %v713_v12  ;;  %7135 = vmatprep.subr.bf16.mxu1 %v7134_v27  ;;  %v7142_v7 = vpack.c.bf16 %v6007_v6, %v6006_v5  ;;  %v6011_v18 = vld [vmem:[%s8944_s0 + $0x158] sm:$0xff]  ;;  %v7122_v22 = vpack.c.bf16 %v850_v21, %v849_v20  ;;  %v6012_v23 = vld [vmem:[%s8944_s0 + $0x160] sm:$0xff]  ;;  %v851_v26 = vld [vmem:[%s8944_s0 + $0x70] sm:$0xff]  ;;  %vm5562_vm6 = vcmask (!%p6194_p0), 1042432   ;;  %vm5564_vm7 = vcmask (!%p6194_p0), 1043456  }
 0x1b2   : > { %734 = vadd.xlane.f32.xlu1 %v714_v13  ;;  %v7150_v19 = vpack.c.bf16 %v6011_v18, %v6010_v17  ;;  %v717_v59 = vld [vmem:[%s8958_s2] sm:$0x3f]  ;;  %vm5566_vm8 = vcmask (!%p6194_p0), 1044480   ;;  %vm5568_vm9 = vcmask (!%p6194_p0), 1045504   ;;  %vm5570_vm10 = vcmask (!%p6194_p0), 1046528  }
 0x1b3   : > { %7105 = vmatpush3.bf16.msra.mxu0 %v7102_v24  ;;  %v6013_v24 = vld [vmem:[%s8944_s0 + $0x168] sm:$0xff]  ;;  %v6021_v18 = vld [vmem:[%s8944_s0 + $0x218] sm:$0xff]  ;;  %vm8372_vm11 = vmmov (!%p6194_p0), 0  }
 0x1b4   : > { %7137 = vmatpush3.bf16.msra.mxu1 %v7134_v27  ;;  %7107 = vmatprep.subr.bf16.mxu0 %v7106_v62  ;;  %v7154_v25 = vpack.c.bf16 %v6013_v24, %v6012_v23  ;;  %v852_v27 = vld [vmem:[%s8944_s0 + $0x78] sm:$0xff] }
 0x1b5   : > { %736 = vadd.xlane.f32.xlu0 %v715_v14  ;;  %7139 = vmatprep.subr.bf16.mxu1 %v7138_v1 }
 0x1b6   : > { %738 = vadd.xlane.f32.xlu1 %v716_v15  ;;  %s6195_s5 = sshll.u32 (!%p6194_p0), %s10252_s19, 3 }
 0x1b7   : > { %7109 = vmatpush3.bf16.msra.mxu0 %v7106_v62  ;;  %s5499_s6 = sld [smem:[#allocation4 + %s6195_s5]] (!%p6194_p0)  ;;  %s5502_s13 = sadd.s32 (!%p6194_p0), 1, %s6195_s5 }
 0x1b8   : > { %7141 = vmatpush3.bf16.msra.mxu1 %v7138_v1  ;;  %7111 = vmatprep.subr.bf16.mxu0 %v7110_v4  ;;  %s5503_s24 = sld [smem:[#allocation4 + %s5502_s13]] (!%p6194_p0)  ;;  %s5512_s12 = sadd.s32 (!%p6194_p0), 3, %s6195_s5 }
 0x1b9   : > { %7143 = vmatprep.subr.bf16.mxu1 %v7142_v7  ;;  %s5517_s28 = sadd.s32 (!%p6194_p0), 4, %s6195_s5  ;;  %s5522_s3 = sadd.s32 (!%p6194_p0), 5, %s6195_s5 }
 0x1ba   : > { %s5523_s27 = sld [smem:[#allocation4 + %s5522_s3]] (!%p6194_p0) }
 0x1bb   : > { %7113 = vmatpush3.bf16.msra.mxu0 %v7110_v4 }
 0x1bc   : > { %7145 = vmatpush3.bf16.msra.mxu1 %v7142_v7 }
 0x1bd   : > { %s5500_s20 = scalar_lea.vmem (!%p6194_p0), [#allocation2], %s5499_s6 }
 0x1c0   : > { %s5833_s18 = scalar_lea.vmem (!%p6194_p0), [#allocation2], %s5523_s27 }
 0x236   : > { %v725_v28 = vpop.xlane.xlu0 %724 }
 0x237   : > { %v729_v29 = vpop.xlane.xlu1 %728  ;;  %v741_v30 = vmul.f32 0.0078125, %v725_v28  ;;  %v7126_v28 = vpack.c.bf16 %v852_v27, %v851_v26  ;;  %v6022_v26 = vld [vmem:[%s8944_s0 + $0x220] sm:$0xff]  ;;  %v6023_v27 = vld [vmem:[%s8944_s0 + $0x228] sm:$0xff] }
 0x238   : > { %v743_v31 = vmul.f32 0.0078125, %v729_v29  ;;  %v6014_v29 = vld [vmem:[%s8944_s0 + $0x170] sm:$0xff] }
 0x239   : > { %v9002_v32 = vsub.f32 %v709_v8, %v741_v30  ;;  %v845_v8 = vld [vmem:[%s8944_s0 + $0x40] sm:$0xff]  ;;  %v6015_v30 = vld [vmem:[%s8944_s0 + $0x178] sm:$0xff] }
 0x23a   : > { %v9004_v33 = vsub.f32 %v711_v9, %v743_v31  ;;  %v727_v34 = vpop.xlane.xlu0 %726  ;;  %v846_v9 = vld [vmem:[%s8944_s0 + $0x48] sm:$0xff]  ;;  %v7158_v31 = vpack.c.bf16 %v6015_v30, %v6014_v29 }
 0x23b   : > { %v731_v35 = vpop.xlane.xlu1 %730  ;;  %v742_v36 = vmul.f32 0.0078125, %v727_v34  ;;  %v757_v37 = vmul.f32 %v9002_v32, %v9002_v32  ;;  %v6018_v34 = vld [vmem:[%s8944_s0 + $0x200] sm:$0xff] }
 0x23c   : > { %v744_v38 = vmul.f32 0.0078125, %v731_v35  ;;  %v759_v41 = vmul.f32 %v9004_v33, %v9004_v33  ;;  %v6019_v35 = vld [vmem:[%s8944_s0 + $0x208] sm:$0xff] }
 0x23d   : > { %v9008_v39 = vsub.f32 %v710_v10, %v742_v36  ;;  %765 = vadd.xlane.f32.xlu0 %v757_v37  ;;  %v7114_v10 = vpack.c.bf16 %v846_v9, %v845_v8  ;;  %v9060_v36 = vpack.c.bf16 %v6019_v35, %v6018_v34  ;;  %v7170_v34 = vpack.c.bf16 %v6023_v27, %v6022_v26 }
 0x23e   : > { %v9010_v40 = vsub.f32 %v712_v11, %v744_v38  ;;  %v733_v42 = vpop.xlane.xlu0 %732  ;;  %v6008_v11 = vld [vmem:[%s8944_s0 + $0x140] sm:$0xff] }
 0x23f   : > { %v735_v43 = vpop.xlane.xlu1 %734  ;;  %v745_v44 = vmul.f32 0.0078125, %v733_v42  ;;  %v758_v45 = vmul.f32 %v9008_v39, %v9008_v39  ;;  %7115 = vmatprep.subr.bf16.mxu0 %v7114_v10 }
 0x240   : > { %v746_v46 = vmul.f32 0.0078125, %v735_v43  ;;  %v760_v49 = vmul.f32 %v9010_v40, %v9010_v40  ;;  %7117 = vmatpush3.bf16.msra.mxu0 %v7114_v10 }
 0x241   : > { %v9016_v47 = vsub.f32 %v713_v12, %v745_v44  ;;  %769 = vadd.xlane.f32.xlu0 %v759_v41  ;;  %767 = vadd.xlane.f32.xlu1 %v758_v45  ;;  %v6009_v12 = vld [vmem:[%s8944_s0 + $0x148] sm:$0xff]  ;;  %v718_v41 = vlaneseq }
 0x242   : > { %v9018_v48 = vsub.f32 %v714_v13, %v746_v46  ;;  %v737_v50 = vpop.xlane.xlu0 %736  ;;  %v7146_v13 = vpack.c.bf16 %v6009_v12, %v6008_v11 }
 0x243   : > { %v739_v51 = vpop.xlane.xlu1 %738  ;;  %v747_v52 = vmul.f32 0.0078125, %v737_v50  ;;  %v761_v53 = vmul.f32 %v9016_v47, %v9016_v47 }
 0x244   : > { %v748_v54 = vmul.f32 0.0078125, %v739_v51  ;;  %v762_v57 = vmul.f32 %v9018_v48, %v9018_v48  ;;  %7147 = vmatprep.subr.bf16.mxu1 %v7146_v13 }
 0x245   : > { %v9024_v55 = vsub.f32 %v715_v14, %v747_v52  ;;  %771 = vadd.xlane.f32.xlu1 %v760_v49  ;;  %773 = vadd.xlane.f32.xlu0 %v761_v53  ;;  %v847_v14 = vld [vmem:[%s8944_s0 + $0x50] sm:$0xff]  ;;  %v9064_v49 = vshrl.u32 %v718_v41, 7 }
 0x246   : > { %v9026_v56 = vsub.f32 %v716_v15, %v748_v54  ;;  %v848_v15 = vld [vmem:[%s8944_s0 + $0x58] sm:$0xff]  ;;  %7149 = vmatpush3.bf16.msra.mxu1 %v7146_v13 }
 0x247   : > { %v763_v58 = vmul.f32 %v9024_v55, %v9024_v55  ;;  %v7118_v16 = vpack.c.bf16 %v848_v15, %v847_v14  ;;  %7151 = vmatprep.subr.bf16.mxu1 %v7150_v19  ;;  %v827_v62 = vsub.s32 1, %v9064_v49 }
 0x248   : > { %v764_v61 = vmul.f32 %v9026_v56, %v9026_v56 }
 0x249   : > { %775 = vadd.xlane.f32.xlu1 %v762_v57  ;;  %777 = vadd.xlane.f32.xlu0 %v763_v58  ;;  %v815_v58 = vsub.s32 0, %v9064_v49  ;;  %v9075_v7 = vrot.slane %v717_v59, %v827_v62 }
 0x24a   : > { %7119 = vmatprep.subr.bf16.mxu0 %v7118_v16  ;;  %7153 = vmatpush3.bf16.msra.mxu1 %v7150_v19 }
 0x24b   : > { %7121 = vmatpush3.bf16.msra.mxu0 %v7118_v16  ;;  %7155 = vmatprep.subr.bf16.mxu1 %v7154_v25  ;;  %v9071_v3 = vrot.slane %v717_v59, %v815_v58 }
 0x24c   : > { %7123 = vmatprep.subr.bf16.mxu0 %v7122_v22 }
 0x24d   : > { %779 = vadd.xlane.f32.xlu1 %v764_v61 }
 0x24e   : > { %7157 = vmatpush3.bf16.msra.mxu1 %v7154_v25 }
 0x24f   : > { %7125 = vmatpush3.bf16.msra.mxu0 %v7122_v22  ;;  %7159 = vmatprep.subr.bf16.mxu1 %v7158_v31 }
 0x250   : > { %7127 = vmatprep.subr.bf16.mxu0 %v7126_v28 }
 0x252   : > { %7161 = vmatpush3.bf16.msra.mxu1 %v7158_v31 }
 0x253   : > { %7129 = vmatpush3.bf16.msra.mxu0 %v7126_v28 }
 0x254   : > { %7163 = vmatprep.subr.bf16.mxu0 %v9060_v36 }
 0x2ca   : > { %v766_v37 = vpop.xlane.xlu0 %765 }
 0x2cb   : > { %v781_v38 = vmul.f32 0.0078125, %v766_v37 }
 0x2cd   : > { %v789_v42 = vadd.f32 1e-05, %v781_v38  ;;  %v6024_v38 = vld [vmem:[%s8944_s0 + $0x230] sm:$0xff] }
 0x2ce   : > { %v768_v43 = vpop.xlane.xlu1 %767  ;;  %v770_v44 = vpop.xlane.xlu0 %769 }
 0x2cf   : > { %7659 = vrsqrt.f32 %v789_v42  ;;  %v782_v45 = vmul.f32 0.0078125, %v768_v43  ;;  %v783_v46 = vmul.f32 0.0078125, %v770_v44 }
 0x2d1   : > { %v790_v50 = vadd.f32 1e-05, %v782_v45  ;;  %v791_v51 = vadd.f32 1e-05, %v783_v46 }
 0x2d2   : > { %v772_v52 = vpop.xlane.xlu1 %771  ;;  %v774_v53 = vpop.xlane.xlu0 %773 }
 0x2d3   : > { %7661 = vrsqrt.f32 %v790_v50  ;;  %v784_v54 = vmul.f32 0.0078125, %v772_v52  ;;  %v785_v57 = vmul.f32 0.0078125, %v774_v53  ;;  %v6026_v50 = vld [vmem:[%s8944_s0 + $0x240] sm:$0xff] }
 0x2d4   : > { %7663 = vrsqrt.f32 %v791_v51  ;;  %v6027_v51 = vld [vmem:[%s8944_s0 + $0x248] sm:$0xff] }
 0x2d5   : > { %v792_v60 = vadd.f32 1e-05, %v784_v54  ;;  %v793_v61 = vadd.f32 1e-05, %v785_v57  ;;  %v7178_v53 = vpack.c.bf16 %v6027_v51, %v6026_v50  ;;  %v6028_v54 = vld [vmem:[%s8944_s0 + $0x250] sm:$0xff]  ;;  %v6029_v57 = vld [vmem:[%s8944_s0 + $0x258] sm:$0xff] }
 0x2d6   : > { %v776_v63 = vpop.xlane.xlu1 %775  ;;  %v778_v0 = vpop.xlane.xlu0 %777  ;;  %v7182_v59 = vpack.c.bf16 %v6029_v57, %v6028_v54 }
 0x2d7   : > { %7665 = vrsqrt.f32 %v792_v60  ;;  %v786_v1 = vmul.f32 0.0078125, %v776_v63  ;;  %v787_v2 = vmul.f32 0.0078125, %v778_v0  ;;  %v6030_v60 = vld [vmem:[%s8944_s0 + $0x260] sm:$0xff]  ;;  %v6032_v0 = vld [vmem:[%s8944_s0 + $0x270] sm:$0xff] }
 0x2d8   : > { %7667 = vrsqrt.f32 %v793_v61  ;;  %v6031_v61 = vld [vmem:[%s8944_s0 + $0x268] sm:$0xff] }
 0x2d9   : > { %v7660_v4 = vpop.eup %7659  ;;  %v794_v5 = vadd.f32 1e-05, %v786_v1  ;;  %v795_v6 = vadd.f32 1e-05, %v787_v2  ;;  %v7186_v63 = vpack.c.bf16 %v6031_v61, %v6030_v60  ;;  %v6033_v1 = vld [vmem:[%s8944_s0 + $0x278] sm:$0xff] }
 0x2da   : > { %v805_v8 = vmul.f32 %v7660_v4, %v9002_v32  ;;  %v780_v9 = vpop.xlane.xlu1 %779  ;;  %v6020_v32 = vld [vmem:[%s8944_s0 + $0x210] sm:$0xff]  ;;  %v7190_v2 = vpack.c.bf16 %v6033_v1, %v6032_v0  ;;  %v6017_v4 = vld [vmem:[%s8950_s29 + $0x2] ss:$0 sm:$0xff] }
 0x2db   : > { %7669 = vrsqrt.f32 %v794_v5  ;;  %v788_v10 = vmul.f32 0.0078125, %v780_v9  ;;  %v5999_v9 = vld [vmem:[%s8950_s29] ss:$0 sm:$0xff] }
 0x2dc   : > { %v817_v11 = vmul.f32 %v9071_v3, %v805_v8  ;;  %7671 = vrsqrt.f32 %v795_v6 }
 0x2dd   : > { %v7662_v12 = vpop.eup %7661  ;;  %v796_v13 = vadd.f32 1e-05, %v788_v10 }
 0x2de   : > { %v7664_v14 = vpop.eup %7663  ;;  %v9080_v15 = vadd.f32 %v9075_v7, %v817_v11  ;;  %v806_v16 = vmul.f32 %v7662_v12, %v9008_v39 }
 0x2df   : > { %v807_v17 = vmul.f32 %v7664_v14, %v9004_v33  ;;  %7673 = vrsqrt.f32 %v796_v13  ;;  %v7166_v33 = vpack.c.bf16 %v6021_v18, %v6020_v32 }
 0x2e0   : > { %v818_v19 = vmul.f32 %v9071_v3, %v806_v16  ;;  %6615 = vmatprep.mubr.f32.mxu0 %v9080_v15  ;;  %6659 = vmatprep.mubr.f32.mxu1 %v9080_v15 }
 0x2e1   : > { %v7666_v20 = vpop.eup %7665  ;;  %v819_v21 = vmul.f32 %v9071_v3, %v807_v17 }
 0x2e2   : > { %v7668_v22 = vpop.eup %7667  ;;  %v9091_v23 = vadd.f32 %v9075_v7, %v818_v19  ;;  %v808_v39 = vmul.f32 %v7666_v20, %v9010_v40 }
 0x2e3   : > { %v9095_v24 = vadd.f32 %v9075_v7, %v819_v21  ;;  %v809_v25 = vmul.f32 %v7668_v22, %v9016_v47 }
 0x2e4   : > { %v820_v28 = vmul.f32 %v9071_v3, %v808_v39  ;;  %6616 = vmatmul.mubr.f32.vlgmr.msra.gmra.mrb[0].mxu0 %v9091_v23  ;;  %6660 = vmatmul.mubr.f32.vlgmr.msra.gmra.mrb[0].mxu1 %v9091_v23 }
 0x2e5   : > { %v7670_v29 = vpop.eup %7669  ;;  %v821_v30 = vmul.f32 %v9071_v3, %v809_v25  ;;  %7165 = vmatpush3.bf16.msra.mxu0 %v9060_v36  ;;  %6618 = vmatprep.mubr.f32.mxu0 %v9095_v24  ;;  %v6025_v36 = vld [vmem:[%s8944_s0 + $0x238] sm:$0xff] }
 0x2e6   : > { %v7672_v40 = vpop.eup %7671  ;;  %v9107_v47 = vadd.f32 %v9075_v7, %v820_v28  ;;  %v810_v31 = vmul.f32 %v7670_v29, %v9018_v48  ;;  %6662 = vmatprep.mubr.f32.mxu1 %v9095_v24  ;;  %7167 = vmatprep.subr.bf16.mxu0 %v7166_v33  ;;  %v7174_v45 = vpack.c.bf16 %v6025_v36, %v6024_v38 }
 0x2e7   : > { %v9112_v35 = vadd.f32 %v9075_v7, %v821_v30  ;;  %v811_v37 = vmul.f32 %v7672_v40, %v9024_v55 }
 0x2e8   : > { %v822_v42 = vmul.f32 %v9071_v3, %v810_v31  ;;  %6619 = vmatmul.mubr.f32.gmra.mrb[2].mxu0 %v9107_v47  ;;  %6663 = vmatmul.mubr.f32.gmra.mrb[2].mxu1 %v9107_v47 }
 0x2e9   : > { %v7674_v48 = vpop.eup %7673  ;;  %v823_v43 = vmul.f32 %v9071_v3, %v811_v37  ;;  %7169 = vmatpush3.bf16.msra.mxu0 %v7166_v33  ;;  %6621 = vmatprep.mubr.f32.mxu0 %v9112_v35 }
 0x2ea   : > { %v9123_v44 = vadd.f32 %v9075_v7, %v822_v42  ;;  %v812_v55 = vmul.f32 %v7674_v48, %v9026_v56  ;;  %6665 = vmatprep.mubr.f32.mxu1 %v9112_v35  ;;  %7171 = vmatprep.subr.bf16.mxu0 %v7170_v34  ;;  %v6035_v42 = vld [vmem:[%s8950_s29 + $0x4] ss:$0 sm:$0xff] }
 0x2eb   : > { %v9128_v46 = vadd.f32 %v9075_v7, %v823_v43 }
 0x2ec   : > { %v824_v52 = vmul.f32 %v9071_v3, %v812_v55  ;;  %6622 = vmatmul.mubr.f32.gmra.mrb[4].mxu0 %v9123_v44  ;;  %6666 = vmatmul.mubr.f32.gmra.mrb[4].mxu1 %v9123_v44  ;;  %v8368_v3 = vmov 0.0  }
 0x2ed   : > { %7173 = vmatpush3.bf16.msra.mxu0 %v7170_v34  ;;  %6624 = vmatprep.mubr.f32.mxu0 %v9128_v46 }
 0x2ee   : > { %v9137_v56 = vadd.f32 %v9075_v7, %v824_v52  ;;  %6668 = vmatprep.mubr.f32.mxu1 %v9128_v46  ;;  %7175 = vmatprep.subr.bf16.mxu0 %v7174_v45 }
 0x2ef   : > { %6715 = vmatprep.subr.mxu1 %v8368_v3 }
 0x2f0   : > { %6625 = vmatmul.mubr.f32.gmra.mrb[6].mxu0 %v9137_v56  ;;  %6669 = vmatmul.mubr.f32.gmra.mrb[6].mxu1 %v9137_v56 }
 0x2f1   : > { %7177 = vmatpush3.bf16.msra.mxu0 %v7174_v45  ;;  %6703 = vmatprep.mubr.f32.mxu0 %v9080_v15 }
 0x2f2   : > { %7179 = vmatprep.subr.bf16.mxu0 %v7178_v53  ;;  %6717 = vmatprep.mubr.msk.f32.mxu1 %vm8369_vm0, %v8368_v3 }
 0x2f5   : > { %7181 = vmatpush3.bf16.msra.mxu0 %v7178_v53 }
 0x2f6   : > { %7183 = vmatprep.subr.bf16.mxu0 %v7182_v59 }
 0x2f9   : > { %7185 = vmatpush3.bf16.msra.mxu0 %v7182_v59 }
 0x2fa   : > { %7187 = vmatprep.subr.bf16.mxu0 %v7186_v63 }
 0x2fd   : > { %7189 = vmatpush3.bf16.msra.mxu0 %v7186_v63 }
 0x2fe   : > { %7191 = vmatprep.subr.bf16.mxu0 %v7190_v2 }
 0x301   : > { %7193 = vmatpush3.bf16.msra.mxu0 %v7190_v2 }
 0x302   : > { %6755 = vmatprep.subr.mxu0 %v8368_v3 }
 0x304   : > { %6704 = vmatmul.mubr.f32.vlgmr.msra.gmra.mrb[8].mxu0 %v9091_v23 }
 0x305   : > { %6706 = vmatprep.mubr.f32.mxu0 %v9095_v24 }
 0x308   : > { %6707 = vmatmul.mubr.f32.gmra.mrb[10].mxu0 %v9107_v47 }
 0x309   : > { %6709 = vmatprep.mubr.f32.mxu0 %v9112_v35 }
 0x30c   : > { %6710 = vmatmul.mubr.f32.gmra.mrb[12].mxu0 %v9123_v44 }
 0x30d   : > { %6712 = vmatprep.mubr.f32.mxu0 %v9128_v46 }
 0x310   : > { %6713 = vmatmul.mubr.f32.gmra.mrb[14].mxu0 %v9137_v56 }
 0x311   : > { %6757 = vmatprep.mubr.msk.f32.mxu0 %vm8369_vm0, %v8368_v3 }
 0x3b7   : > { %v6617_v5 = vpop.f32.mrb[0].mxu0  ;;  %v6661_v6 = vpop.f32.mrb[0].mxu1 }
 0x3b8   : > { %v926_v7 = vpop.f32.mrb[1].mxu0  ;;  %v1056_v8 = vpop.f32.mrb[1].mxu1  ;;  %v1062_v17 = vadd.f32 %v6661_v6, %v6017_v4  ;;  %v932_v19 = vadd.f32 %v6617_v5, %v5999_v9  ;;  %v8370_v5 = vmov -1e+09  }
 0x3b9   : > { %v1057_v10 = vadd.f32 %v6017_v4, %v1056_v8  ;;  %v927_v13 = vadd.f32 %v5999_v9, %v926_v7 }
 0x3bb   : > { %v6620_v11 = vpop.f32.mrb[2].mxu0  ;;  %v6664_v12 = vpop.f32.mrb[2].mxu1  ;;  %6716 = vmatpush3.xpose.msk.msra.mxu1 %vm1225_vm1, %v1057_v10 }
 0x3bc   : > { %v936_v14 = vpop.f32.mrb[3].mxu0  ;;  %v1066_v16 = vpop.f32.mrb[3].mxu1  ;;  %6720 = vmatprep.subr.mxu1 %v8368_v3  ;;  %v1072_v28 = vadd.f32 %v6664_v12, %v6017_v4  ;;  %v942_v29 = vadd.f32 %v6620_v11, %v5999_v9 }
 0x3bd   : > { %v1067_v22 = vadd.f32 %v6017_v4, %v1066_v16  ;;  %v937_v25 = vadd.f32 %v5999_v9, %v936_v14 }
 0x3be   : > { %6718 = vmatmul.mubr.msk.f32.vlgmr.msra.gmra.mrb[8].mxu1 %vm1225_vm1, %v927_v13 }
 0x3bf   : > { %v6623_v32 = vpop.f32.mrb[4].mxu0  ;;  %v6667_v18 = vpop.f32.mrb[4].mxu1  ;;  %6721 = vmatpush3.xpose.msk.msra.mxu1 %vm1225_vm1, %v1062_v17  ;;  %6722 = vmatprep.mubr.msk.f32.mxu1 %vm8369_vm0, %v8368_v3 }
 0x3c0   : > { %v946_v20 = vpop.f32.mrb[5].mxu0  ;;  %v1076_v21 = vpop.f32.mrb[5].mxu1  ;;  %6725 = vmatprep.subr.mxu1 %v8368_v3  ;;  %v1082_v31 = vadd.f32 %v6667_v18, %v6017_v4  ;;  %v952_v34 = vadd.f32 %v6623_v32, %v5999_v9 }
 0x3c1   : > { %v1077_v30 = vadd.f32 %v6017_v4, %v1076_v21  ;;  %v947_v40 = vadd.f32 %v5999_v9, %v946_v20 }
 0x3c2   : > { %6723 = vmatmul.mubr.msk.f32.vlgmr.msra.gmra.mrb[10].mxu1 %vm1225_vm1, %v932_v19 }
 0x3c3   : > { %v6626_v39 = vpop.f32.mrb[6].mxu0  ;;  %v6670_v33 = vpop.f32.mrb[6].mxu1  ;;  %6726 = vmatpush3.xpose.msk.msra.mxu1 %vm1225_vm1, %v1067_v22  ;;  %6727 = vmatprep.mubr.msk.f32.mxu1 %vm8369_vm0, %v8368_v3 }
 0x3c4   : > { %v956_v26 = vpop.f32.mrb[7].mxu0  ;;  %v1086_v27 = vpop.f32.mrb[7].mxu1  ;;  %6730 = vmatprep.subr.mxu1 %v8368_v3  ;;  %v1092_v36 = vadd.f32 %v6670_v33, %v6017_v4  ;;  %v962_v43 = vadd.f32 %v6626_v39, %v5999_v9 }
 0x3c5   : > { %v1087_v37 = vadd.f32 %v6017_v4, %v1086_v27  ;;  %v957_v38 = vadd.f32 %v5999_v9, %v956_v26  ;;  %v721_v4 = vand.u32 127, %v718_v41 }
 0x3c6   : > { %6728 = vmatmul.mubr.msk.f32.vlgmr.msra.gmra.mrb[12].mxu1 %vm1225_vm1, %v937_v25 }
 0x3c7   : > { %6731 = vmatpush3.xpose.msk.msra.mxu1 %vm1225_vm1, %v1072_v28  ;;  %6732 = vmatprep.mubr.msk.f32.mxu1 %vm8369_vm0, %v8368_v3  ;;  %vm722_vm2 = vcmp.le.s32.totalorder %v721_v4, %v9064_v49 }
 0x3c8   : > { %6735 = vmatprep.subr.mxu1 %v8368_v3  ;;  %v9221_v6 = vsel %vm722_vm2, 0.0, %v8370_v5 }
 0x3ca   : > { %6733 = vmatmul.mubr.msk.f32.vlgmr.msra.gmra.mrb[14].mxu1 %vm1225_vm1, %v942_v29 }
 0x3cb   : > { %6736 = vmatpush3.xpose.msk.msra.mxu1 %vm1225_vm1, %v1077_v30  ;;  %6737 = vmatprep.mubr.msk.f32.mxu1 %vm8369_vm0, %v8368_v3 }
 0x3cc   : > { %6740 = vmatprep.subr.mxu1 %v8368_v3 }
 0x3ce   : > { %6738 = vmatmul.mubr.msk.f32.vlgmr.msra.gmra.mrb[16].mxu1 %vm1225_vm1, %v947_v40 }
 0x3cf   : > { %6741 = vmatpush3.xpose.msk.msra.mxu1 %vm1225_vm1, %v1082_v31  ;;  %6742 = vmatprep.mubr.msk.f32.mxu1 %vm8369_vm0, %v8368_v3 }
 0x3d0   : > { %6745 = vmatprep.subr.mxu1 %v8368_v3 }
 0x3d2   : > { %6743 = vmatmul.mubr.msk.f32.vlgmr.msra.gmra.mrb[18].mxu1 %vm1225_vm1, %v952_v34 }
 0x3d3   : > { %6746 = vmatpush3.xpose.msk.msra.mxu1 %vm1225_vm1, %v1087_v37  ;;  %6747 = vmatprep.mubr.msk.f32.mxu1 %vm8369_vm0, %v8368_v3 }
 0x3d4   : > { %6750 = vmatprep.subr.mxu1 %v8368_v3 }
 0x3d6   : > { %6748 = vmatmul.mubr.msk.f32.vlgmr.msra.gmra.mrb[20].mxu1 %vm1225_vm1, %v957_v38 }
 0x3d7   : > { %v6705_v48 = vpop.f32.mrb[8].mxu0  ;;  %6751 = vmatpush3.xpose.msk.msra.mxu1 %vm1225_vm1, %v1092_v36  ;;  %6752 = vmatprep.mubr.msk.f32.mxu1 %vm8369_vm0, %v8368_v3 }
 0x3d8   : > { %v1186_v55 = vpop.f32.mrb[9].mxu0  ;;  %6760 = vmatprep.subr.mxu1 %v8368_v3  ;;  %v1192_v45 = vadd.f32 %v6705_v48, %v6035_v42 }
 0x3d9   : > { %v1187_v50 = vadd.f32 %v6035_v42, %v1186_v55 }
 0x3da   : > { %6753 = vmatmul.mubr.msk.f32.vlgmr.msra.gmra.mrb[22].mxu1 %vm1225_vm1, %v962_v43 }
 0x3db   : > { %v6708_v51 = vpop.f32.mrb[10].mxu0  ;;  %6756 = vmatpush3.msra.mxu0 %v1187_v50  ;;  %6761 = vmatpush3.msra.mxu1 %v1192_v45 }
 0x3dc   : > { %v9203_v52 = vadd.f32 %v6708_v51, %v6035_v42  ;;  %v1196_v53 = vpop.f32.mrb[11].mxu0  ;;  %6765 = vmatprep.subr.mxu0 %v8368_v3  ;;  %6762 = vmatprep.mubr.msk.f32.mxu1 %vm8369_vm0, %v8368_v3 }
 0x3dd   : > { %v9208_v54 = vadd.f32 %v6035_v42, %v1196_v53  ;;  %6770 = vmatprep.subr.mxu1 %v8368_v3 }
 0x3df   : > { %v6711_v57 = vpop.f32.mrb[12].mxu0 }
 0x3e0   : > { %v9211_v59 = vadd.f32 %v6711_v57, %v6035_v42  ;;  %v1206_v60 = vpop.f32.mrb[13].mxu0 }
 0x3e1   : > { %v9213_v61 = vadd.f32 %v6035_v42, %v1206_v60 }
 0x3e3   : > { %v6714_v63 = vpop.f32.mrb[14].mxu0 }
 0x3e4   : > { %v9215_v0 = vadd.f32 %v6714_v63, %v6035_v42  ;;  %v1216_v1 = vpop.f32.mrb[15].mxu0 }
 0x3e5   : > { %v9217_v2 = vadd.f32 %v6035_v42, %v1216_v1 }
 0x491   : > { %v1298_v7 = vpop.f32.mrb[8].mxu1 }
 0x492   : > { %v1299_v8 = vadd.f32 %v1298_v7, %v9221_v6  ;;  %v6719_v9 = vpop.f32.mrb[9].mxu1 }
 0x494   : > { %v1835_v10 = vsel %vm1834_vm3, %v1299_v8, -inf }
 0x495   : > { %1836 = vmax.xlane.f32.xlu1 %v1835_v10  ;;  %v1374_v11 = vpop.f32.mrb[10].mxu1 }
 0x496   : > { %v1375_v12 = vadd.f32 %v1374_v11, %v9221_v6  ;;  %v6724_v13 = vpop.f32.mrb[11].mxu1 }
 0x498   : > { %v1838_v14 = vsel %vm1834_vm3, %v1375_v12, -inf }
 0x499   : > { %1839 = vmax.xlane.f32.xlu0 %v1838_v14  ;;  %v1450_v41 = vpop.f32.mrb[12].mxu1 }
 0x49a   : > { %v1451_v16 = vadd.f32 %v1450_v41, %v9221_v6  ;;  %v6729_v17 = vpop.f32.mrb[13].mxu1 }
 0x49c   : > { %v1841_v32 = vsel %vm1834_vm3, %v1451_v16, -inf }
 0x49d   : > { %1842 = vmax.xlane.f32.xlu1 %v1841_v32  ;;  %v1526_v18 = vpop.f32.mrb[14].mxu1 }
 0x49e   : > { %v1527_v19 = vadd.f32 %v1526_v18, %v9221_v6  ;;  %v6734_v20 = vpop.f32.mrb[15].mxu1 }
 0x4a0   : > { %v1844_v21 = vsel %vm1834_vm3, %v1527_v19, -inf }
 0x4a1   : > { %1845 = vmax.xlane.f32.xlu0 %v1844_v21  ;;  %v1602_v22 = vpop.f32.mrb[16].mxu1 }
 0x4a2   : > { %v1603_v39 = vadd.f32 %v1602_v22, %v9221_v6  ;;  %v6739_v33 = vpop.f32.mrb[17].mxu1 }
 0x4a4   : > { %v1847_v25 = vsel %vm1834_vm3, %v1603_v39, -inf }
 0x4a5   : > { %1848 = vmax.xlane.f32.xlu1 %v1847_v25  ;;  %v1678_v26 = vpop.f32.mrb[18].mxu1 }
 0x4a6   : > { %v1679_v27 = vadd.f32 %v1678_v26, %v9221_v6  ;;  %v6744_v28 = vpop.f32.mrb[19].mxu1 }
 0x4a8   : > { %v1850_v29 = vsel %vm1834_vm3, %v1679_v27, -inf }
 0x4a9   : > { %1851 = vmax.xlane.f32.xlu0 %v1850_v29  ;;  %v1754_v30 = vpop.f32.mrb[20].mxu1 }
 0x4aa   : > { %v1755_v40 = vadd.f32 %v1754_v30, %v9221_v6  ;;  %v6749_v31 = vpop.f32.mrb[21].mxu1 }
 0x4ac   : > { %v1853_v34 = vsel %vm1834_vm3, %v1755_v40, -inf }
 0x4ad   : > { %1854 = vmax.xlane.f32.xlu1 %v1853_v34  ;;  %v1830_v37 = vpop.f32.mrb[22].mxu1 }
 0x4ae   : > { %v1831_v38 = vadd.f32 %v1830_v37, %v9221_v6  ;;  %v6754_v36 = vpop.f32.mrb[23].mxu1 }
 0x4b0   : > { %v1856_v42 = vsel %vm1834_vm3, %v1831_v38, -inf }
 0x4b1   : > { %1857 = vmax.xlane.f32.xlu0 %v1856_v42 }
 0x522   : > { %v1837_v48 = vpop.xlane.xlu1 %1836 }
 0x523   : > { %v1859_v43 = vsub.f32 %v1299_v8, %v1837_v48 }
 0x525   : > { %v1867_v55 = vmul.f32 1.442695, %v1859_v43 }
 0x526   : > { %v1840_v45 = vpop.xlane.xlu0 %1839 }
 0x527   : > { %7675 = vpow2.f32 %v1867_v55  ;;  %v1860_v50 = vsub.f32 %v1375_v12, %v1840_v45 }
 0x529   : > { %v1869_v51 = vmul.f32 1.442695, %v1860_v50 }
 0x52a   : > { %v1843_v53 = vpop.xlane.xlu1 %1842 }
 0x52b   : > { %7677 = vpow2.f32 %v1869_v51  ;;  %v1861_v57 = vsub.f32 %v1451_v16, %v1843_v53 }
 0x52d   : > { %v1871_v60 = vmul.f32 1.442695, %v1861_v57 }
 0x52e   : > { %v1846_v63 = vpop.xlane.xlu0 %1845 }
 0x52f   : > { %7679 = vpow2.f32 %v1871_v60  ;;  %v1862_v1 = vsub.f32 %v1527_v19, %v1846_v63 }
 0x531   : > { %v7676_v4 = vpop.eup %7675  ;;  %v1873_v5 = vmul.f32 1.442695, %v1862_v1 }
 0x532   : > { %v1849_v7 = vpop.xlane.xlu1 %1848  ;;  %v1883_v9 = vsel %vm1834_vm3, %v7676_v4, 0.0 }
 0x533   : > { %7681 = vpow2.f32 %v1873_v5  ;;  %v1863_v10 = vsub.f32 %v1603_v39, %v1849_v7  ;;  %1884 = vadd.xlane.f32.xlu1 %v1883_v9 }
 0x535   : > { %v7678_v8 = vpop.eup %7677  ;;  %v1875_v11 = vmul.f32 1.442695, %v1863_v10 }
 0x536   : > { %v1852_v13 = vpop.xlane.xlu0 %1851  ;;  %v1886_v12 = vsel %vm1834_vm3, %v7678_v8, 0.0 }
 0x537   : > { %7683 = vpow2.f32 %v1875_v11  ;;  %v1864_v14 = vsub.f32 %v1679_v27, %v1852_v13  ;;  %1887 = vadd.xlane.f32.xlu0 %v1886_v12 }
 0x539   : > { %v9241_v41 = vpop.eup %7679  ;;  %v1877_v16 = vmul.f32 1.442695, %v1864_v14 }
 0x53a   : > { %v1855_v17 = vpop.xlane.xlu1 %1854  ;;  %v1889_v32 = vsel %vm1834_vm3, %v9241_v41, 0.0 }
 0x53b   : > { %7685 = vpow2.f32 %v1877_v16  ;;  %v1865_v18 = vsub.f32 %v1755_v40, %v1855_v17  ;;  %1890 = vadd.xlane.f32.xlu1 %v1889_v32 }
 0x53d   : > { %v9245_v19 = vpop.eup %7681  ;;  %v1879_v20 = vmul.f32 1.442695, %v1865_v18  ;;  %v6060_v18 = vld [vmem:[%s8944_s0 + $0x80] sm:$0xff] }
 0x53e   : > { %v1858_v21 = vpop.xlane.xlu0 %1857  ;;  %v1892_v22 = vsel %vm1834_vm3, %v9245_v19, 0.0 }
 0x53f   : > { %7687 = vpow2.f32 %v1879_v20  ;;  %v1866_v39 = vsub.f32 %v1831_v38, %v1858_v21  ;;  %1893 = vadd.xlane.f32.xlu0 %v1892_v22  ;;  %v6061_v20 = vld [vmem:[%s8944_s0 + $0x88] sm:$0xff] }
 0x541   : > { %v9249_v33 = vpop.eup %7683  ;;  %v1881_v25 = vmul.f32 1.442695, %v1866_v39  ;;  %v7194_v39 = vpack.c.bf16 %v6061_v20, %v6060_v18  ;;  %v6088_v18 = vld [vmem:[%s8944_s0 + $0x1d0] sm:$0xff]  ;;  %v6089_v20 = vld [vmem:[%s8944_s0 + $0x1d8] sm:$0xff] }
 0x542   : > { %v1895_v26 = vsel %vm1834_vm3, %v9249_v33, 0.0 }
 0x543   : > { %7689 = vpow2.f32 %v1881_v25  ;;  %1896 = vadd.xlane.f32.xlu1 %v1895_v26  ;;  %v6078_v26 = vld [vmem:[%s8944_s0 + $0x180] sm:$0xff] }
 0x545   : > { %v9253_v27 = vpop.eup %7685 }
 0x546   : > { %v1898_v28 = vsel %vm1834_vm3, %v9253_v27, 0.0 }
 0x547   : > { %1899 = vadd.xlane.f32.xlu0 %v1898_v28  ;;  %v6079_v28 = vld [vmem:[%s8944_s0 + $0x188] sm:$0xff] }
 0x549   : > { %v9257_v29 = vpop.eup %7687 }
 0x54a   : > { %v1901_v30 = vsel %vm1834_vm3, %v9257_v29, 0.0 }
 0x54b   : > { %1902 = vadd.xlane.f32.xlu1 %v1901_v30 }
 0x54d   : > { %v9261_v40 = vpop.eup %7689 }
 0x54e   : > { %v1904_v31 = vsel %vm1834_vm3, %v9261_v40, 0.0 }
 0x54f   : > { %1905 = vadd.xlane.f32.xlu0 %v1904_v31 }
 0x5c0   : > { %v1885_v34 = vpop.xlane.xlu1 %1884 }
 0x5c1   : > { %7691 = vrcp.f32 %v1885_v34 }
 0x5c4   : > { %v1888_v37 = vpop.xlane.xlu0 %1887 }
 0x5c5   : > { %7693 = vrcp.f32 %v1888_v37 }
 0x5c8   : > { %v1891_v38 = vpop.xlane.xlu1 %1890 }
 0x5c9   : > { %7695 = vrcp.f32 %v1891_v38 }
 0x5cb   : > { %v7692_v36 = vpop.eup %7691 }
 0x5cc   : > { %v1915_v42 = vmul.f32 %v7692_v36, %v1885_v34  ;;  %v1894_v48 = vpop.xlane.xlu0 %1893  ;;  %v7226_v34 = vpack.c.bf16 %v6079_v28, %v6078_v26 }
 0x5cd   : > { %7697 = vrcp.f32 %v1894_v48 }
 0x5ce   : > { %v1923_v43 = vsub.f32 2.0, %v1915_v42 }
 0x5cf   : > { %v7694_v55 = vpop.eup %7693 }
 0x5d0   : > { %v1931_v45 = vmul.f32 %v7692_v36, %v1923_v43  ;;  %v1916_v50 = vmul.f32 %v7694_v55, %v1888_v37  ;;  %v1897_v51 = vpop.xlane.xlu1 %1896  ;;  %v6063_v36 = vld [vmem:[%s8944_s0 + $0x98] sm:$0xff] }
 0x5d1   : > { %7699 = vrcp.f32 %v1897_v51 }
 0x5d2   : > { %v1939_v53 = vmul.f32 %v7676_v4, %v1931_v45  ;;  %v1924_v57 = vsub.f32 2.0, %v1916_v50  ;;  %v6065_v45 = vld [vmem:[%s8944_s0 + $0xa8] sm:$0xff] }
 0x5d3   : > { %v7696_v60 = vpop.eup %7695 }
 0x5d4   : > { %v1932_v63 = vmul.f32 %v7694_v55, %v1924_v57  ;;  %v1917_v1 = vmul.f32 %v7696_v60, %v1891_v38  ;;  %6758 = vmatmul.mubr.msk.f32.vlgmr.msra.gmra.mrb[16].mxu0 %vm1834_vm3, %v1939_v53  ;;  %v1900_v5 = vpop.xlane.xlu0 %1899  ;;  %v6062_v38 = vld [vmem:[%s8944_s0 + $0x90] sm:$0xff]  ;;  %v6064_v55 = vld [vmem:[%s8944_s0 + $0xa0] sm:$0xff]  ;;  %v6081_v53 = vld [vmem:[%s8944_s0 + $0x198] sm:$0xff] }
 0x5d5   : > { %6766 = vmatpush3.msra.mxu0 %v9208_v54  ;;  %7701 = vrcp.f32 %v1900_v5  ;;  %6767 = vmatprep.mubr.msk.f32.mxu0 %vm8369_vm0, %v8368_v3  ;;  %v7198_v43 = vpack.c.bf16 %v6063_v36, %v6062_v38  ;;  %v6066_v57 = vld [vmem:[%s8944_s0 + $0xb0] sm:$0xff]  ;;  %v6099_v36 = vld [vmem:[%s8944_s0 + $0x298] sm:$0xff] }
 0x5d6   : > { %v1940_v7 = vmul.f32 %v7678_v8, %v1932_v63  ;;  %v1925_v9 = vsub.f32 2.0, %v1917_v1  ;;  %6775 = vmatprep.subr.mxu0 %v8368_v3  ;;  %v6067_v63 = vld [vmem:[%s8944_s0 + $0xb8] sm:$0xff]  ;;  %v6082_v1 = vld [vmem:[%s8944_s0 + $0x1a0] sm:$0xff]  ;;  %v6098_v38 = vld [vmem:[%s8944_s0 + $0x290] sm:$0xff] }
 0x5d7   : > { %v7698_v10 = vpop.eup %7697 }
 0x5d8   : > { %v1933_v11 = vmul.f32 %v7696_v60, %v1925_v9  ;;  %v1918_v4 = vmul.f32 %v7698_v10, %v1894_v48  ;;  %v1903_v13 = vpop.xlane.xlu1 %1902  ;;  %6763 = vmatmul.mubr.msk.f32.vlgmr.msra.gmra.mrb[24].mxu1 %vm1834_vm3, %v1940_v7  ;;  %v6068_v9 = vld [vmem:[%s8944_s0 + $0xc0] sm:$0xff] }
 0x5d9   : > { %7703 = vrcp.f32 %v1903_v13  ;;  %6771 = vmatpush3.msra.mxu1 %v9203_v52  ;;  %6772 = vmatprep.mubr.msk.f32.mxu1 %vm8369_vm0, %v8368_v3 }
 0x5da   : > { %v1941_v54 = vmul.f32 %v9241_v41, %v1933_v11  ;;  %v1926_v8 = vsub.f32 2.0, %v1918_v4  ;;  %6780 = vmatprep.subr.mxu1 %v8368_v3  ;;  %v6084_v11 = vld [vmem:[%s8944_s0 + $0x1b0] sm:$0xff]  ;;  %v6085_v4 = vld [vmem:[%s8944_s0 + $0x1b8] sm:$0xff] }
 0x5db   : > { %v7700_v12 = vpop.eup %7699 }
 0x5dc   : > { %v1934_v14 = vmul.f32 %v7698_v10, %v1926_v8  ;;  %v1919_v16 = vmul.f32 %v7700_v12, %v1897_v51  ;;  %6768 = vmatmul.mubr.msk.f32.vlgmr.msra.gmra.mrb[18].mxu0 %vm1834_vm3, %v1941_v54  ;;  %v1906_v17 = vpop.xlane.xlu0 %1905  ;;  %v6080_v51 = vld [vmem:[%s8944_s0 + $0x190] sm:$0xff]  ;;  %v6069_v10 = vld [vmem:[%s8944_s0 + $0xc8] sm:$0xff]  ;;  %v7238_v54 = vpack.c.bf16 %v6085_v4, %v6084_v11 }
 0x5dd   : > { %6776 = vmatpush3.msra.mxu0 %v9213_v61  ;;  %7705 = vrcp.f32 %v1906_v17  ;;  %6777 = vmatprep.mubr.msk.f32.mxu0 %vm8369_vm0, %v8368_v3  ;;  %v7230_v60 = vpack.c.bf16 %v6081_v53, %v6080_v51  ;;  %v6070_v8 = vld [vmem:[%s8944_s0 + $0xd0] sm:$0xff]  ;;  %v6105_v51 = vld [vmem:[%s8944_s0 + $0x2c8] sm:$0xff] }
 0x5de   : > { %v1942_v52 = vmul.f32 %v9245_v19, %v1934_v14  ;;  %v1927_v41 = vsub.f32 2.0, %v1919_v16  ;;  %6785 = vmatprep.subr.mxu0 %v8368_v3  ;;  %v6086_v14 = vld [vmem:[%s8944_s0 + $0x1c0] sm:$0xff]  ;;  %v6087_v16 = vld [vmem:[%s8944_s0 + $0x1c8] sm:$0xff] }
 0x5df   : > { %v7702_v32 = vpop.eup %7701 }
 0x5e0   : > { %v1935_v21 = vmul.f32 %v7700_v12, %v1927_v41  ;;  %v1920_v22 = vmul.f32 %v7702_v32, %v1900_v5  ;;  %6773 = vmatmul.mubr.msk.f32.vlgmr.msra.gmra.mrb[26].mxu1 %vm1834_vm3, %v1942_v52  ;;  %v6083_v5 = vld [vmem:[%s8944_s0 + $0x1a8] sm:$0xff]  ;;  %v6071_v12 = vld [vmem:[%s8944_s0 + $0xd8] sm:$0xff]  ;;  %v7242_v52 = vpack.c.bf16 %v6087_v16, %v6086_v14  ;;  %v6072_v41 = vld [vmem:[%s8944_s0 + $0xe0] sm:$0xff] }
 0x5e1   : > { %6781 = vmatpush3.msra.mxu1 %v9211_v59  ;;  %6782 = vmatprep.mubr.msk.f32.mxu1 %vm8369_vm0, %v8368_v3  ;;  %v7234_v7 = vpack.c.bf16 %v6083_v5, %v6082_v1  ;;  %v6110_v5 = vld [vmem:[%s8944_s0 + $0x2f0] sm:$0xff] }
 0x5e2   : > { %v1943_v61 = vmul.f32 %v9249_v33, %v1935_v21  ;;  %v1928_v19 = vsub.f32 2.0, %v1920_v22  ;;  %6790 = vmatprep.subr.mxu1 %v8368_v3  ;;  %v7246_v22 = vpack.c.bf16 %v6089_v20, %v6088_v18  ;;  %v6077_v20 = vld [vmem:[%s8950_s29 + $0x1] ss:$0 sm:$0xff] }
 0x5e3   : > { %v7704_v25 = vpop.eup %7703 }
 0x5e4   : > { %v1936_v30 = vmul.f32 %v7702_v32, %v1928_v19  ;;  %v1921_v31 = vmul.f32 %v7704_v25, %v1903_v13  ;;  %6778 = vmatmul.mubr.msk.f32.vlgmr.msra.gmra.mrb[20].mxu0 %vm1834_vm3, %v1943_v61  ;;  %v7210_v13 = vpack.c.bf16 %v6069_v10, %v6068_v9  ;;  %v6073_v32 = vld [vmem:[%s8944_s0 + $0xe8] sm:$0xff]  ;;  %v6074_v61 = vld [vmem:[%s8944_s0 + $0xf0] sm:$0xff]  ;;  %v6075_v19 = vld [vmem:[%s8944_s0 + $0xf8] sm:$0xff] }
 0x5e5   : > { %6786 = vmatpush3.msra.mxu0 %v9217_v2  ;;  %6787 = vmatprep.mubr.msk.f32.mxu0 %vm8369_vm0, %v8368_v3  ;;  %v7218_v21 = vpack.c.bf16 %v6073_v32, %v6072_v41  ;;  %v7222_v26 = vpack.c.bf16 %v6075_v19, %v6074_v61 }
 0x5e6   : > { %v1944_v59 = vmul.f32 %v9253_v27, %v1936_v30  ;;  %v1929_v33 = vsub.f32 2.0, %v1921_v31  ;;  %7195 = vmatprep.subr.bf16.mxu0 %v7194_v39  ;;  %v6092_v30 = vld [vmem:[%s8944_s0 + $0x1f0] sm:$0xff]  ;;  %v6093_v31 = vld [vmem:[%s8944_s0 + $0x1f8] sm:$0xff] }
 0x5e7   : > { %v7706_v37 = vpop.eup %7705 }
 0x5e8   : > { %v1937_v42 = vmul.f32 %v7704_v25, %v1929_v33  ;;  %v1922_v48 = vmul.f32 %v7706_v37, %v1906_v17  ;;  %6783 = vmatmul.mubr.msk.f32.vlgmr.msra.gmra.mrb[28].mxu1 %vm1834_vm3, %v1944_v59  ;;  %v7214_v17 = vpack.c.bf16 %v6071_v12, %v6070_v8  ;;  %v6091_v25 = vld [vmem:[%s8944_s0 + $0x1e8] sm:$0xff]  ;;  %v6096_v59 = vld [vmem:[%s8944_s0 + $0x280] sm:$0xff] }
 0x5e9   : > { %6791 = vmatpush3.msra.mxu1 %v9215_v0  ;;  %6792 = vmatprep.mubr.msk.f32.mxu1 %vm8369_vm0, %v8368_v3  ;;  %v6097_v33 = vld [vmem:[%s8944_s0 + $0x288] sm:$0xff] }
 0x5ea   : > { %v1945_v2 = vmul.f32 %v9257_v29, %v1937_v42  ;;  %v1930_v27 = vsub.f32 2.0, %v1922_v48  ;;  %7227 = vmatprep.subr.bf16.mxu1 %v7226_v34  ;;  %v7202_v29 = vpack.c.bf16 %v6065_v45, %v6064_v55  ;;  %v7262_v42 = vpack.c.bf16 %v6099_v36, %v6098_v38  ;;  %v6100_v48 = vld [vmem:[%s8944_s0 + $0x2a0] sm:$0xff]  ;;  %v6103_v55 = vld [vmem:[%s8944_s0 + $0x2b8] sm:$0xff] }
 0x5ec   : > { %v1938_v50 = vmul.f32 %v7706_v37, %v1930_v27  ;;  %6788 = vmatmul.mubr.msk.f32.vlgmr.msra.gmra.mrb[22].mxu0 %vm1834_vm3, %v1945_v2  ;;  %v7258_v37 = vpack.c.bf16 %v6097_v33, %v6096_v59  ;;  %v6101_v2 = vld [vmem:[%s8944_s0 + $0x2a8] sm:$0xff] }
 0x5ed   : > { %7197 = vmatpush3.bf16.msra.mxu0 %v7194_v39  ;;  %6827 = vmatprep.mubr.f32.mxu0 %v9080_v15  ;;  %v6090_v39 = vld [vmem:[%s8944_s0 + $0x1e0] sm:$0xff]  ;;  %v7266_v27 = vpack.c.bf16 %v6101_v2, %v6100_v48 }
 0x5ee   : > { %v1946_v0 = vmul.f32 %v9261_v40, %v1938_v50  ;;  %7199 = vmatprep.subr.bf16.mxu0 %v7198_v43  ;;  %v7206_v40 = vpack.c.bf16 %v6067_v63, %v6066_v57  ;;  %v7250_v28 = vpack.c.bf16 %v6091_v25, %v6090_v39  ;;  %v6104_v50 = vld [vmem:[%s8944_s0 + $0x2c0] sm:$0xff]  ;;  %v6109_v63 = vld [vmem:[%s8944_s0 + $0x2e8] sm:$0xff] }
 0x5ef   : > { %v7274_v53 = vpack.c.bf16 %v6105_v51, %v6104_v50  ;;  %v6113_v50 = vld [vmem:[%s8950_s29 + $0x5] ss:$0 sm:$0xff] }
 0x5f0   : > { %6793 = vmatmul.mubr.msk.f32.vlgmr.msra.gmra.mrb[30].mxu1 %vm1834_vm3, %v1946_v0  ;;  %v6106_v0 = vld [vmem:[%s8944_s0 + $0x2d0] sm:$0xff] }
 0x5f1   : > { %7201 = vmatpush3.bf16.msra.mxu0 %v7198_v43  ;;  %7229 = vmatpush3.bf16.msra.mxu1 %v7226_v34  ;;  %v7254_v34 = vpack.c.bf16 %v6093_v31, %v6092_v30  ;;  %v6102_v43 = vld [vmem:[%s8944_s0 + $0x2b0] sm:$0xff] }
 0x5f2   : > { %6871 = vmatprep.mubr.f32.mxu1 %v9080_v15  ;;  %7203 = vmatprep.subr.bf16.mxu0 %v7202_v29  ;;  %v7270_v45 = vpack.c.bf16 %v6103_v55, %v6102_v43 }
 0x5f3   : > { %7231 = vmatprep.subr.bf16.mxu1 %v7230_v60 }
 0x5f5   : > { %7205 = vmatpush3.bf16.msra.mxu0 %v7202_v29  ;;  %7233 = vmatpush3.bf16.msra.mxu1 %v7230_v60  ;;  %v6107_v29 = vld [vmem:[%s8944_s0 + $0x2d8] sm:$0xff]  ;;  %v6108_v60 = vld [vmem:[%s8944_s0 + $0x2e0] sm:$0xff] }
 0x5f6   : > { %7207 = vmatprep.subr.bf16.mxu0 %v7206_v40  ;;  %7235 = vmatprep.subr.bf16.mxu1 %v7234_v7  ;;  %v7278_v57 = vpack.c.bf16 %v6107_v29, %v6106_v0  ;;  %v7282_v1 = vpack.c.bf16 %v6109_v63, %v6108_v60 }
 0x5f9   : > { %7209 = vmatpush3.bf16.msra.mxu0 %v7206_v40  ;;  %7237 = vmatpush3.bf16.msra.mxu1 %v7234_v7  ;;  %v6111_v40 = vld [vmem:[%s8944_s0 + $0x2f8] sm:$0xff]  ;;  %s5507_s0 = sadd.s32 (!%p6194_p0), 2, %s6195_s5 }
 0x5fa   : > { %7211 = vmatprep.subr.bf16.mxu0 %v7210_v13  ;;  %7239 = vmatprep.subr.bf16.mxu1 %v7238_v54  ;;  %v7286_v7 = vpack.c.bf16 %v6111_v40, %v6110_v5  ;;  %s5508_s26 = sld [smem:[#allocation4 + %s5507_s0]] (!%p6194_p0) }
 0x5fd   : > { %7213 = vmatpush3.bf16.msra.mxu0 %v7210_v13  ;;  %7241 = vmatpush3.bf16.msra.mxu1 %v7238_v54 }
 0x5fe   : > { %7215 = vmatprep.subr.bf16.mxu0 %v7214_v17  ;;  %7243 = vmatprep.subr.bf16.mxu1 %v7242_v52 }
 0x601   : > { %7217 = vmatpush3.bf16.msra.mxu0 %v7214_v17  ;;  %7245 = vmatpush3.bf16.msra.mxu1 %v7242_v52  ;;  %v6095_v17 = vld [vmem:[%s8950_s29 + $0x3] ss:$0 sm:$0xff]  ;;  %s5513_s29 = sld [smem:[#allocation4 + %s5512_s12]] (!%p6194_p0) }
 0x602   : > { %7219 = vmatprep.subr.bf16.mxu0 %v7218_v21  ;;  %7247 = vmatprep.subr.bf16.mxu1 %v7246_v22 }
 0x605   : > { %7221 = vmatpush3.bf16.msra.mxu0 %v7218_v21  ;;  %7249 = vmatpush3.bf16.msra.mxu1 %v7246_v22 }
 0x606   : > { %7223 = vmatprep.subr.bf16.mxu0 %v7222_v26  ;;  %7251 = vmatprep.subr.bf16.mxu1 %v7250_v28 }
 0x607   : > { %s5829_s11 = scalar_lea.vmem (!%p6194_p0), [#allocation2], %s5513_s29 }
 0x609   : > { %7225 = vmatpush3.bf16.msra.mxu0 %v7222_v26  ;;  %7253 = vmatpush3.bf16.msra.mxu1 %v7250_v28 }
 0x60a   : > { %7255 = vmatprep.subr.bf16.mxu1 %v7254_v34  ;;  %7259 = vmatprep.subr.bf16.mxu0 %v7258_v37 }
 0x60c   : > { %6828 = vmatmul.mubr.f32.vlgmr.msra.gmra.mrb[24].mxu0 %v9091_v23 }
 0x60d   : > { %6830 = vmatprep.mubr.f32.mxu0 %v9095_v24  ;;  %7257 = vmatpush3.bf16.msra.mxu1 %v7254_v34 }
 0x60e   : > { %7261 = vmatpush3.bf16.msra.mxu0 %v7258_v37  ;;  %6927 = vmatprep.subr.mxu1 %v8368_v3 }
 0x60f   : > { %7263 = vmatprep.subr.bf16.mxu0 %v7262_v42 }
 0x610   : > { %6831 = vmatmul.mubr.f32.gmra.mrb[26].mxu0 %v9107_v47  ;;  %6872 = vmatmul.mubr.f32.vlgmr.msra.gmra.mrb[32].mxu1 %v9091_v23 }
 0x611   : > { %6833 = vmatprep.mubr.f32.mxu0 %v9112_v35  ;;  %6874 = vmatprep.mubr.f32.mxu1 %v9095_v24 }
 0x612   : > { %7265 = vmatpush3.bf16.msra.mxu0 %v7262_v42 }
 0x613   : > { %7267 = vmatprep.subr.bf16.mxu0 %v7266_v27 }
 0x614   : > { %6834 = vmatmul.mubr.f32.gmra.mrb[28].mxu0 %v9123_v44  ;;  %6875 = vmatmul.mubr.f32.gmra.mrb[34].mxu1 %v9107_v47 }
 0x615   : > { %6836 = vmatprep.mubr.f32.mxu0 %v9128_v46  ;;  %6877 = vmatprep.mubr.f32.mxu1 %v9112_v35 }
 0x616   : > { %7269 = vmatpush3.bf16.msra.mxu0 %v7266_v27 }
 0x617   : > { %7271 = vmatprep.subr.bf16.mxu0 %v7270_v45 }
 0x618   : > { %6837 = vmatmul.mubr.f32.gmra.mrb[30].mxu0 %v9137_v56  ;;  %6878 = vmatmul.mubr.f32.gmra.mrb[36].mxu1 %v9123_v44 }
 0x619   : > { %6880 = vmatprep.mubr.f32.mxu1 %v9128_v46  ;;  %6915 = vmatprep.mubr.f32.mxu0 %v9080_v15 }
 0x61a   : > { %7273 = vmatpush3.bf16.msra.mxu0 %v7270_v45 }
 0x61b   : > { %7275 = vmatprep.subr.bf16.mxu0 %v7274_v53 }
 0x61c   : > { %6881 = vmatmul.mubr.f32.gmra.mrb[38].mxu1 %v9137_v56 }
 0x61d   : > { %6929 = vmatprep.mubr.msk.f32.mxu1 %vm8369_vm0, %v8368_v3 }
 0x61e   : > { %7277 = vmatpush3.bf16.msra.mxu0 %v7274_v53 }
 0x61f   : > { %7279 = vmatprep.subr.bf16.mxu0 %v7278_v57 }
 0x622   : > { %7281 = vmatpush3.bf16.msra.mxu0 %v7278_v57 }
 0x623   : > { %7283 = vmatprep.subr.bf16.mxu0 %v7282_v1 }
 0x626   : > { %7285 = vmatpush3.bf16.msra.mxu0 %v7282_v1 }
 0x627   : > { %7287 = vmatprep.subr.bf16.mxu0 %v7286_v7 }
 0x62a   : > { %7289 = vmatpush3.bf16.msra.mxu0 %v7286_v7 }
 0x62b   : > { %6967 = vmatprep.subr.mxu0 %v8368_v3 }
 0x62d   : > { %6916 = vmatmul.mubr.f32.vlgmr.msra.gmra.mrb[32].mxu0 %v9091_v23 }
 0x62e   : > { %6918 = vmatprep.mubr.f32.mxu0 %v9095_v24 }
 0x631   : > { %6919 = vmatmul.mubr.f32.gmra.mrb[34].mxu0 %v9107_v47 }
 0x632   : > { %6921 = vmatprep.mubr.f32.mxu0 %v9112_v35 }
 0x635   : > { %6922 = vmatmul.mubr.f32.gmra.mrb[36].mxu0 %v9123_v44 }
 0x636   : > { %6924 = vmatprep.mubr.f32.mxu0 %v9128_v46 }
 0x639   : > { %6925 = vmatmul.mubr.f32.gmra.mrb[38].mxu0 %v9137_v56 }
 0x63a   : > { %6969 = vmatprep.mubr.msk.f32.mxu0 %vm8369_vm0, %v8368_v3 }
 0x6a7   : > { %v9379_v15 = vpop.f32.mrb[16].mxu0 }
 0x6a8   : > { %v6759_v9 = vpop.f32.mrb[17].mxu0 }
 0x6ab   : > { %v9381_v10 = vpop.f32.mrb[24].mxu1 }
 0x6ac   : > { %v6764_v23 = vpop.f32.mrb[25].mxu1 }
 0x6af   : > { %v9383_v24 = vpop.f32.mrb[18].mxu0 }
 0x6b0   : > { %v6769_v47 = vpop.f32.mrb[19].mxu0 }
 0x6b3   : > { %v9385_v35 = vpop.f32.mrb[26].mxu1 }
 0x6b4   : > { %v6774_v44 = vpop.f32.mrb[27].mxu1 }
 0x6b7   : > { %v9387_v46 = vpop.f32.mrb[20].mxu0 }
 0x6b8   : > { %v6779_v56 = vpop.f32.mrb[21].mxu0 }
 0x6bb   : > { %v9389_v11 = vpop.f32.mrb[28].mxu1 }
 0x6bc   : > { %v6784_v4 = vpop.f32.mrb[29].mxu1 }
 0x6bf   : > { %v9391_v13 = vpop.f32.mrb[22].mxu0 }
 0x6c0   : > { %v6789_v54 = vpop.f32.mrb[23].mxu0 }
 0x6c3   : > { %v9393_v8 = vpop.f32.mrb[30].mxu1 }
 0x6c4   : > { %v6794_v12 = vpop.f32.mrb[31].mxu1 }
 0x6df   : > { %v6829_v14 = vpop.f32.mrb[24].mxu0 }
 0x6e0   : > { %v2630_v16 = vpop.f32.mrb[25].mxu0  ;;  %v2636_v31 = vadd.f32 %v6829_v14, %v6077_v20 }
 0x6e1   : > { %v2631_v19 = vadd.f32 %v6077_v20, %v2630_v16 }
 0x6e3   : > { %v6832_v52 = vpop.f32.mrb[26].mxu0  ;;  %v6873_v41 = vpop.f32.mrb[32].mxu1 }
 0x6e4   : > { %v2640_v32 = vpop.f32.mrb[27].mxu0  ;;  %v2760_v18 = vpop.f32.mrb[33].mxu1  ;;  %v2766_v26 = vadd.f32 %v6873_v41, %v6095_v17  ;;  %v2646_v48 = vadd.f32 %v6832_v52, %v6077_v20 }
 0x6e5   : > { %v2761_v21 = vadd.f32 %v6095_v17, %v2760_v18  ;;  %v2641_v38 = vadd.f32 %v6077_v20, %v2640_v32 }
 0x6e7   : > { %v6835_v22 = vpop.f32.mrb[28].mxu0  ;;  %v6876_v61 = vpop.f32.mrb[34].mxu1  ;;  %6928 = vmatpush3.xpose.msk.msra.mxu1 %vm1225_vm1, %v2761_v21 }
 0x6e8   : > { %v2650_v39 = vpop.f32.mrb[29].mxu0  ;;  %v2770_v25 = vpop.f32.mrb[35].mxu1  ;;  %6932 = vmatprep.subr.mxu1 %v8368_v3  ;;  %v2776_v42 = vadd.f32 %v6876_v61, %v6095_v17  ;;  %v2656_v55 = vadd.f32 %v6835_v22, %v6077_v20 }
 0x6e9   : > { %v2771_v34 = vadd.f32 %v6095_v17, %v2770_v25  ;;  %v2651_v27 = vadd.f32 %v6077_v20, %v2650_v39 }
 0x6ea   : > { %6930 = vmatmul.mubr.msk.f32.vlgmr.msra.gmra.mrb[40].mxu1 %vm1225_vm1, %v2631_v19 }
 0x6eb   : > { %v6838_v28 = vpop.f32.mrb[30].mxu0  ;;  %v6879_v30 = vpop.f32.mrb[36].mxu1  ;;  %6933 = vmatpush3.xpose.msk.msra.mxu1 %vm1225_vm1, %v2766_v26  ;;  %6934 = vmatprep.mubr.msk.f32.mxu1 %vm8369_vm0, %v8368_v3 }
 0x6ec   : > { %v2660_v59 = vpop.f32.mrb[31].mxu0  ;;  %v2780_v33 = vpop.f32.mrb[37].mxu1  ;;  %6937 = vmatprep.subr.mxu1 %v8368_v3  ;;  %v2786_v43 = vadd.f32 %v6879_v30, %v6095_v17  ;;  %v2666_v60 = vadd.f32 %v6838_v28, %v6077_v20 }
 0x6ed   : > { %v2781_v2 = vadd.f32 %v6095_v17, %v2780_v33  ;;  %v2661_v51 = vadd.f32 %v6077_v20, %v2660_v59 }
 0x6ee   : > { %6935 = vmatmul.mubr.msk.f32.vlgmr.msra.gmra.mrb[42].mxu1 %vm1225_vm1, %v2636_v31 }
 0x6ef   : > { %v6882_v37 = vpop.f32.mrb[38].mxu1  ;;  %6938 = vmatpush3.xpose.msk.msra.mxu1 %vm1225_vm1, %v2771_v34  ;;  %6939 = vmatprep.mubr.msk.f32.mxu1 %vm8369_vm0, %v8368_v3 }
 0x6f0   : > { %v2790_v36 = vpop.f32.mrb[39].mxu1  ;;  %6942 = vmatprep.subr.mxu1 %v8368_v3  ;;  %v2796_v0 = vadd.f32 %v6882_v37, %v6095_v17 }
 0x6f1   : > { %v2791_v45 = vadd.f32 %v6095_v17, %v2790_v36 }
 0x6f2   : > { %6940 = vmatmul.mubr.msk.f32.vlgmr.msra.gmra.mrb[44].mxu1 %vm1225_vm1, %v2641_v38 }
 0x6f3   : > { %6943 = vmatpush3.xpose.msk.msra.mxu1 %vm1225_vm1, %v2776_v42  ;;  %6944 = vmatprep.mubr.msk.f32.mxu1 %vm8369_vm0, %v8368_v3 }
 0x6f4   : > { %6947 = vmatprep.subr.mxu1 %v8368_v3 }
 0x6f6   : > { %6945 = vmatmul.mubr.msk.f32.vlgmr.msra.gmra.mrb[46].mxu1 %vm1225_vm1, %v2646_v48 }
 0x6f7   : > { %6948 = vmatpush3.xpose.msk.msra.mxu1 %vm1225_vm1, %v2781_v2  ;;  %6949 = vmatprep.mubr.msk.f32.mxu1 %vm8369_vm0, %v8368_v3 }
 0x6f8   : > { %6952 = vmatprep.subr.mxu1 %v8368_v3 }
 0x6fa   : > { %6950 = vmatmul.mubr.msk.f32.vlgmr.msra.gmra.mrb[48].mxu1 %vm1225_vm1, %v2651_v27 }
 0x6fb   : > { %6953 = vmatpush3.xpose.msk.msra.mxu1 %vm1225_vm1, %v2786_v43  ;;  %6954 = vmatprep.mubr.msk.f32.mxu1 %vm8369_vm0, %v8368_v3 }
 0x6fc   : > { %6957 = vmatprep.subr.mxu1 %v8368_v3 }
 0x6fe   : > { %6955 = vmatmul.mubr.msk.f32.vlgmr.msra.gmra.mrb[50].mxu1 %vm1225_vm1, %v2656_v55 }
 0x6ff   : > { %6958 = vmatpush3.xpose.msk.msra.mxu1 %vm1225_vm1, %v2791_v45  ;;  %6959 = vmatprep.mubr.msk.f32.mxu1 %vm8369_vm0, %v8368_v3 }
 0x700   : > { %v6917_v53 = vpop.f32.mrb[32].mxu0  ;;  %6962 = vmatprep.subr.mxu1 %v8368_v3 }
 0x701   : > { %v2890_v29 = vpop.f32.mrb[33].mxu0  ;;  %v2896_v1 = vadd.f32 %v6917_v53, %v6113_v50 }
 0x702   : > { %v2891_v57 = vadd.f32 %v6113_v50, %v2890_v29  ;;  %6960 = vmatmul.mubr.msk.f32.vlgmr.msra.gmra.mrb[52].mxu1 %vm1225_vm1, %v2661_v51 }
 0x703   : > { %6963 = vmatpush3.xpose.msk.msra.mxu1 %vm1225_vm1, %v2796_v0  ;;  %6964 = vmatprep.mubr.msk.f32.mxu1 %vm8369_vm0, %v8368_v3 }
 0x704   : > { %v6920_v63 = vpop.f32.mrb[34].mxu0  ;;  %6968 = vmatpush3.msra.mxu0 %v2891_v57  ;;  %6972 = vmatprep.subr.mxu1 %v8368_v3 }
 0x705   : > { %v9435_v5 = vadd.f32 %v6920_v63, %v6113_v50  ;;  %v2900_v40 = vpop.f32.mrb[35].mxu0  ;;  %6977 = vmatprep.subr.mxu0 %v8368_v3 }
 0x706   : > { %v9438_v7 = vadd.f32 %v6113_v50, %v2900_v40  ;;  %6965 = vmatmul.mubr.msk.f32.vlgmr.msra.gmra.mrb[54].mxu1 %vm1225_vm1, %v2666_v60 }
 0x707   : > { %6973 = vmatpush3.msra.mxu1 %v2896_v1  ;;  %6974 = vmatprep.mubr.msk.f32.mxu1 %vm8369_vm0, %v8368_v3 }
 0x708   : > { %v6923_v9 = vpop.f32.mrb[36].mxu0  ;;  %6982 = vmatprep.subr.mxu1 %v8368_v3 }
 0x709   : > { %v9444_v23 = vadd.f32 %v6923_v9, %v6113_v50  ;;  %v2910_v47 = vpop.f32.mrb[37].mxu0 }
 0x70a   : > { %v9446_v44 = vadd.f32 %v6113_v50, %v2910_v47 }
 0x70c   : > { %v6926_v56 = vpop.f32.mrb[38].mxu0 }
 0x70d   : > { %v9448_v4 = vadd.f32 %v6926_v56, %v6113_v50  ;;  %v2920_v54 = vpop.f32.mrb[39].mxu0 }
 0x70e   : > { %v9450_v12 = vadd.f32 %v6113_v50, %v2920_v54 }
 0x7bd   : > { %v3001_v14 = vpop.f32.mrb[40].mxu1 }
 0x7be   : > { %v3002_v16 = vadd.f32 %v3001_v14, %v9221_v6  ;;  %v6931_v17 = vpop.f32.mrb[41].mxu1 }
 0x7c0   : > { %v3537_v52 = vsel %vm1834_vm3, %v3002_v16, -inf }
 0x7c1   : > { %3538 = vmax.xlane.f32.xlu0 %v3537_v52  ;;  %v3077_v41 = vpop.f32.mrb[42].mxu1 }
 0x7c2   : > { %v3078_v32 = vadd.f32 %v3077_v41, %v9221_v6  ;;  %v6936_v18 = vpop.f32.mrb[43].mxu1 }
 0x7c4   : > { %v3540_v20 = vsel %vm1834_vm3, %v3078_v32, -inf }
 0x7c5   : > { %3541 = vmax.xlane.f32.xlu1 %v3540_v20  ;;  %v3153_v21 = vpop.f32.mrb[44].mxu1 }
 0x7c6   : > { %v3154_v22 = vadd.f32 %v3153_v21, %v9221_v6  ;;  %v6941_v61 = vpop.f32.mrb[45].mxu1 }
 0x7c8   : > { %v3543_v19 = vsel %vm1834_vm3, %v3154_v22, -inf }
 0x7c9   : > { %3544 = vmax.xlane.f32.xlu0 %v3543_v19  ;;  %v3229_v39 = vpop.f32.mrb[46].mxu1 }
 0x7ca   : > { %v3230_v25 = vadd.f32 %v3229_v39, %v9221_v6  ;;  %v6946_v26 = vpop.f32.mrb[47].mxu1 }
 0x7cc   : > { %v3546_v28 = vsel %vm1834_vm3, %v3230_v25, -inf }
 0x7cd   : > { %3547 = vmax.xlane.f32.xlu1 %v3546_v28  ;;  %v3305_v30 = vpop.f32.mrb[48].mxu1 }
 0x7ce   : > { %v3306_v31 = vadd.f32 %v3305_v30, %v9221_v6  ;;  %v6951_v59 = vpop.f32.mrb[49].mxu1 }
 0x7d0   : > { %v3549_v33 = vsel %vm1834_vm3, %v3306_v31, -inf }
 0x7d1   : > { %3550 = vmax.xlane.f32.xlu0 %v3549_v33  ;;  %v3381_v34 = vpop.f32.mrb[50].mxu1 }
 0x7d2   : > { %v3382_v37 = vadd.f32 %v3381_v34, %v9221_v6  ;;  %v6956_v38 = vpop.f32.mrb[51].mxu1 }
 0x7d4   : > { %v3552_v36 = vsel %vm1834_vm3, %v3382_v37, -inf }
 0x7d5   : > { %3553 = vmax.xlane.f32.xlu1 %v3552_v36  ;;  %v3457_v42 = vpop.f32.mrb[52].mxu1 }
 0x7d6   : > { %v3458_v48 = vadd.f32 %v3457_v42, %v9221_v6  ;;  %v6961_v2 = vpop.f32.mrb[53].mxu1 }
 0x7d8   : > { %v3555_v27 = vsel %vm1834_vm3, %v3458_v48, -inf }
 0x7d9   : > { %3556 = vmax.xlane.f32.xlu0 %v3555_v27  ;;  %v3533_v43 = vpop.f32.mrb[54].mxu1 }
 0x7da   : > { %v3534_v55 = vadd.f32 %v3533_v43, %v9221_v6  ;;  %v6966_v45 = vpop.f32.mrb[55].mxu1 }
 0x7dc   : > { %v3558_v50 = vsel %vm1834_vm3, %v3534_v55, -inf }
 0x7dd   : > { %3559 = vmax.xlane.f32.xlu1 %v3558_v50 }
 0x84e   : > { %v3539_v51 = vpop.xlane.xlu0 %3538 }
 0x84f   : > { %v3561_v53 = vsub.f32 %v3002_v16, %v3539_v51 }
 0x851   : > { %v3569_v0 = vmul.f32 1.442695, %v3561_v53 }
 0x852   : > { %v3542_v29 = vpop.xlane.xlu1 %3541 }
 0x853   : > { %7707 = vpow2.f32 %v3569_v0  ;;  %v3562_v57 = vsub.f32 %v3078_v32, %v3542_v29 }
 0x855   : > { %v3571_v60 = vmul.f32 1.442695, %v3562_v57 }
 0x856   : > { %v3545_v63 = vpop.xlane.xlu0 %3544 }
 0x857   : > { %7709 = vpow2.f32 %v3571_v60  ;;  %v3563_v1 = vsub.f32 %v3154_v22, %v3545_v63 }
 0x859   : > { %v3573_v40 = vmul.f32 1.442695, %v3563_v1 }
 0x85a   : > { %v3548_v9 = vpop.xlane.xlu1 %3547 }
 0x85b   : > { %7711 = vpow2.f32 %v3573_v40  ;;  %v3564_v47 = vsub.f32 %v3230_v25, %v3548_v9 }
 0x85d   : > { %v7708_v56 = vpop.eup %7707  ;;  %v3575_v6 = vmul.f32 1.442695, %v3564_v47 }
 0x85e   : > { %v3551_v54 = vpop.xlane.xlu0 %3550  ;;  %v3585_v14 = vsel %vm1834_vm3, %v7708_v56, 0.0 }
 0x85f   : > { %7713 = vpow2.f32 %v3575_v6  ;;  %v3565_v17 = vsub.f32 %v3306_v31, %v3551_v54  ;;  %3586 = vadd.xlane.f32.xlu0 %v3585_v14 }
 0x861   : > { %v7710_v16 = vpop.eup %7709  ;;  %v3577_v52 = vmul.f32 1.442695, %v3565_v17 }
 0x862   : > { %v3554_v41 = vpop.xlane.xlu1 %3553  ;;  %v3588_v32 = vsel %vm1834_vm3, %v7710_v16, 0.0 }
 0x863   : > { %7715 = vpow2.f32 %v3577_v52  ;;  %v3566_v18 = vsub.f32 %v3382_v37, %v3554_v41  ;;  %3589 = vadd.xlane.f32.xlu1 %v3588_v32 }
 0x865   : > { %v9470_v20 = vpop.eup %7711  ;;  %v3579_v21 = vmul.f32 1.442695, %v3566_v18 }
 0x866   : > { %v3557_v22 = vpop.xlane.xlu0 %3556  ;;  %v3591_v61 = vsel %vm1834_vm3, %v9470_v20, 0.0 }
 0x867   : > { %7717 = vpow2.f32 %v3579_v21  ;;  %v3567_v19 = vsub.f32 %v3458_v48, %v3557_v22  ;;  %3592 = vadd.xlane.f32.xlu0 %v3591_v61  ;;  %v2531_v61 = vld [vmem:[%s8952_s9] sm:$0xff] }
 0x869   : > { %v9474_v39 = vpop.eup %7713  ;;  %v3581_v25 = vmul.f32 1.442695, %v3567_v19  ;;  %v2532_v19 = vld [vmem:[%s8952_s9 + $0x8] sm:$0xff] }
 0x86a   : > { %v3560_v26 = vpop.xlane.xlu1 %3559  ;;  %v3594_v28 = vsel %vm1834_vm3, %v9474_v39, 0.0 }
 0x86b   : > { %7719 = vpow2.f32 %v3581_v25  ;;  %v3568_v30 = vsub.f32 %v3534_v55, %v3560_v26  ;;  %3595 = vadd.xlane.f32.xlu1 %v3594_v28  ;;  %v7306_v28 = vpack.c.bf16 %v2532_v19, %v2531_v61 }
 0x86d   : > { %v9478_v31 = vpop.eup %7715  ;;  %v3583_v59 = vmul.f32 1.442695, %v3568_v30 }
 0x86e   : > { %v3597_v33 = vsel %vm1834_vm3, %v9478_v31, 0.0 }
 0x86f   : > { %7721 = vpow2.f32 %v3583_v59  ;;  %3598 = vadd.xlane.f32.xlu0 %v3597_v33  ;;  %v6138_v59 = vld [vmem:[%s8952_s9 + $0x40] sm:$0xff]  ;;  %v6139_v33 = vld [vmem:[%s8952_s9 + $0x48] sm:$0xff] }
 0x871   : > { %v9482_v34 = vpop.eup %7717 }
 0x872   : > { %v3600_v37 = vsel %vm1834_vm3, %v9482_v34, 0.0 }
 0x873   : > { %3601 = vadd.xlane.f32.xlu1 %v3600_v37 }
 0x875   : > { %v9486_v38 = vpop.eup %7719 }
 0x876   : > { %v3603_v36 = vsel %vm1834_vm3, %v9486_v38, 0.0 }
 0x877   : > { %3604 = vadd.xlane.f32.xlu0 %v3603_v36 }
 0x879   : > { %v9490_v42 = vpop.eup %7721 }
 0x87a   : > { %v3606_v48 = vsel %vm1834_vm3, %v9490_v42, 0.0 }
 0x87b   : > { %3607 = vadd.xlane.f32.xlu1 %v3606_v48  ;;  %v7290_v48 = vpack.c.bf16 %v6139_v33, %v6138_v59  ;;  %v9574_v59 = vld [vmem:[%s8958_s2] sm:$0x3f] }
 0x8ec   : > { %v3587_v2 = vpop.xlane.xlu0 %3586 }
 0x8ed   : > { %7723 = vrcp.f32 %v3587_v2 }
 0x8f0   : > { %v3590_v27 = vpop.xlane.xlu1 %3589 }
 0x8f1   : > { %7725 = vrcp.f32 %v3590_v27 }
 0x8f4   : > { %v3593_v43 = vpop.xlane.xlu0 %3592 }
 0x8f5   : > { %7727 = vrcp.f32 %v3593_v43 }
 0x8f7   : > { %v7724_v55 = vpop.eup %7723 }
 0x8f8   : > { %v3617_v45 = vmul.f32 %v7724_v55, %v3587_v2  ;;  %v3596_v50 = vpop.xlane.xlu1 %3595 }
 0x8f9   : > { %7729 = vrcp.f32 %v3596_v50 }
 0x8fa   : > { %v3625_v51 = vsub.f32 2.0, %v3617_v45 }
 0x8fb   : > { %v7726_v53 = vpop.eup %7725 }
 0x8fc   : > { %v3633_v0 = vmul.f32 %v7724_v55, %v3625_v51  ;;  %v3618_v29 = vmul.f32 %v7726_v53, %v3590_v27  ;;  %v3599_v57 = vpop.xlane.xlu0 %3598  ;;  %v2533_v27 = vld [vmem:[%s8952_s9 + $0x10] sm:$0xff]  ;;  %v2535_v51 = vld [vmem:[%s8952_s9 + $0x20] sm:$0xff] }
 0x8fd   : > { %7731 = vrcp.f32 %v3599_v57 }
 0x8fe   : > { %v3641_v60 = vmul.f32 %v7708_v56, %v3633_v0  ;;  %v3626_v63 = vsub.f32 2.0, %v3618_v29  ;;  %v6140_v0 = vld [vmem:[%s8952_s9 + $0x50] sm:$0xff]  ;;  %v6141_v29 = vld [vmem:[%s8952_s9 + $0x58] sm:$0xff] }
 0x8ff   : > { %v7728_v1 = vpop.eup %7727 }
 0x900   : > { %v3634_v40 = vmul.f32 %v7726_v53, %v3626_v63  ;;  %v3619_v9 = vmul.f32 %v7728_v1, %v3593_v43  ;;  %6970 = vmatmul.mubr.msk.f32.vlgmr.msra.gmra.mrb[40].mxu0 %vm1834_vm3, %v3641_v60  ;;  %v3602_v47 = vpop.xlane.xlu1 %3601  ;;  %v2534_v43 = vld [vmem:[%s8952_s9 + $0x18] sm:$0xff]  ;;  %v2536_v53 = vld [vmem:[%s8952_s9 + $0x28] sm:$0xff]  ;;  %v2537_v60 = vld [vmem:[%s8952_s9 + $0x30] sm:$0xff]  ;;  %v7294_v63 = vpack.c.bf16 %v6141_v29, %v6140_v0 }
 0x901   : > { %6978 = vmatpush3.msra.mxu0 %v9438_v7  ;;  %7733 = vrcp.f32 %v3602_v47  ;;  %6979 = vmatprep.mubr.msk.f32.mxu0 %vm8369_vm0, %v8368_v3 }
 0x902   : > { %v3642_v6 = vmul.f32 %v7710_v16, %v3634_v40  ;;  %v3627_v54 = vsub.f32 2.0, %v3619_v9  ;;  %6987 = vmatprep.subr.mxu0 %v8368_v3  ;;  %v6142_v40 = vld [vmem:[%s8952_s9 + $0x60] sm:$0xff]  ;;  %v6143_v9 = vld [vmem:[%s8952_s9 + $0x68] sm:$0xff] }
 0x903   : > { %v7730_v14 = vpop.eup %7729 }
 0x904   : > { %v3635_v17 = vmul.f32 %v7728_v1, %v3627_v54  ;;  %v3620_v56 = vmul.f32 %v7730_v14, %v3596_v50  ;;  %v3605_v52 = vpop.xlane.xlu0 %3604  ;;  %6975 = vmatmul.mubr.msk.f32.vlgmr.msra.gmra.mrb[56].mxu1 %vm1834_vm3, %v3642_v6  ;;  %v7310_v50 = vpack.c.bf16 %v2534_v43, %v2533_v27  ;;  %v2538_v1 = vld [vmem:[%s8952_s9 + $0x38] sm:$0xff]  ;;  %v7298_v6 = vpack.c.bf16 %v6143_v9, %v6142_v40 }
 0x905   : > { %7735 = vrcp.f32 %v3605_v52  ;;  %6983 = vmatpush3.msra.mxu1 %v9435_v5  ;;  %6984 = vmatprep.mubr.msk.f32.mxu1 %vm8369_vm0, %v8368_v3  ;;  %v7889_v40 = vld [vmem:[#allocation2 + $0x20] sm:$0xff] }
 0x906   : > { %v3643_v7 = vmul.f32 %v9470_v20, %v3635_v17  ;;  %v3628_v16 = vsub.f32 2.0, %v3620_v56  ;;  %6992 = vmatprep.subr.mxu1 %v8368_v3 }
 0x907   : > { %v7732_v41 = vpop.eup %7731 }
 0x908   : > { %v3636_v32 = vmul.f32 %v7730_v14, %v3628_v16  ;;  %v3621_v18 = vmul.f32 %v7732_v41, %v3599_v57  ;;  %6980 = vmatmul.mubr.msk.f32.vlgmr.msra.gmra.mrb[42].mxu0 %vm1834_vm3, %v3643_v7  ;;  %v3608_v21 = vpop.xlane.xlu1 %3607 }
 0x909   : > { %6988 = vmatpush3.msra.mxu0 %v9446_v44  ;;  %7737 = vrcp.f32 %v3608_v21  ;;  %6989 = vmatprep.mubr.msk.f32.mxu0 %vm8369_vm0, %v8368_v3 }
 0x90a   : > { %v3644_v5 = vmul.f32 %v9474_v39, %v3636_v32  ;;  %v3629_v20 = vsub.f32 2.0, %v3621_v18  ;;  %6997 = vmatprep.subr.mxu0 %v8368_v3 }
 0x90b   : > { %v7734_v22 = vpop.eup %7733 }
 0x90c   : > { %v3637_v25 = vmul.f32 %v7732_v41, %v3629_v20  ;;  %v3622_v26 = vmul.f32 %v7734_v22, %v3602_v47  ;;  %6985 = vmatmul.mubr.msk.f32.vlgmr.msra.gmra.mrb[58].mxu1 %vm1834_vm3, %v3644_v5  ;;  %v7318_v47 = vpack.c.bf16 %v2538_v1, %v2537_v60 }
 0x90d   : > { %6993 = vmatpush3.msra.mxu1 %v9444_v23  ;;  %6994 = vmatprep.mubr.msk.f32.mxu1 %vm8369_vm0, %v8368_v3 }
 0x90e   : > { %v3645_v44 = vmul.f32 %v9478_v31, %v3637_v25  ;;  %v3630_v39 = vsub.f32 2.0, %v3622_v26  ;;  %7002 = vmatprep.subr.mxu1 %v8368_v3 }
 0x90f   : > { %v7736_v30 = vpop.eup %7735 }
 0x910   : > { %v3638_v37 = vmul.f32 %v7734_v22, %v3630_v39  ;;  %v3623_v36 = vmul.f32 %v7736_v30, %v3605_v52  ;;  %6990 = vmatmul.mubr.msk.f32.vlgmr.msra.gmra.mrb[44].mxu0 %vm1834_vm3, %v3645_v44  ;;  %v4510_v44 = vsub.s32 2, %v9064_v49 }
 0x911   : > { %6998 = vmatpush3.msra.mxu0 %v9450_v12  ;;  %6999 = vmatprep.mubr.msk.f32.mxu0 %vm8369_vm0, %v8368_v3 }
 0x912   : > { %v3646_v23 = vmul.f32 %v9482_v34, %v3638_v37  ;;  %v3631_v31 = vsub.f32 2.0, %v3623_v36  ;;  %7307 = vmatprep.subr.bf16.mxu0 %v7306_v28  ;;  %v4511_v33 = vrot.slane %v9574_v59, %v4510_v44  ;;  %v7884_v36 = vld [vmem:[#allocation2 + $0x8] sm:$0xff] }
 0x913   : > { %v7738_v2 = vpop.eup %7737 }
 0x914   : > { %v3639_v55 = vmul.f32 %v7736_v30, %v3631_v31  ;;  %v3624_v45 = vmul.f32 %v7738_v2, %v3608_v21  ;;  %6995 = vmatmul.mubr.msk.f32.vlgmr.msra.gmra.mrb[60].mxu1 %vm1834_vm3, %v3646_v23  ;;  %v7885_v31 = vld [vmem:[#allocation2] sm:$0xff] }
 0x915   : > { %7003 = vmatpush3.msra.mxu1 %v9448_v4  ;;  %7004 = vmatprep.mubr.msk.f32.mxu1 %vm8369_vm0, %v8368_v3 }
 0x916   : > { %v3647_v12 = vmul.f32 %v9486_v38, %v3639_v55  ;;  %v3632_v34 = vsub.f32 2.0, %v3624_v45  ;;  %7291 = vmatprep.subr.bf16.mxu1 %v7290_v48  ;;  %v7314_v38 = vpack.c.bf16 %v2536_v53, %v2535_v51  ;;  %v7887_v51 = vld [vmem:[#allocation2 + $0x10] sm:$0xff] }
 0x918   : > { %v3640_v57 = vmul.f32 %v7738_v2, %v3632_v34  ;;  %7000 = vmatmul.mubr.msk.f32.vlgmr.msra.gmra.mrb[46].mxu0 %vm1834_vm3, %v3647_v12  ;;  %v7886_v34 = vld [vmem:[#allocation2 + $0x18] sm:$0xff] }
 0x919   : > { %7309 = vmatpush3.bf16.msra.mxu0 %v7306_v28  ;;  %7051 = vmatprep.mubr.msk.f32.mxu0 %vm1225_vm1, %v9379_v15  ;;  %v6144_v15 = vld [vmem:[%s8952_s9 + $0x70] sm:$0xff] }
 0x91a   : > { %v3648_v4 = vmul.f32 %v9490_v42, %v3640_v57  ;;  %7311 = vmatprep.subr.bf16.mxu0 %v7310_v50 }
 0x91c   : > { %7005 = vmatmul.mubr.msk.f32.vlgmr.msra.gmra.mrb[62].mxu1 %vm1834_vm3, %v3648_v4 }
 0x91d   : > { %7313 = vmatpush3.bf16.msra.mxu0 %v7310_v50  ;;  %7293 = vmatpush3.bf16.msra.mxu1 %v7290_v48 }
 0x91e   : > { %7315 = vmatprep.subr.bf16.mxu0 %v7314_v38  ;;  %7295 = vmatprep.subr.bf16.mxu1 %v7294_v63 }
 0x921   : > { %7317 = vmatpush3.bf16.msra.mxu0 %v7314_v38  ;;  %7297 = vmatpush3.bf16.msra.mxu1 %v7294_v63  ;;  %v7888_v63 = vld [vmem:[#allocation2 + $0x28] sm:$0xff] }
 0x922   : > { %7319 = vmatprep.subr.bf16.mxu0 %v7318_v47  ;;  %7299 = vmatprep.subr.bf16.mxu1 %v7298_v6 }
 0x925   : > { %7321 = vmatpush3.bf16.msra.mxu0 %v7318_v47  ;;  %7301 = vmatpush3.bf16.msra.mxu1 %v7298_v6 }
 0x928   : > { %7052 = vmatmul.mubr.msk.f32.vlgmr.msra.gmra.mrb[48].mxu0 %vm1225_vm1, %v9381_v10  ;;  %v6145_v10 = vld [vmem:[%s8952_s9 + $0x78] sm:$0xff]  ;;  %s5518_s9 = sld [smem:[#allocation4 + %s5517_s28]] (!%p6194_p0) }
 0x929   : > { %7054 = vmatprep.mubr.msk.f32.mxu0 %vm1225_vm1, %v9383_v24  ;;  %v7302_v24 = vpack.c.bf16 %v6145_v10, %v6144_v15 }
 0x92b   : > { %7303 = vmatprep.subr.bf16.mxu1 %v7302_v24 }
 0x92c   : > { %7055 = vmatmul.mubr.msk.f32.gmra.mrb[50].mxu0 %vm1225_vm1, %v9385_v35  ;;  %7305 = vmatpush3.bf16.msra.mxu1 %v7302_v24 }
 0x92d   : > { %7057 = vmatprep.mubr.msk.f32.mxu0 %vm1225_vm1, %v9387_v46 }
 0x92e   : > { %s5831_s4 = scalar_lea.vmem (!%p6194_p0), [#allocation2], %s5518_s9 }
 0x930   : > { %7058 = vmatmul.mubr.msk.f32.gmra.mrb[52].mxu0 %vm1225_vm1, %v9389_v11 }
 0x931   : > { %7060 = vmatprep.mubr.msk.f32.mxu0 %vm1225_vm1, %v9391_v13 }
 0x934   : > { %7061 = vmatmul.mubr.msk.f32.gmra.mrb[54].mxu0 %vm1225_vm1, %v9393_v8 }
 0x935   : > { %4895 = vmatprep.mubr.f32.mxu0 %v8368_v3 }
 0x9d3   : > { %v3718_v35 = vpop.f32.mrb[40].mxu0 }
 0x9d4   : > { %v6971_v42 = vpop.f32.mrb[41].mxu0  ;;  %7023 = vmatprep.mubr.msk.f32.mxu1 %vm1225_vm1, %v3718_v35 }
 0x9d5   : > { %v7890_v42 = vld [vmem:[#allocation2 + $0x38] sm:$0xff] }
 0x9d7   : > { %v3791_v46 = vpop.f32.mrb[56].mxu1 }
 0x9d8   : > { %v6976_v54 = vpop.f32.mrb[57].mxu1  ;;  %7024 = vmatmul.mubr.msk.f32.vlgmr.msra.gmra.mrb[64].mxu1 %vm1225_vm1, %v3791_v46 }
 0x9d9   : > { %v7891_v54 = vld [vmem:[#allocation2 + $0x30] sm:$0xff] }
 0x9db   : > { %v3864_v11 = vpop.f32.mrb[42].mxu0 }
 0x9dc   : > { %v6981_v13 = vpop.f32.mrb[43].mxu0  ;;  %7026 = vmatprep.mubr.msk.f32.mxu1 %vm1225_vm1, %v3864_v11 }
 0x9df   : > { %v3937_v8 = vpop.f32.mrb[58].mxu1 }
 0x9e0   : > { %v6986_v14 = vpop.f32.mrb[59].mxu1  ;;  %7027 = vmatmul.mubr.msk.f32.gmra.mrb[66].mxu1 %vm1225_vm1, %v3937_v8 }
 0x9e1   : > { %v4633_v14 = vld [vmem:[%s8960_s10 + $0x8] sm:$0xff] }
 0x9e3   : > { %v4010_v17 = vpop.f32.mrb[44].mxu0 }
 0x9e4   : > { %v6991_v56 = vpop.f32.mrb[45].mxu0  ;;  %7029 = vmatprep.mubr.msk.f32.mxu1 %vm1225_vm1, %v4010_v17  ;;  %v4637_v17 = vld [vmem:[%s8960_s10 + $0x28] sm:$0xff] }
 0x9e5   : > { %v4635_v56 = vld [vmem:[%s8960_s10 + $0x18] sm:$0xff] }
 0x9e7   : > { %v4083_v52 = vpop.f32.mrb[60].mxu1 }
 0x9e8   : > { %v6996_v7 = vpop.f32.mrb[61].mxu1  ;;  %7030 = vmatmul.mubr.msk.f32.gmra.mrb[68].mxu1 %vm1225_vm1, %v4083_v52  ;;  %v7322_v52 = vpack.c.bf16 %v4637_v17, %v4633_v14 }
 0x9e9   : > { %v4639_v7 = vld [vmem:[%s8960_s10 + $0x38] sm:$0xff] }
 0x9ea   : > { %7323 = vmatprep.subr.bf16.mxu1 %v7322_v52 }
 0x9eb   : > { %v4156_v16 = vpop.f32.mrb[46].mxu0 }
 0x9ec   : > { %v7001_v41 = vpop.f32.mrb[47].mxu0  ;;  %7032 = vmatprep.mubr.msk.f32.mxu1 %vm1225_vm1, %v4156_v16  ;;  %v4632_v16 = vld [vmem:[%s8960_s10] sm:$0xff] }
 0x9ed   : > { %v4636_v41 = vld [vmem:[%s8960_s10 + $0x20] sm:$0xff] }
 0x9ef   : > { %v4229_v32 = vpop.f32.mrb[62].mxu1 }
 0x9f0   : > { %v7006_v18 = vpop.f32.mrb[63].mxu1  ;;  %7033 = vmatmul.mubr.msk.f32.gmra.mrb[70].mxu1 %vm1225_vm1, %v4229_v32  ;;  %v7354_v32 = vpack.c.bf16 %v4639_v7, %v4635_v56 }
 0x9f1   : > { %4782 = vmatprep.mubr.f32.mxu1 %v8368_v3  ;;  %v7324_v18 = vpack.c.bf16 %v4636_v41, %v4632_v16 }
 0x9f2   : > { %7355 = vmatprep.subr.bf16.mxu0 %v7354_v32 }
 0x9f3   : > { %7325 = vmatpush1.bf16.msra.mxu1 %v7324_v18 }
 0x9fb   : > { %v7053_v21 = vpop.f32.mrb[48].mxu0 }
 0x9fc   : > { %v4461_v5 = vpop.f32.mrb[49].mxu0 }
 0x9ff   : > { %v7056_v20 = vpop.f32.mrb[50].mxu0 }
 0xa00   : > { %v4471_v22 = vpop.f32.mrb[51].mxu0 }
 0xa03   : > { %v7059_v61 = vpop.f32.mrb[52].mxu0 }
 0xa04   : > { %v4481_v19 = vpop.f32.mrb[53].mxu0 }
 0xa07   : > { %v7062_v25 = vpop.f32.mrb[54].mxu0 }
 0xa08   : > { %v4491_v26 = vpop.f32.mrb[55].mxu0 }
 0xaab   : > { %v7025_v39 = vpop.f32.mrb[64].mxu1 }
 0xaac   : > { %v4467_v28 = vadd.f32 %v7053_v21, %v7025_v39  ;;  %v4332_v30 = vpop.f32.mrb[65].mxu1  ;;  %v4634_v21 = vld [vmem:[%s8960_s10 + $0x10] sm:$0xff] }
 0xaad   : > { %v4462_v37 = vadd.f32 %v4461_v5, %v4332_v30  ;;  %v4638_v5 = vld [vmem:[%s8960_s10 + $0x30] sm:$0xff]  ;;  %v4644_v30 = vld [vmem:[%s8960_s10 + $0x60] sm:$0xff] }
 0xaae   : > { %v4501_v23 = vadd.f32 %v7884_v36, %v4467_v28  ;;  %v4640_v28 = vld [vmem:[%s8960_s10 + $0x40] sm:$0xff]  ;;  %v4646_v36 = vld [vmem:[%s8960_s10 + $0x70] sm:$0xff] }
 0xaaf   : > { %v4500_v48 = vadd.f32 %v7885_v31, %v4462_v37  ;;  %v7328_v37 = vpack.c.bf16 %v4644_v30, %v4640_v28  ;;  %v4653_v31 = vld [vmem:[%s8960_s10 + $0xa8] sm:$0xff]  ;;  %v4658_v30 = vld [vmem:[%s8960_s10 + $0xd0] sm:$0xff] }
 0xab0   : > { %v9579_v2 = vadd.f32 %v4511_v33, %v4501_v23  ;;  %v4649_v23 = vld [vmem:[%s8960_s10 + $0x88] sm:$0xff] }
 0xab1   : > { %v9581_v27 = vadd.f32 %v4511_v33, %v4500_v48 }
 0xab2   : > { %4522 = vadd.xlane.f32.xlu1 %v9579_v2 }
 0xab3   : > { %4520 = vadd.xlane.f32.xlu0 %v9581_v27  ;;  %v7028_v43 = vpop.f32.mrb[66].mxu1 }
 0xab4   : > { %v4477_v55 = vadd.f32 %v7056_v20, %v7028_v43  ;;  %v4342_v45 = vpop.f32.mrb[67].mxu1  ;;  %v4641_v20 = vld [vmem:[%s8960_s10 + $0x48] sm:$0xff]  ;;  %v7330_v43 = vpack.c.bf16 %v4653_v31, %v4649_v23 }
 0xab5   : > { %v4472_v12 = vadd.f32 %v4471_v22, %v4342_v45  ;;  %v7356_v22 = vpack.c.bf16 %v4638_v5, %v4634_v21  ;;  %v4655_v45 = vld [vmem:[%s8960_s10 + $0xb8] sm:$0xff]  ;;  %v4657_v21 = vld [vmem:[%s8960_s10 + $0xc8] sm:$0xff] }
 0xab6   : > { %v4503_v50 = vadd.f32 %v7886_v34, %v4477_v55  ;;  %v4651_v55 = vld [vmem:[%s8960_s10 + $0x98] sm:$0xff]  ;;  %v4661_v5 = vld [vmem:[%s8960_s10 + $0xe8] sm:$0xff] }
 0xab7   : > { %v4502_v53 = vadd.f32 %v7887_v51, %v4472_v12  ;;  %7357 = vmatpush1.bf16.msra.mxu0 %v7356_v22  ;;  %v4648_v12 = vld [vmem:[%s8960_s10 + $0x80] sm:$0xff]  ;;  %v7362_v34 = vpack.c.bf16 %v4655_v45, %v4651_v55  ;;  %v4650_v51 = vld [vmem:[%s8960_s10 + $0x90] sm:$0xff]  ;;  %v4667_v55 = vld [vmem:[%s8960_s10 + $0x118] sm:$0xff] }
 0xab8   : > { %v9585_v0 = vadd.f32 %v4511_v33, %v4503_v50  ;;  %v4652_v50 = vld [vmem:[%s8960_s10 + $0xa0] sm:$0xff] }
 0xab9   : > { %v9587_v29 = vadd.f32 %v4511_v33, %v4502_v53  ;;  %v4654_v53 = vld [vmem:[%s8960_s10 + $0xb0] sm:$0xff] }
 0xaba   : > { %4526 = vadd.xlane.f32.xlu1 %v9585_v0 }
 0xabb   : > { %4524 = vadd.xlane.f32.xlu0 %v9587_v29  ;;  %v7031_v57 = vpop.f32.mrb[68].mxu1 }
 0xabc   : > { %v4487_v4 = vadd.f32 %v7059_v61, %v7031_v57  ;;  %v4352_v38 = vpop.f32.mrb[69].mxu1  ;;  %v4645_v61 = vld [vmem:[%s8960_s10 + $0x68] sm:$0xff]  ;;  %v7332_v57 = vpack.c.bf16 %v4652_v50, %v4648_v12  ;;  %v4664_v50 = vld [vmem:[%s8960_s10 + $0x100] sm:$0xff] }
 0xabd   : > { %v4482_v60 = vadd.f32 %v4481_v19, %v4352_v38  ;;  %v4643_v19 = vld [vmem:[%s8960_s10 + $0x58] sm:$0xff] }
 0xabe   : > { %v4505_v1 = vadd.f32 %v7888_v63, %v4487_v4  ;;  %v7364_v4 = vpack.c.bf16 %v4654_v53, %v4650_v51  ;;  %v4668_v51 = vld [vmem:[%s8960_s10 + $0x120] sm:$0xff] }
 0xabf   : > { %v4504_v9 = vadd.f32 %v7889_v40, %v4482_v60 }
 0xac0   : > { %v9591_v47 = vadd.f32 %v4511_v33, %v4505_v1 }
 0xac1   : > { %v9593_v6 = vadd.f32 %v4511_v33, %v4504_v9 }
 0xac2   : > { %10243 = vst [vmem:[#allocation49_spill] sm:$0xff] %v9591_v47  ;;  %4530 = vadd.xlane.f32.xlu1 %v9591_v47 }
 0xac3   : > { %10244 = vst [vmem:[#allocation50_spill] sm:$0xff] %v9593_v6  ;;  %4528 = vadd.xlane.f32.xlu0 %v9593_v6  ;;  %v7034_v15 = vpop.f32.mrb[70].mxu1 }
 0xac4   : > { %v4497_v10 = vadd.f32 %v7062_v25, %v7034_v15  ;;  %v4362_v24 = vpop.f32.mrb[71].mxu1  ;;  %v4647_v25 = vld [vmem:[%s8960_s10 + $0x78] sm:$0xff] }
 0xac5   : > { %v4492_v35 = vadd.f32 %v4491_v26, %v4362_v24  ;;  %v7326_v26 = vpack.c.bf16 %v4645_v61, %v4641_v20  ;;  %v7358_v39 = vpack.c.bf16 %v4647_v25, %v4643_v19  ;;  %v4659_v20 = vld [vmem:[%s8960_s10 + $0xd8] sm:$0xff]  ;;  %v7334_v61 = vpack.c.bf16 %v4661_v5, %v4657_v21  ;;  %v4656_v25 = vld [vmem:[%s8960_s10 + $0xc0] sm:$0xff]  ;;  %v4681_v5 = vld [vmem:[%s8960_s10 + $0x188] sm:$0xff] }
 0xac6   : > { %v4507_v46 = vadd.f32 %v7890_v42, %v4497_v10  ;;  %v4663_v19 = vld [vmem:[%s8960_s10 + $0xf8] sm:$0xff] }
 0xac7   : > { %v4506_v11 = vadd.f32 %v7891_v54, %v4492_v35  ;;  %7327 = vmatprep.subr.bf16.mxu1 %v7326_v26  ;;  %7359 = vmatprep.subr.bf16.mxu0 %v7358_v39  ;;  %v4660_v26 = vld [vmem:[%s8960_s10 + $0xe0] sm:$0xff]  ;;  %v7366_v39 = vpack.c.bf16 %v4663_v19, %v4659_v20  ;;  %v4685_v20 = vld [vmem:[%s8960_s10 + $0x1a8] sm:$0xff]  ;;  %v4687_v19 = vld [vmem:[%s8960_s10 + $0x1b8] sm:$0xff] }
 0xac8   : > { %v9597_v13 = vadd.f32 %v4511_v33, %v4507_v46  ;;  %7329 = vmatpush1.bf16.msra.mxu1 %v7328_v37  ;;  %v7336_v28 = vpack.c.bf16 %v4660_v26, %v4656_v25  ;;  %v4680_v25 = vld [vmem:[%s8960_s10 + $0x180] sm:$0xff] }
 0xac9   : > { %v9599_v8 = vadd.f32 %v4511_v33, %v4506_v11  ;;  %v4642_v33 = vld [vmem:[%s8960_s10 + $0x50] sm:$0xff]  ;;  %7331 = vmatprep.subr.bf16.mxu1 %v7330_v43  ;;  %v4669_v43 = vld [vmem:[%s8960_s10 + $0x128] sm:$0xff]  ;;  %v4684_v26 = vld [vmem:[%s8960_s10 + $0x1a0] sm:$0xff] }
 0xaca   : > { %10245 = vst [vmem:[#allocation51_spill] sm:$0xff] %v9597_v13  ;;  %4534 = vadd.xlane.f32.xlu1 %v9597_v13  ;;  %v7360_v48 = vpack.c.bf16 %v4646_v36, %v4642_v33  ;;  %v4662_v33 = vld [vmem:[%s8960_s10 + $0xf0] sm:$0xff] }
 0xacb   : > { %10246 = vst [vmem:[#allocation52_spill] sm:$0xff] %v9599_v8  ;;  %4532 = vadd.xlane.f32.xlu0 %v9599_v8  ;;  %v7368_v36 = vpack.c.bf16 %v4662_v33, %v4658_v30  ;;  %v4682_v30 = vld [vmem:[%s8960_s10 + $0x190] sm:$0xff] }
 0xacc   : > { %7361 = vmatpush1.bf16.msra.mxu0 %v7360_v48  ;;  %7333 = vmatpush1.bf16.msra.mxu1 %v7332_v57  ;;  %v4665_v48 = vld [vmem:[%s8960_s10 + $0x108] sm:$0xff]  ;;  %v4686_v33 = vld [vmem:[%s8960_s10 + $0x1b0] sm:$0xff] }
 0xacd   : > { %7363 = vmatprep.subr.bf16.mxu0 %v7362_v34  ;;  %7335 = vmatprep.subr.bf16.mxu1 %v7334_v61  ;;  %v7338_v12 = vpack.c.bf16 %v4669_v43, %v4665_v48  ;;  %v4671_v34 = vld [vmem:[%s8960_s10 + $0x138] sm:$0xff]  ;;  %v7346_v61 = vpack.c.bf16 %v4685_v20, %v4681_v5 }
 0xace   : > { %v7370_v57 = vpack.c.bf16 %v4671_v34, %v4667_v55  ;;  %v4695_v43 = vld [vmem:[%s8960_s10 + $0x1f8] sm:$0xff]  ;;  %v4688_v55 = vld [vmem:[%s8960_s10 + $0x1c0] sm:$0xff] }
 0xad0   : > { %7365 = vmatpush1.bf16.msra.mxu0 %v7364_v4  ;;  %7337 = vmatpush1.bf16.msra.mxu1 %v7336_v28  ;;  %v7340_v4 = vpack.c.bf16 %v4668_v51, %v4664_v50  ;;  %v7348_v28 = vpack.c.bf16 %v4684_v26, %v4680_v25  ;;  %v4690_v50 = vld [vmem:[%s8960_s10 + $0x1d0] sm:$0xff] }
 0xad1   : > { %7367 = vmatprep.subr.bf16.mxu0 %v7366_v39  ;;  %7339 = vmatprep.subr.bf16.mxu1 %v7338_v12  ;;  %v4694_v51 = vld [vmem:[%s8960_s10 + $0x1f0] sm:$0xff] }
 0xad4   : > { %7369 = vmatpush1.bf16.msra.mxu0 %v7368_v36  ;;  %7341 = vmatpush1.bf16.msra.mxu1 %v7340_v4  ;;  %v4689_v36 = vld [vmem:[%s8960_s10 + $0x1c8] sm:$0xff] }
 0xad5   : > { %7371 = vmatprep.subr.bf16.mxu0 %v7370_v57  ;;  %v7384_v57 = vpack.c.bf16 %v4694_v51, %v4690_v50 }
 0xb3f   : > { %v4523_v38 = vpop.xlane.xlu1 %4522 }
 0xb40   : > { %v4537_v60 = vmul.f32 0.0078125, %v4523_v38  ;;  %v4521_v63 = vpop.xlane.xlu0 %4520  ;;  %v4666_v38 = vld [vmem:[%s8960_s10 + $0x110] sm:$0xff] }
 0xb41   : > { %v4536_v1 = vmul.f32 0.0078125, %v4521_v63 }
 0xb42   : > { %v9628_v40 = vsub.f32 %v9579_v2, %v4537_v60  ;;  %v4670_v60 = vld [vmem:[%s8960_s10 + $0x130] sm:$0xff] }
 0xb43   : > { %v9631_v9 = vsub.f32 %v9581_v27, %v4536_v1  ;;  %v7372_v1 = vpack.c.bf16 %v4670_v60, %v4666_v38 }
 0xb44   : > { %v4553_v15 = vmul.f32 %v9628_v40, %v9628_v40 }
 0xb45   : > { %v4552_v10 = vmul.f32 %v9631_v9, %v9631_v9  ;;  %7373 = vmatpush1.bf16.msra.mxu0 %v7372_v1 }
 0xb46   : > { %4562 = vadd.xlane.f32.xlu1 %v4553_v15 }
 0xb47   : > { %v4527_v24 = vpop.xlane.xlu1 %4526  ;;  %4560 = vadd.xlane.f32.xlu0 %v4552_v10  ;;  %v4673_v10 = vld [vmem:[%s8960_s10 + $0x148] sm:$0xff] }
 0xb48   : > { %v4539_v35 = vmul.f32 0.0078125, %v4527_v24  ;;  %v4525_v42 = vpop.xlane.xlu0 %4524  ;;  %v4677_v24 = vld [vmem:[%s8960_s10 + $0x168] sm:$0xff] }
 0xb49   : > { %v4538_v46 = vmul.f32 0.0078125, %v4525_v42 }
 0xb4a   : > { %v9638_v54 = vsub.f32 %v9585_v0, %v4539_v35  ;;  %v4675_v35 = vld [vmem:[%s8960_s10 + $0x158] sm:$0xff] }
 0xb4b   : > { %v9641_v11 = vsub.f32 %v9587_v29, %v4538_v46  ;;  %v7342_v46 = vpack.c.bf16 %v4677_v24, %v4673_v10 }
 0xb4c   : > { %v4555_v14 = vmul.f32 %v9638_v54, %v9638_v54 }
 0xb4d   : > { %v4554_v17 = vmul.f32 %v9641_v11, %v9641_v11  ;;  %7343 = vmatprep.subr.bf16.mxu1 %v7342_v46 }
 0xb4e   : > { %4566 = vadd.xlane.f32.xlu1 %v4555_v14  ;;  %v4679_v14 = vld [vmem:[%s8960_s10 + $0x178] sm:$0xff] }
 0xb4f   : > { %v4531_v56 = vpop.xlane.xlu1 %4530  ;;  %4564 = vadd.xlane.f32.xlu0 %v4554_v17  ;;  %v4672_v17 = vld [vmem:[%s8960_s10 + $0x140] sm:$0xff] }
 0xb50   : > { %v4541_v52 = vmul.f32 0.0078125, %v4531_v56  ;;  %v4529_v7 = vpop.xlane.xlu0 %4528  ;;  %v4676_v56 = vld [vmem:[%s8960_s10 + $0x160] sm:$0xff] }
 0xb51   : > { %v4540_v16 = vmul.f32 0.0078125, %v4529_v7  ;;  %v7344_v7 = vpack.c.bf16 %v4676_v56, %v4672_v17  ;;  %v4610_v17 = vsub.s32 3, %v9064_v49 }
 0xb52   : > { %v9648_v41 = vsub.f32 %v9591_v47, %v4541_v52  ;;  %v7374_v52 = vpack.c.bf16 %v4679_v14, %v4675_v35 }
 0xb53   : > { %v9651_v32 = vsub.f32 %v9593_v6, %v4540_v16  ;;  %v4674_v16 = vld [vmem:[%s8960_s10 + $0x150] sm:$0xff]  ;;  %7345 = vmatpush1.bf16.msra.mxu1 %v7344_v7 }
 0xb54   : > { %v4557_v18 = vmul.f32 %v9648_v41, %v9648_v41  ;;  %7375 = vmatprep.subr.bf16.mxu0 %v7374_v52  ;;  %7347 = vmatprep.subr.bf16.mxu1 %v7346_v61  ;;  %v4622_v52 = vsub.s32 4, %v9064_v49 }
 0xb55   : > { %v4556_v22 = vmul.f32 %v9651_v32, %v9651_v32 }
 0xb56   : > { %4570 = vadd.xlane.f32.xlu1 %v4557_v18  ;;  %v4678_v18 = vld [vmem:[%s8960_s10 + $0x170] sm:$0xff]  ;;  %v9716_v61 = vrot.slane %v9574_v59, %v4622_v52 }
 0xb57   : > { %v4535_v37 = vpop.xlane.xlu1 %4534  ;;  %4568 = vadd.xlane.f32.xlu0 %v4556_v22  ;;  %v7376_v21 = vpack.c.bf16 %v4678_v18, %v4674_v16  ;;  %v4683_v22 = vld [vmem:[%s8960_s10 + $0x198] sm:$0xff]  ;;  %7349 = vmatpush1.bf16.msra.mxu1 %v7348_v28  ;;  %v9712_v16 = vrot.slane %v9574_v59, %v4610_v17 }
 0xb58   : > { %v4543_v23 = vmul.f32 0.0078125, %v4535_v37  ;;  %v4533_v31 = vpop.xlane.xlu0 %4532  ;;  %v7378_v39 = vpack.c.bf16 %v4687_v19, %v4683_v22  ;;  %v7380_v37 = vpack.c.bf16 %v4686_v33, %v4682_v30 }
 0xb59   : > { %v4542_v45 = vmul.f32 0.0078125, %v4533_v31  ;;  %7377 = vmatpush1.bf16.msra.mxu0 %v7376_v21  ;;  %v4691_v31 = vld [vmem:[%s8960_s10 + $0x1d8] sm:$0xff] }
 0xb5a   : > { %v9672_v53 = vsub.f32 %v9597_v13, %v4543_v23  ;;  %7379 = vmatprep.subr.bf16.mxu0 %v7378_v39  ;;  %v4693_v23 = vld [vmem:[%s8960_s10 + $0x1e8] sm:$0xff]  ;;  %v7382_v12 = vpack.c.bf16 %v4695_v43, %v4691_v31 }
 0xb5b   : > { %v9677_v63 = vsub.f32 %v9599_v8, %v4542_v45  ;;  %v7350_v48 = vpack.c.bf16 %v4693_v23, %v4689_v36  ;;  %v4692_v45 = vld [vmem:[%s8960_s10 + $0x1e0] sm:$0xff]  ;;  %s5532_s10 = sadd.s32 (!%p6194_p0), 7, %s6195_s5 }
 0xb5c   : > { %v4559_v15 = vmul.f32 %v9672_v53, %v9672_v53  ;;  %v7352_v34 = vpack.c.bf16 %v4692_v45, %v4688_v55  ;;  %s5533_s1 = sld [smem:[#allocation4 + %s5532_s10]] (!%p6194_p0) }
 0xb5d   : > { %v4558_v42 = vmul.f32 %v9677_v63, %v9677_v63  ;;  %7381 = vmatpush1.bf16.msra.mxu0 %v7380_v37  ;;  %7351 = vmatprep.subr.bf16.mxu1 %v7350_v48 }
 0xb5e   : > { %4574 = vadd.xlane.f32.xlu1 %v4559_v15  ;;  %7383 = vmatprep.subr.bf16.mxu0 %v7382_v12 }
 0xb5f   : > { %4572 = vadd.xlane.f32.xlu0 %v4558_v42  ;;  %7353 = vmatpush1.bf16.msra.mxu1 %v7352_v34 }
 0xb61   : > { %7385 = vmatpush1.bf16.msra.mxu0 %v7384_v57 }
 0xbd3   : > { %v4563_v4 = vpop.xlane.xlu1 %4562 }
 0xbd4   : > { %v4577_v38 = vmul.f32 0.0078125, %v4563_v4  ;;  %v4561_v60 = vpop.xlane.xlu0 %4560 }
 0xbd5   : > { %v4576_v1 = vmul.f32 0.0078125, %v4561_v60 }
 0xbd6   : > { %v4585_v15 = vadd.f32 1e-05, %v4577_v38 }
 0xbd7   : > { %v4584_v10 = vadd.f32 1e-05, %v4576_v1 }
 0xbd8   : > { %7739 = vrsqrt.f32 %v4585_v15 }
 0xbd9   : > { %7741 = vrsqrt.f32 %v4584_v10 }
 0xbdb   : > { %v4567_v24 = vpop.xlane.xlu1 %4566 }
 0xbdc   : > { %v4579_v35 = vmul.f32 0.0078125, %v4567_v24  ;;  %v4565_v42 = vpop.xlane.xlu0 %4564 }
 0xbdd   : > { %v4578_v46 = vmul.f32 0.0078125, %v4565_v42 }
 0xbde   : > { %v4587_v14 = vadd.f32 1e-05, %v4579_v35 }
 0xbdf   : > { %v4586_v56 = vadd.f32 1e-05, %v4578_v46  ;;  %v5216_v46 = vld [vmem:[%s8968_s14 + $0x80] sm:$0xff] }
 0xbe0   : > { %7743 = vrsqrt.f32 %v4587_v14  ;;  %v5217_v14 = vld [vmem:[%s8968_s14 + $0x88] sm:$0xff] }
 0xbe1   : > { %7745 = vrsqrt.f32 %v4586_v56  ;;  %v5248_v56 = vld [vmem:[%s8968_s14 + $0x180] sm:$0xff]  ;;  %v7386_v52 = vpack.c.bf16 %v5217_v14, %v5216_v46  ;;  %v5257_v14 = vld [vmem:[%s8968_s14 + $0x1c8] sm:$0xff] }
 0xbe2   : > { %v7740_v7 = vpop.eup %7739 }
 0xbe3   : > { %v7742_v18 = vpop.eup %7741  ;;  %v4571_v21 = vpop.xlane.xlu1 %4570  ;;  %v4601_v19 = vmul.f32 %v7740_v7, %v9628_v40  ;;  %v5249_v7 = vld [vmem:[%s8968_s14 + $0x188] sm:$0xff]  ;;  %7387 = vmatprep.subr.bf16.mxu1 %v7386_v52 }
 0xbe4   : > { %v4600_v5 = vmul.f32 %v7742_v18, %v9631_v9  ;;  %v4581_v20 = vmul.f32 0.0078125, %v4571_v21  ;;  %v4569_v22 = vpop.xlane.xlu0 %4568  ;;  %v5201_v18 = vld [vmem:[%s8968_s14 + $0x8] sm:$0xff]  ;;  %v7418_v21 = vpack.c.bf16 %v5249_v7, %v5248_v56  ;;  %v5208_v56 = vld [vmem:[%s8968_s14 + $0x40] sm:$0xff] }
 0xbe5   : > { %v4580_v25 = vmul.f32 0.0078125, %v4569_v22  ;;  %v4613_v33 = vmul.f32 %v9712_v16, %v4601_v19  ;;  %v5219_v19 = vld [vmem:[%s8968_s14 + $0x98] sm:$0xff]  ;;  %v5209_v52 = vld [vmem:[%s8968_s14 + $0x48] sm:$0xff] }
 0xbe6   : > { %v4589_v26 = vadd.f32 1e-05, %v4581_v20  ;;  %v4612_v39 = vmul.f32 %v9712_v16, %v4600_v5  ;;  %v5233_v20 = vld [vmem:[%s8968_s14 + $0x108] sm:$0xff]  ;;  %7419 = vmatprep.subr.bf16.mxu0 %v7418_v21 }
 0xbe7   : > { %v4588_v28 = vadd.f32 1e-05, %v4580_v25  ;;  %v4625_v23 = vadd.f32 %v9716_v61, %v4613_v33  ;;  %v5250_v25 = vld [vmem:[%s8968_s14 + $0x190] sm:$0xff]  ;;  %v5241_v21 = vld [vmem:[%s8968_s14 + $0x148] sm:$0xff] }
 0xbe8   : > { %7747 = vrsqrt.f32 %v4589_v26  ;;  %v4624_v30 = vadd.f32 %v9716_v61, %v4612_v39  ;;  %v5251_v39 = vld [vmem:[%s8968_s14 + $0x198] sm:$0xff] }
 0xbe9   : > { %7749 = vrsqrt.f32 %v4588_v28  ;;  %v5202_v28 = vld [vmem:[%s8968_s14 + $0x10] sm:$0xff]  ;;  %v7422_v33 = vpack.c.bf16 %v5251_v39, %v5250_v25  ;;  %v5211_v39 = vld [vmem:[%s8968_s14 + $0x58] sm:$0xff] }
 0xbea   : > { %v7744_v37 = vpop.eup %7743  ;;  %4783 = vmatmul.mubr.f32.vlgmr.msra.gmra.mrb[72].mxu1 %v4624_v30  ;;  %4896 = vmatmul.mubr.f32.vlgmr.msra.gmra.mrb[56].mxu0 %v4624_v30  ;;  %v5203_v30 = vld [vmem:[%s8968_s14 + $0x18] sm:$0xff] }
 0xbeb   : > { %v7746_v9 = vpop.eup %7745  ;;  %v4575_v36 = vpop.xlane.xlu1 %4574  ;;  %4788 = vmatprep.mubr.f32.mxu1 %v8368_v3  ;;  %4901 = vmatprep.mubr.f32.mxu0 %v8368_v3  ;;  %v4603_v48 = vmul.f32 %v7744_v37, %v9638_v54  ;;  %v7392_v37 = vpack.c.bf16 %v5203_v30, %v5202_v28  ;;  %v5242_v28 = vld [vmem:[%s8968_s14 + $0x150] sm:$0xff] }
 0xbec   : > { %v4583_v59 = vmul.f32 0.0078125, %v4575_v36  ;;  %v4573_v40 = vpop.xlane.xlu0 %4572  ;;  %v4602_v31 = vmul.f32 %v7746_v9, %v9641_v11  ;;  %v5234_v9 = vld [vmem:[%s8968_s14 + $0x110] sm:$0xff]  ;;  %v5235_v36 = vld [vmem:[%s8968_s14 + $0x118] sm:$0xff] }
 0xbed   : > { %v4582_v43 = vmul.f32 0.0078125, %v4573_v40  ;;  %v4615_v50 = vmul.f32 %v9712_v16, %v4603_v48  ;;  %v5220_v40 = vld [vmem:[%s8968_s14 + $0xa0] sm:$0xff] }
 0xbee   : > { %v4591_v55 = vadd.f32 1e-05, %v4583_v59  ;;  %4789 = vmatmul.mubr.f32.gmra.mrb[74].mxu1 %v4625_v23  ;;  %4902 = vmatmul.mubr.f32.gmra.mrb[58].mxu0 %v4625_v23  ;;  %v4614_v45 = vmul.f32 %v9712_v16, %v4602_v31  ;;  %v7424_v59 = vpack.c.bf16 %v5235_v36, %v5234_v9  ;;  %v5221_v23 = vld [vmem:[%s8968_s14 + $0xa8] sm:$0xff]  ;;  %v5252_v31 = vld [vmem:[%s8968_s14 + $0x1a0] sm:$0xff] }
 0xbef   : > { %v4590_v12 = vadd.f32 1e-05, %v4582_v43  ;;  %4794 = vmatprep.mubr.f32.mxu1 %v8368_v3  ;;  %4907 = vmatprep.mubr.f32.mxu0 %v8368_v3  ;;  %v4627_v51 = vadd.f32 %v9716_v61, %v4615_v50  ;;  %v7394_v48 = vpack.c.bf16 %v5221_v23, %v5220_v40  ;;  %v5253_v43 = vld [vmem:[%s8968_s14 + $0x1a8] sm:$0xff]  ;;  %v5228_v9 = vld [vmem:[%s8968_s14 + $0xe0] sm:$0xff] }
 0xbf0   : > { %7751 = vrsqrt.f32 %v4591_v55  ;;  %v4626_v34 = vadd.f32 %v9716_v61, %v4614_v45  ;;  %v7426_v55 = vpack.c.bf16 %v5253_v43, %v5252_v31  ;;  %v5204_v45 = vld [vmem:[%s8968_s14 + $0x20] sm:$0xff]  ;;  %v5229_v36 = vld [vmem:[%s8968_s14 + $0xe8] sm:$0xff] }
 0xbf1   : > { %7753 = vrsqrt.f32 %v4590_v12  ;;  %v5205_v12 = vld [vmem:[%s8968_s14 + $0x28] sm:$0xff]  ;;  %v7410_v40 = vpack.c.bf16 %v5229_v36, %v5228_v9  ;;  %v5212_v31 = vld [vmem:[%s8968_s14 + $0x60] sm:$0xff] }
 0xbf2   : > { %v7748_v11 = vpop.eup %7747  ;;  %4795 = vmatmul.mubr.f32.gmra.mrb[76].mxu1 %v4626_v34  ;;  %4908 = vmatmul.mubr.f32.gmra.mrb[60].mxu0 %v4626_v34  ;;  %v5236_v34 = vld [vmem:[%s8968_s14 + $0x120] sm:$0xff]  ;;  %v7396_v50 = vpack.c.bf16 %v5205_v12, %v5204_v45  ;;  %v5261_v23 = vld [vmem:[%s8968_s14 + $0x1e8] sm:$0xff] }
 0xbf3   : > { %v7750_v54 = vpop.eup %7749  ;;  %4800 = vmatprep.mubr.f32.mxu1 %v8368_v3  ;;  %4913 = vmatprep.mubr.f32.mxu0 %v8368_v3  ;;  %v4605_v4 = vmul.f32 %v7748_v11, %v9648_v41  ;;  %v5237_v11 = vld [vmem:[%s8968_s14 + $0x128] sm:$0xff]  ;;  %v5244_v45 = vld [vmem:[%s8968_s14 + $0x160] sm:$0xff] }
 0xbf4   : > { %v4604_v57 = vmul.f32 %v7750_v54, %v9651_v32  ;;  %v7428_v54 = vpack.c.bf16 %v5237_v11, %v5236_v34  ;;  %v5245_v12 = vld [vmem:[%s8968_s14 + $0x168] sm:$0xff]  ;;  %v5231_v11 = vld [vmem:[%s8968_s14 + $0xf8] sm:$0xff] }
 0xbf5   : > { %v4617_v1 = vmul.f32 %v9712_v16, %v4605_v4  ;;  %v5254_v4 = vld [vmem:[%s8968_s14 + $0x1b0] sm:$0xff]  ;;  %v7444_v34 = vpack.c.bf16 %v5245_v12, %v5244_v45 }
 0xbf6   : > { %4801 = vmatmul.mubr.f32.gmra.mrb[78].mxu1 %v4627_v51  ;;  %4914 = vmatmul.mubr.f32.gmra.mrb[62].mxu0 %v4627_v51  ;;  %v4616_v38 = vmul.f32 %v9712_v16, %v4604_v57  ;;  %v5222_v51 = vld [vmem:[%s8968_s14 + $0xb0] sm:$0xff]  ;;  %v5223_v57 = vld [vmem:[%s8968_s14 + $0xb8] sm:$0xff] }
 0xbf7   : > { %4806 = vmatprep.mubr.f32.mxu1 %v8368_v3  ;;  %4919 = vmatprep.mubr.f32.mxu0 %v8368_v3  ;;  %v4629_v41 = vadd.f32 %v9716_v61, %v4617_v1  ;;  %v5206_v1 = vld [vmem:[%s8968_s14 + $0x30] sm:$0xff] }
 0xbf8   : > { %v4628_v60 = vadd.f32 %v9716_v61, %v4616_v38  ;;  %v7398_v38 = vpack.c.bf16 %v5223_v57, %v5222_v51  ;;  %v5263_v57 = vld [vmem:[%s8968_s14 + $0x1f8] sm:$0xff] }
 0xbfa   : > { %v7752_v15 = vpop.eup %7751  ;;  %4807 = vmatmul.mubr.f32.gmra.mrb[80].mxu1 %v4628_v60  ;;  %4920 = vmatmul.mubr.f32.gmra.mrb[64].mxu0 %v4628_v60  ;;  %v5255_v60 = vld [vmem:[%s8968_s14 + $0x1b8] sm:$0xff] }
 0xbfb   : > { %v7754_v10 = vpop.eup %7753  ;;  %4812 = vmatprep.mubr.f32.mxu1 %v8368_v3  ;;  %4925 = vmatprep.mubr.f32.mxu0 %v8368_v3  ;;  %v4607_v24 = vmul.f32 %v7752_v15, %v9672_v53  ;;  %v5207_v15 = vld [vmem:[%s8968_s14 + $0x38] sm:$0xff] }
 0xbfc   : > { %v4606_v32 = vmul.f32 %v7754_v10, %v9677_v63  ;;  %v7430_v10 = vpack.c.bf16 %v5255_v60, %v5254_v4  ;;  %v5214_v4 = vld [vmem:[%s8968_s14 + $0x70] sm:$0xff] }
 0xbfd   : > { %v4619_v63 = vmul.f32 %v9712_v16, %v4607_v24  ;;  %v5239_v24 = vld [vmem:[%s8968_s14 + $0x138] sm:$0xff] }
 0xbfe   : > { %4813 = vmatmul.mubr.f32.gmra.mrb[82].mxu1 %v4629_v41  ;;  %4926 = vmatmul.mubr.f32.gmra.mrb[66].mxu0 %v4629_v41  ;;  %v4618_v35 = vmul.f32 %v9712_v16, %v4606_v32  ;;  %v5200_v16 = vld [vmem:[%s8968_s14] sm:$0xff]  ;;  %v7400_v41 = vpack.c.bf16 %v5207_v15, %v5206_v1  ;;  %v5238_v32 = vld [vmem:[%s8968_s14 + $0x130] sm:$0xff] }
 0xbff   : > { %4818 = vmatprep.mubr.f32.mxu1 %v8368_v3  ;;  %4931 = vmatprep.mubr.f32.mxu0 %v8368_v3  ;;  %v4631_v53 = vadd.f32 %v9716_v61, %v4619_v63  ;;  %v7388_v5 = vpack.c.bf16 %v5201_v18, %v5200_v16  ;;  %v5225_v63 = vld [vmem:[%s8968_s14 + $0xc8] sm:$0xff]  ;;  %v7404_v16 = vpack.c.bf16 %v5209_v52, %v5208_v56  ;;  %v5240_v18 = vld [vmem:[%s8968_s14 + $0x140] sm:$0xff]  ;;  %v5246_v15 = vld [vmem:[%s8968_s14 + $0x170] sm:$0xff] }
 0xc00   : > { %v4630_v42 = vadd.f32 %v9716_v61, %v4618_v35  ;;  %v5218_v61 = vld [vmem:[%s8968_s14 + $0x90] sm:$0xff]  ;;  %v7432_v35 = vpack.c.bf16 %v5239_v24, %v5238_v32  ;;  %v4696_v32 = vld [vmem:[%s8966_s25] sm:$0xf]  ;;  %s5825_s25 = scalar_lea.vmem (!%p6194_p0), [#allocation2], %s5503_s24 }
 0xc01   : > { %7389 = vmatpush3.bf16.msra.mxu1 %v7388_v5  ;;  %v7390_v26 = vpack.c.bf16 %v5219_v19, %v5218_v61  ;;  %v7436_v5 = vpack.c.bf16 %v5241_v21, %v5240_v18  ;;  %v5259_v19 = vld [vmem:[%s8968_s14 + $0x1d8] sm:$0xff]  ;;  %v9822_v24 = vrot.slane %v4696_v32, %v815_v58 }
 0xc02   : > { %4819 = vmatmul.mubr.f32.gmra.mrb[84].mxu1 %v4630_v42  ;;  %4932 = vmatmul.mubr.f32.gmra.mrb[68].mxu0 %v4630_v42  ;;  %v5224_v42 = vld [vmem:[%s8968_s14 + $0xc0] sm:$0xff] }
 0xc03   : > { %4824 = vmatprep.mubr.f32.mxu1 %v8368_v3  ;;  %4937 = vmatprep.mubr.f32.mxu0 %v8368_v3  ;;  %v5232_v3 = vld [vmem:[%s8968_s14 + $0x100] sm:$0xff]  ;;  %v7402_v46 = vpack.c.bf16 %v5225_v63, %v5224_v42  ;;  %v9830_v42 = vrot.slane %v4696_v32, %v827_v62  ;;  %v9834_v63 = vrot.slane %v4696_v32, %v4610_v17 }
 0xc04   : > { %v7420_v22 = vpack.c.bf16 %v5233_v20, %v5232_v3  ;;  %7391 = vmatprep.subr.bf16.mxu1 %v7390_v26  ;;  %v5226_v3 = vld [vmem:[%s8968_s14 + $0xd0] sm:$0xff]  ;;  %v5227_v20 = vld [vmem:[%s8968_s14 + $0xd8] sm:$0xff] }
 0xc05   : > { %7393 = vmatpush3.bf16.msra.mxu1 %v7392_v37  ;;  %v7406_v61 = vpack.c.bf16 %v5227_v20, %v5226_v3  ;;  %v5210_v26 = vld [vmem:[%s8968_s14 + $0x50] sm:$0xff] }
 0xc06   : > { %4825 = vmatmul.mubr.f32.gmra.mrb[86].mxu1 %v4631_v53  ;;  %4938 = vmatmul.mubr.f32.gmra.mrb[70].mxu0 %v4631_v53  ;;  %v5256_v53 = vld [vmem:[%s8968_s14 + $0x1c0] sm:$0xff]  ;;  %v7408_v30 = vpack.c.bf16 %v5211_v39, %v5210_v26 }
 0xc07   : > { %7421 = vmatpush3.bf16.msra.mxu0 %v7420_v22  ;;  %7395 = vmatprep.subr.bf16.mxu1 %v7394_v48  ;;  %v7434_v7 = vpack.c.bf16 %v5257_v14, %v5256_v53  ;;  %v5258_v22 = vld [vmem:[%s8968_s14 + $0x1d0] sm:$0xff]  ;;  %v5213_v48 = vld [vmem:[%s8968_s14 + $0x68] sm:$0xff] }
 0xc08   : > { %7423 = vmatprep.subr.bf16.mxu0 %v7422_v33  ;;  %v7438_v25 = vpack.c.bf16 %v5259_v19, %v5258_v22  ;;  %v5243_v33 = vld [vmem:[%s8968_s14 + $0x158] sm:$0xff] }
 0xc09   : > { %7397 = vmatpush3.bf16.msra.mxu1 %v7396_v50  ;;  %v7440_v37 = vpack.c.bf16 %v5243_v33, %v5242_v28  ;;  %v5230_v50 = vld [vmem:[%s8968_s14 + $0xf0] sm:$0xff] }
 0xc0a   : > { %7399 = vmatprep.subr.bf16.mxu1 %v7398_v38  ;;  %v7414_v51 = vpack.c.bf16 %v5231_v11, %v5230_v50  ;;  %v5215_v38 = vld [vmem:[%s8968_s14 + $0x78] sm:$0xff] }
 0xc0b   : > { %7425 = vmatpush3.bf16.msra.mxu0 %v7424_v59  ;;  %v5260_v59 = vld [vmem:[%s8968_s14 + $0x1e0] sm:$0xff]  ;;  %v7416_v1 = vpack.c.bf16 %v5215_v38, %v5214_v4 }
 0xc0c   : > { %7427 = vmatprep.subr.bf16.mxu0 %v7426_v55  ;;  %v7442_v43 = vpack.c.bf16 %v5261_v23, %v5260_v59  ;;  %v7412_v55 = vpack.c.bf16 %v5213_v48, %v5212_v31 }
 0xc0d   : > { %7401 = vmatpush3.bf16.msra.mxu1 %v7400_v41 }
 0xc0e   : > { %7403 = vmatprep.subr.bf16.mxu1 %v7402_v46 }
 0xc0f   : > { %7429 = vmatpush3.bf16.msra.mxu0 %v7428_v54  ;;  %v5262_v54 = vld [vmem:[%s8968_s14 + $0x1f0] sm:$0xff] }
 0xc10   : > { %7431 = vmatprep.subr.bf16.mxu0 %v7430_v10  ;;  %v7446_v60 = vpack.c.bf16 %v5263_v57, %v5262_v54  ;;  %v5247_v10 = vld [vmem:[%s8968_s14 + $0x178] sm:$0xff]  ;;  %s5827_s14 = scalar_lea.vmem (!%p6194_p0), [#allocation2], %s5508_s26 }
 0xc11   : > { %7405 = vmatpush3.bf16.msra.mxu1 %v7404_v16  ;;  %v7448_v41 = vpack.c.bf16 %v5247_v10, %v5246_v15 }
 0xc12   : > { %7407 = vmatprep.subr.bf16.mxu1 %v7406_v61 }
 0xc13   : > { %7433 = vmatpush3.bf16.msra.mxu0 %v7432_v35  ;;  %v9826_v35 = vrot.slane %v4696_v32, %v4510_v44 }
 0xc14   : > { %7435 = vmatprep.subr.bf16.mxu0 %v7434_v7 }
 0xc15   : > { %7409 = vmatpush3.bf16.msra.mxu1 %v7408_v30 }
 0xc16   : > { %7411 = vmatprep.subr.bf16.mxu1 %v7410_v40 }
 0xc17   : > { %7437 = vmatpush3.bf16.msra.mxu0 %v7436_v5 }
 0xc18   : > { %7439 = vmatprep.subr.bf16.mxu0 %v7438_v25 }
 0xc19   : > { %7413 = vmatpush3.bf16.msra.mxu1 %v7412_v55 }
 0xc1a   : > { %7415 = vmatprep.subr.bf16.mxu1 %v7414_v51 }
 0xc1b   : > { %7441 = vmatpush3.bf16.msra.mxu0 %v7440_v37 }
 0xc1c   : > { %7443 = vmatprep.subr.bf16.mxu0 %v7442_v43 }
 0xc1d   : > { %7417 = vmatpush3.bf16.msra.mxu1 %v7416_v1 }
 0xc1f   : > { %7445 = vmatpush3.bf16.msra.mxu0 %v7444_v34 }
 0xc20   : > { %7447 = vmatprep.subr.bf16.mxu0 %v7446_v60 }
 0xc23   : > { %7449 = vmatpush3.bf16.msra.mxu0 %v7448_v41 }
 0xcbd   : > { %v4784_v53 = vpop.f32.mrb[72].mxu1  ;;  %v4897_v46 = vpop.f32.mrb[56].mxu0 }
 0xcbe   : > { %v9837_v14 = vadd.f32 %v4784_v53, %v9822_v24  ;;  %v9840_v58 = vadd.f32 %v4897_v46, %v9826_v35  ;;  %v4786_v56 = vpop.f32.mrb[73].mxu1  ;;  %v4899_v52 = vpop.f32.mrb[57].mxu0 }
 0xcbf   : > { %v9843_v44 = vadd.f32 %v4786_v56, %v9830_v42  ;;  %v9846_v62 = vadd.f32 %v4899_v52, %v9834_v63 }
 0xcc0   : > { %v6162_v7 = vmul.f32 -1.702, %v9837_v14  ;;  %v6164_v17 = vmul.f32 -1.702, %v9840_v58 }
 0xcc1   : > { %v6163_v16 = vmul.f32 -1.702, %v9843_v44  ;;  %v6165_v18 = vmul.f32 -1.702, %v9846_v62  ;;  %v4790_v21 = vpop.f32.mrb[74].mxu1  ;;  %v4903_v5 = vpop.f32.mrb[58].mxu0 }
 0xcc2   : > { %v5008_v3 = vmul.f32 1.442695, %v6162_v7  ;;  %v5012_v20 = vmul.f32 1.442695, %v6164_v17  ;;  %v9853_v22 = vadd.f32 %v4790_v21, %v9822_v24  ;;  %v9856_v61 = vadd.f32 %v4903_v5, %v9826_v35  ;;  %v4792_v19 = vpop.f32.mrb[75].mxu1  ;;  %v4905_v25 = vpop.f32.mrb[59].mxu0 }
 0xcc3   : > { %v5010_v26 = vmul.f32 1.442695, %v6163_v16  ;;  %v5014_v39 = vmul.f32 1.442695, %v6165_v18  ;;  %v9859_v28 = vadd.f32 %v4792_v19, %v9830_v42  ;;  %v9862_v30 = vadd.f32 %v4905_v25, %v9834_v63 }
 0xcc4   : > { %7755 = vpow2.f32 %v5008_v3  ;;  %v6166_v33 = vmul.f32 -1.702, %v9853_v22  ;;  %v6168_v37 = vmul.f32 -1.702, %v9856_v61 }
 0xcc5   : > { %7757 = vpow2.f32 %v5012_v20  ;;  %v6167_v9 = vmul.f32 -1.702, %v9859_v28  ;;  %v6169_v36 = vmul.f32 -1.702, %v9862_v30  ;;  %v4796_v59 = vpop.f32.mrb[76].mxu1  ;;  %v4909_v40 = vpop.f32.mrb[60].mxu0 }
 0xcc6   : > { %7759 = vpow2.f32 %v5010_v26  ;;  %v5016_v23 = vmul.f32 1.442695, %v6166_v33  ;;  %v5020_v31 = vmul.f32 1.442695, %v6168_v37  ;;  %v9869_v48 = vadd.f32 %v4796_v59, %v9822_v24  ;;  %v4798_v43 = vpop.f32.mrb[77].mxu1  ;;  %v4911_v55 = vpop.f32.mrb[61].mxu0 }
 0xcc7   : > { %7761 = vpow2.f32 %v5014_v39  ;;  %v5018_v45 = vmul.f32 1.442695, %v6167_v9  ;;  %v5022_v12 = vmul.f32 1.442695, %v6169_v36  ;;  %v9872_v34 = vadd.f32 %v4909_v40, %v9826_v35 }
 0xcc8   : > { %7763 = vpow2.f32 %v5016_v23  ;;  %v6170_v50 = vmul.f32 -1.702, %v9869_v48  ;;  %v9876_v11 = vadd.f32 %v4798_v43, %v9830_v42  ;;  %v9879_v54 = vadd.f32 %v4911_v55, %v9834_v63 }
 0xcc9   : > { %7765 = vpow2.f32 %v5020_v31  ;;  %v6172_v51 = vmul.f32 -1.702, %v9872_v34  ;;  %v4802_v57 = vpop.f32.mrb[78].mxu1  ;;  %v4915_v4 = vpop.f32.mrb[62].mxu0 }
 0xcca   : > { %7767 = vpow2.f32 %v5018_v45  ;;  %v5024_v38 = vmul.f32 1.442695, %v6170_v50  ;;  %v6171_v60 = vmul.f32 -1.702, %v9876_v11  ;;  %v6173_v1 = vmul.f32 -1.702, %v9879_v54 }
 0xccb   : > { %7769 = vpow2.f32 %v5022_v12  ;;  %v5028_v15 = vmul.f32 1.442695, %v6172_v51  ;;  %v4804_v10 = vpop.f32.mrb[79].mxu1  ;;  %v4917_v41 = vpop.f32.mrb[63].mxu0  ;;  %v9885_v7 = vadd.f32 %v4802_v57, %v9822_v24  ;;  %v9888_v5 = vadd.f32 %v4915_v4, %v9826_v35 }
 0xccc   : > { %7771 = vpow2.f32 %v5024_v38  ;;  %v5026_v32 = vmul.f32 1.442695, %v6171_v60  ;;  %v5030_v53 = vmul.f32 1.442695, %v6173_v1  ;;  %v9891_v26 = vadd.f32 %v4804_v10, %v9830_v42 }
 0xccd   : > { %7773 = vpow2.f32 %v5028_v15  ;;  %v4808_v46 = vpop.f32.mrb[80].mxu1  ;;  %v4921_v56 = vpop.f32.mrb[64].mxu0  ;;  %v6174_v9 = vmul.f32 -1.702, %v9885_v7  ;;  %v6176_v23 = vmul.f32 -1.702, %v9888_v5  ;;  %v9896_v31 = vadd.f32 %v4917_v41, %v9834_v63 }
 0xcce   : > { %v7756_v52 = vpop.eup %7755  ;;  %7775 = vpow2.f32 %v5026_v32  ;;  %v4810_v17 = vpop.f32.mrb[81].mxu1  ;;  %v9899_v12 = vadd.f32 %v4808_v46, %v9822_v24  ;;  %v6175_v4 = vmul.f32 -1.702, %v9891_v26  ;;  %v9903_v38 = vadd.f32 %v4921_v56, %v9826_v35 }
 0xccf   : > { %v4923_v16 = vpop.f32.mrb[65].mxu0  ;;  %v7758_v18 = vpop.eup %7757  ;;  %v5072_v21 = vadd.f32 1.0, %v7756_v52  ;;  %7777 = vpow2.f32 %v5030_v53  ;;  %v5032_v41 = vmul.f32 1.442695, %v6174_v9  ;;  %v9908_v32 = vadd.f32 %v4810_v17, %v9830_v42 }
 0xcd0   : > { %v7760_v3 = vpop.eup %7759  ;;  %v5074_v20 = vadd.f32 1.0, %v7758_v18  ;;  %v6177_v56 = vmul.f32 -1.702, %v9896_v31 }
 0xcd1   : > { %v7762_v19 = vpop.eup %7761  ;;  %7779 = vrcp.f32 %v5072_v21  ;;  %v5073_v25 = vadd.f32 1.0, %v7760_v3  ;;  %v4814_v39 = vpop.f32.mrb[82].mxu1  ;;  %v5036_v21 = vmul.f32 1.442695, %v6176_v23  ;;  %v6179_v23 = vmul.f32 -1.702, %v9908_v32 }
 0xcd2   : > { %v7764_v33 = vpop.eup %7763  ;;  %7781 = vrcp.f32 %v5074_v20  ;;  %v5075_v37 = vadd.f32 1.0, %v7762_v19  ;;  %v4927_v36 = vpop.f32.mrb[66].mxu0  ;;  %v6178_v19 = vmul.f32 -1.702, %v9899_v12  ;;  %v9921_v9 = vadd.f32 %v4814_v39, %v9822_v24 }
 0xcd3   : > { %v7766_v59 = vpop.eup %7765  ;;  %7783 = vrcp.f32 %v5073_v25  ;;  %v5076_v40 = vadd.f32 1.0, %v7764_v33  ;;  %v4816_v43 = vpop.f32.mrb[83].mxu1  ;;  %v9917_v25 = vadd.f32 %v4923_v16, %v9834_v63  ;;  %v5042_v13 = vmul.f32 1.442695, %v6179_v23 }
 0xcd4   : > { %v7768_v55 = vpop.eup %7767  ;;  %7785 = vrcp.f32 %v5075_v37  ;;  %v5078_v45 = vadd.f32 1.0, %v7766_v59  ;;  %v4929_v50 = vpop.f32.mrb[67].mxu0  ;;  %v6180_v37 = vmul.f32 -1.702, %v9903_v38  ;;  %v9934_v39 = vadd.f32 %v4816_v43, %v9830_v42 }
 0xcd5   : > { %v7770_v51 = vpop.eup %7769  ;;  %7787 = vrcp.f32 %v5076_v40  ;;  %v5077_v57 = vadd.f32 1.0, %v7768_v55  ;;  %v4820_v60 = vpop.f32.mrb[84].mxu1  ;;  %v9927_v55 = vadd.f32 %v4927_v36, %v9826_v35  ;;  %v9940_v36 = vadd.f32 %v4929_v50, %v9834_v63 }
 0xcd6   : > { %v9905_v1 = vpop.f32.mrb[68].mxu0  ;;  %v7772_v15 = vpop.eup %7771  ;;  %7789 = vrcp.f32 %v5078_v45  ;;  %v5079_v10 = vadd.f32 1.0, %v7770_v51 }
 0xcd7   : > { %v9910_v53 = vpop.f32.mrb[85].mxu1  ;;  %v9912_v46 = vpop.f32.mrb[69].mxu0  ;;  %7791 = vrcp.f32 %v5077_v57  ;;  %v5080_v18 = vadd.f32 1.0, %v7772_v15  ;;  %v5034_v57 = vmul.f32 1.442695, %v6175_v4  ;;  %v9944_v4 = vadd.f32 %v4820_v60, %v9822_v24 }
 0xcd8   : > { %v7774_v52 = vpop.eup %7773  ;;  %7793 = vrcp.f32 %v5079_v10  ;;  %v5038_v15 = vmul.f32 1.442695, %v6177_v56  ;;  %v6185_v6 = vmul.f32 -1.702, %v9940_v36 }
 0xcd9   : > { %v7776_v3 = vpop.eup %7775  ;;  %v5082_v20 = vadd.f32 1.0, %v7774_v52  ;;  %7795 = vrcp.f32 %v5080_v18  ;;  %v9923_v59 = vpop.f32.mrb[86].mxu1  ;;  %v5040_v18 = vmul.f32 1.442695, %v6178_v19  ;;  %v6184_v19 = vmul.f32 -1.702, %v9927_v55 }
 0xcda   : > { %v7778_v17 = vpop.eup %7777  ;;  %v5081_v33 = vadd.f32 1.0, %v7776_v3  ;;  %v9929_v45 = vpop.f32.mrb[70].mxu0  ;;  %v6181_v3 = vmul.f32 -1.702, %v9917_v25  ;;  %v6186_v23 = vmul.f32 -1.702, %v9944_v4 }
 0xcdb   : > { %7797 = vrcp.f32 %v5082_v20  ;;  %v5083_v40 = vadd.f32 1.0, %v7778_v17  ;;  %v9931_v16 = vpop.f32.mrb[87].mxu1  ;;  %v7780_v51 = vpop.eup %7779  ;;  %v5044_v17 = vmul.f32 1.442695, %v6180_v37 }
 0xcdc   : > { %7799 = vrcp.f32 %v5081_v33  ;;  %v9936_v10 = vpop.f32.mrb[71].mxu0  ;;  %v7782_v52 = vpop.eup %7781  ;;  %v6182_v33 = vmul.f32 -1.702, %v9921_v9  ;;  %v5168_v8 = vmul.f32 %v7780_v51, %v9837_v14  ;;  %v5046_v60 = vmul.f32 1.442695, %v6181_v3 }
 0xcdd   : > { %7801 = vrcp.f32 %v5083_v40  ;;  %v7784_v20 = vpop.eup %7783  ;;  %v5170_v47 = vmul.f32 %v7782_v52, %v9840_v58  ;;  %v5052_v51 = vmul.f32 1.442695, %v6184_v19 }
 0xcde   : > { %7803 = vpow2.f32 %v5032_v41  ;;  %v7786_v43 = vpop.eup %7785  ;;  %v5169_v56 = vmul.f32 %v7784_v20, %v9843_v44  ;;  %v6183_v41 = vmul.f32 -1.702, %v9934_v39  ;;  %v5054_v20 = vmul.f32 1.442695, %v6185_v6 }
 0xcdf   : > { %7805 = vpow2.f32 %v5036_v21  ;;  %v7788_v40 = vpop.eup %7787  ;;  %v5171_v50 = vmul.f32 %v7786_v43, %v9846_v62  ;;  %v5048_v21 = vmul.f32 1.442695, %v6182_v33  ;;  %v5056_v33 = vmul.f32 1.442695, %v6186_v23 }
 0xce0   : > { %7807 = vpow2.f32 %v5034_v57  ;;  %v7790_v37 = vpop.eup %7789  ;;  %5332 = vmatprep.mubr.f32.mxu1 %v5169_v56  ;;  %v5172_v58 = vmul.f32 %v7788_v40, %v9853_v22  ;;  %v5050_v52 = vmul.f32 1.442695, %v6183_v41  ;;  %v9968_v41 = vadd.f32 %v9910_v53, %v9830_v42 }
 0xce1   : > { %7809 = vpow2.f32 %v5038_v15  ;;  %v7792_v44 = vpop.eup %7791  ;;  %5437 = vmatprep.mubr.f32.mxu0 %v5171_v50  ;;  %5333 = vmatmul.mubr.f32.vlgmr.msra.gmra.mrb[88].mxu1 %v5168_v8 }
 0xce2   : > { %7811 = vpow2.f32 %v5040_v18  ;;  %v7794_v14 = vpop.eup %7793  ;;  %v5173_v62 = vmul.f32 %v7792_v44, %v9859_v28  ;;  %5438 = vmatmul.mubr.f32.vlgmr.msra.gmra.mrb[72].mxu0 %v5170_v47  ;;  %v5174_v18 = vmul.f32 %v7790_v37, %v9856_v61  ;;  %v9972_v44 = vadd.f32 %v9912_v46, %v9834_v63 }
 0xce3   : > { %7813 = vpow2.f32 %v5044_v17  ;;  %v7796_v57 = vpop.eup %7795  ;;  %v5175_v15 = vmul.f32 %v7794_v14, %v9862_v30 }
 0xce4   : > { %7815 = vpow2.f32 %v5042_v13  ;;  %5337 = vmatprep.mubr.f32.mxu1 %v5173_v62  ;;  %v5176_v13 = vmul.f32 %v7796_v57, %v9869_v48 }
 0xce5   : > { %v7798_v3 = vpop.eup %7797  ;;  %7817 = vpow2.f32 %v5046_v60  ;;  %5442 = vmatprep.mubr.f32.mxu0 %v5175_v15  ;;  %5338 = vmatmul.mubr.f32.gmra.mrb[90].mxu1 %v5172_v58  ;;  %v6187_v58 = vmul.f32 -1.702, %v9968_v41  ;;  %v9986_v15 = vadd.f32 %v9931_v16, %v9830_v42 }
 0xce6   : > { %v7800_v8 = vpop.eup %7799  ;;  %7819 = vpow2.f32 %v5048_v21  ;;  %5443 = vmatmul.mubr.f32.gmra.mrb[74].mxu0 %v5174_v18  ;;  %v5178_v6 = vmul.f32 %v7798_v3, %v9872_v34  ;;  %v9991_v3 = vadd.f32 %v9936_v10, %v9834_v63 }
 0xce7   : > { %v7802_v28 = vpop.eup %7801  ;;  %v5177_v47 = vmul.f32 %v7800_v8, %v9876_v11  ;;  %7821 = vpow2.f32 %v5052_v51  ;;  %v9981_v51 = vadd.f32 %v9929_v45, %v9826_v35 }
 0xce8   : > { %v7804_v22 = vpop.eup %7803  ;;  %v5179_v30 = vmul.f32 %v7802_v28, %v9879_v54  ;;  %7823 = vpow2.f32 %v5050_v52  ;;  %v9964_v54 = vadd.f32 %v9905_v1, %v9826_v35  ;;  %v9976_v1 = vadd.f32 %v9923_v59, %v9822_v24 }
 0xce9   : > { %v7806_v61 = vpop.eup %7805  ;;  %v5084_v17 = vadd.f32 1.0, %v7804_v22  ;;  %7825 = vpow2.f32 %v5054_v20  ;;  %5342 = vmatprep.mubr.f32.mxu1 %v5177_v47  ;;  %v6189_v52 = vmul.f32 -1.702, %v9972_v44  ;;  %v6192_v42 = vmul.f32 -1.702, %v9981_v51 }
 0xcea   : > { %v7808_v43 = vpop.eup %7807  ;;  %v5086_v56 = vadd.f32 1.0, %v7806_v61  ;;  %7827 = vpow2.f32 %v5056_v33  ;;  %5447 = vmatprep.mubr.f32.mxu0 %v5179_v30  ;;  %5343 = vmatmul.mubr.f32.gmra.mrb[92].mxu1 %v5176_v13  ;;  %v6188_v53 = vmul.f32 -1.702, %v9964_v54  ;;  %v6190_v18 = vmul.f32 -1.702, %v9976_v1 }
 0xceb   : > { %v7810_v11 = vpop.eup %7809  ;;  %7829 = vrcp.f32 %v5084_v17  ;;  %v5085_v19 = vadd.f32 1.0, %v7808_v43  ;;  %5448 = vmatmul.mubr.f32.gmra.mrb[76].mxu0 %v5178_v6  ;;  %v5058_v28 = vmul.f32 1.442695, %v6187_v58  ;;  %v6191_v47 = vmul.f32 -1.702, %v9986_v15 }
 0xcec   : > { %v7812_v40 = vpop.eup %7811  ;;  %7831 = vrcp.f32 %v5086_v56  ;;  %v5087_v48 = vadd.f32 1.0, %v7810_v11  ;;  %v5060_v33 = vmul.f32 1.442695, %v6188_v53  ;;  %v5062_v63 = vmul.f32 1.442695, %v6189_v52 }
 0xced   : > { %v7814_v34 = vpop.eup %7813  ;;  %7833 = vrcp.f32 %v5085_v19  ;;  %v5088_v50 = vadd.f32 1.0, %v7812_v40  ;;  %v6193_v10 = vmul.f32 -1.702, %v9991_v3  ;;  %v5064_v30 = vmul.f32 1.442695, %v6190_v18 }
 0xcee   : > { %v7816_v37 = vpop.eup %7815  ;;  %7835 = vrcp.f32 %v5087_v48  ;;  %v5090_v60 = vadd.f32 1.0, %v7814_v34  ;;  %v5068_v17 = vmul.f32 1.442695, %v6192_v42  ;;  %v5066_v19 = vmul.f32 1.442695, %v6191_v47 }
 0xcef   : > { %v7818_v21 = vpop.eup %7817  ;;  %7837 = vrcp.f32 %v5088_v50  ;;  %v5089_v23 = vadd.f32 1.0, %v7816_v37  ;;  %v5070_v34 = vmul.f32 1.442695, %v6193_v10 }
 0xcf0   : > { %v7820_v14 = vpop.eup %7819  ;;  %7839 = vrcp.f32 %v5090_v60  ;;  %v5091_v62 = vadd.f32 1.0, %v7818_v21 }
 0xcf1   : > { %v7822_v57 = vpop.eup %7821  ;;  %7841 = vrcp.f32 %v5089_v23  ;;  %v5092_v46 = vadd.f32 1.0, %v7820_v14 }
 0xcf2   : > { %v7824_v24 = vpop.eup %7823  ;;  %7843 = vrcp.f32 %v5091_v62  ;;  %v5094_v59 = vadd.f32 1.0, %v7822_v57 }
 0xcf3   : > { %v7826_v35 = vpop.eup %7825  ;;  %7845 = vrcp.f32 %v5092_v46  ;;  %v5093_v45 = vadd.f32 1.0, %v7824_v24 }
 0xcf4   : > { %v7828_v20 = vpop.eup %7827  ;;  %7847 = vrcp.f32 %v5094_v59  ;;  %v5095_v8 = vadd.f32 1.0, %v7826_v35 }
 0xcf5   : > { %v7830_v16 = vpop.eup %7829  ;;  %7849 = vrcp.f32 %v5093_v45 }
 0xcf6   : > { %v7832_v22 = vpop.eup %7831  ;;  %7851 = vrcp.f32 %v5095_v8  ;;  %v5180_v56 = vmul.f32 %v7830_v16, %v9885_v7 }
 0xcf7   : > { %v7834_v13 = vpop.eup %7833  ;;  %7853 = vpow2.f32 %v5060_v33  ;;  %v5182_v48 = vmul.f32 %v7832_v22, %v9888_v5 }
 0xcf8   : > { %v7836_v61 = vpop.eup %7835  ;;  %v5181_v6 = vmul.f32 %v7834_v13, %v9891_v26  ;;  %7855 = vpow2.f32 %v5058_v28 }
 0xcf9   : > { %v7838_v43 = vpop.eup %7837  ;;  %v5183_v11 = vmul.f32 %v7836_v61, %v9896_v31  ;;  %7857 = vpow2.f32 %v5062_v63 }
 0xcfa   : > { %v7840_v40 = vpop.eup %7839  ;;  %5347 = vmatprep.mubr.f32.mxu1 %v5181_v6  ;;  %7859 = vpow2.f32 %v5064_v30  ;;  %v5184_v31 = vmul.f32 %v7838_v43, %v9899_v12 }
 0xcfb   : > { %v7842_v50 = vpop.eup %7841  ;;  %5452 = vmatprep.mubr.f32.mxu0 %v5183_v11  ;;  %5348 = vmatmul.mubr.f32.gmra.mrb[94].mxu1 %v5180_v56  ;;  %7861 = vpow2.f32 %v5068_v17  ;;  %v5186_v5 = vmul.f32 %v7840_v40, %v9903_v38  ;;  %v7892_v17 = vld [vmem:[%s8958_s2] sm:$0x3f]  ;;  %s5527_s2 = sadd.s32 (!%p6194_p0), 6, %s6195_s5  ;;  %s5837_s5 = scalar_lea.vmem (!%p6194_p0), [#allocation2], %s5533_s1 }
 0xcfc   : > { %v7844_v26 = vpop.eup %7843  ;;  %v5185_v37 = vmul.f32 %v7842_v50, %v9908_v32  ;;  %5453 = vmatmul.mubr.f32.gmra.mrb[78].mxu0 %v5182_v48  ;;  %7863 = vpow2.f32 %v5066_v19  ;;  %v5096_v32 = vadd.f32 1.0, %v7828_v20  ;;  %s5528_s22 = sld [smem:[#allocation4 + %s5527_s2]] (!%p6194_p0) }
 0xcfd   : > { %v7846_v7 = vpop.eup %7845  ;;  %v5187_v60 = vmul.f32 %v7844_v26, %v9917_v25  ;;  %7865 = vpow2.f32 %v5070_v34 }
 0xcfe   : > { %v7848_v21 = vpop.eup %7847  ;;  %5352 = vmatprep.mubr.f32.mxu1 %v5185_v37  ;;  %v5188_v53 = vmul.f32 %v7846_v7, %v9921_v9  ;;  %7867 = vrcp.f32 %v5096_v32 }
 0xcff   : > { %v7850_v23 = vpop.eup %7849  ;;  %5457 = vmatprep.mubr.f32.mxu0 %v5187_v60  ;;  %5353 = vmatmul.mubr.f32.gmra.mrb[96].mxu1 %v5184_v31  ;;  %v5190_v25 = vmul.f32 %v7848_v21, %v9927_v55 }
 0xd00   : > { %v7852_v14 = vpop.eup %7851  ;;  %v5189_v62 = vmul.f32 %v7850_v23, %v9934_v39  ;;  %5458 = vmatmul.mubr.f32.gmra.mrb[80].mxu0 %v5186_v5 }
 0xd01   : > { %v5191_v12 = vmul.f32 %v7852_v14, %v9940_v36  ;;  %v7854_v57 = vpop.eup %7853 }
 0xd02   : > { %5357 = vmatprep.mubr.f32.mxu1 %v5189_v62  ;;  %v7856_v46 = vpop.eup %7855  ;;  %v5098_v38 = vadd.f32 1.0, %v7854_v57  ;;  %s5835_s19 = scalar_lea.vmem (!%p6194_p0), [#allocation2], %s5528_s22 }
 0xd03   : > { %5462 = vmatprep.mubr.f32.mxu0 %v5191_v12  ;;  %5358 = vmatmul.mubr.f32.gmra.mrb[98].mxu1 %v5188_v53  ;;  %v7858_v58 = vpop.eup %7857  ;;  %v5097_v24 = vadd.f32 1.0, %v7856_v46 }
 0xd04   : > { %5463 = vmatmul.mubr.f32.gmra.mrb[82].mxu0 %v5190_v25  ;;  %v7860_v59 = vpop.eup %7859  ;;  %7869 = vrcp.f32 %v5098_v38  ;;  %v5099_v39 = vadd.f32 1.0, %v7858_v58 }
 0xd05   : > { %v7862_v52 = vpop.eup %7861  ;;  %7871 = vrcp.f32 %v5097_v24  ;;  %v5100_v9 = vadd.f32 1.0, %v7860_v59 }
 0xd06   : > { %v7864_v35 = vpop.eup %7863  ;;  %7873 = vrcp.f32 %v5099_v39  ;;  %v5102_v36 = vadd.f32 1.0, %v7862_v52 }
 0xd07   : > { %v7866_v45 = vpop.eup %7865  ;;  %7875 = vrcp.f32 %v5100_v9  ;;  %v5101_v55 = vadd.f32 1.0, %v7864_v35 }
 0xd08   : > { %7877 = vrcp.f32 %v5102_v36  ;;  %v5103_v18 = vadd.f32 1.0, %v7866_v45  ;;  %v7868_v20 = vpop.eup %7867 }
 0xd09   : > { %7879 = vrcp.f32 %v5101_v55  ;;  %v5192_v47 = vmul.f32 %v7868_v20, %v9944_v4 }
 0xd0a   : > { %7881 = vrcp.f32 %v5103_v18 }
 0xd0e   : > { %v7870_v8 = vpop.eup %7869 }
 0xd0f   : > { %v7872_v33 = vpop.eup %7871  ;;  %v5194_v10 = vmul.f32 %v7870_v8, %v9964_v54  ;;  %v5266_v54 = vsub.s32 5, %v9064_v49 }
 0xd10   : > { %v7874_v42 = vpop.eup %7873  ;;  %v5193_v16 = vmul.f32 %v7872_v33, %v9968_v41 }
 0xd11   : > { %v7876_v28 = vpop.eup %7875  ;;  %v5195_v22 = vmul.f32 %v7874_v42, %v9972_v44  ;;  %v10019_v43 = vrot.slane %v7892_v17, %v5266_v54 }
 0xd12   : > { %v7878_v63 = vpop.eup %7877  ;;  %5362 = vmatprep.mubr.f32.mxu1 %v5193_v16  ;;  %v5196_v6 = vmul.f32 %v7876_v28, %v9976_v1 }
 0xd13   : > { %v7880_v13 = vpop.eup %7879  ;;  %5467 = vmatprep.mubr.f32.mxu0 %v5195_v22  ;;  %5363 = vmatmul.mubr.f32.gmra.mrb[100].mxu1 %v5192_v47  ;;  %v5198_v4 = vmul.f32 %v7878_v63, %v9981_v51  ;;  %v10247_v47 = vld [vmem:[#allocation50_spill] sm:$0xff] }
 0xd14   : > { %v7882_v30 = vpop.eup %7881  ;;  %v5197_v61 = vmul.f32 %v7880_v13, %v9986_v15  ;;  %5468 = vmatmul.mubr.f32.gmra.mrb[84].mxu0 %v5194_v10  ;;  %v10248_v13 = vld [vmem:[#allocation49_spill] sm:$0xff] }
 0xd15   : > { %v5199_v41 = vmul.f32 %v7882_v30, %v9991_v3 }
 0xd16   : > { %5367 = vmatprep.mubr.f32.mxu1 %v5197_v61 }
 0xd17   : > { %5472 = vmatprep.mubr.f32.mxu0 %v5199_v41  ;;  %5368 = vmatmul.mubr.f32.gmra.mrb[102].mxu1 %v5196_v6 }
 0xd18   : > { %5473 = vmatmul.mubr.f32.gmra.mrb[86].mxu0 %v5198_v4 }
 0xdb4   : > { %v6486_v44 = vpop.f32.mrb[88].mxu1 }
 0xdb5   : > { %v6542_v56 = vpop.f32.mrb[72].mxu0  ;;  %v6487_v11 = vpop.f32.mrb[89].mxu1 }
 0xdb6   : > { %v6488_v15 = vadd.f32 %v6487_v11, %v6486_v44  ;;  %v6543_v19 = vpop.f32.mrb[73].mxu0 }
 0xdb7   : > { %v6544_v40 = vadd.f32 %v6543_v19, %v6542_v56 }
 0xdb8   : > { %v5335_v1 = vadd.f32 %v6488_v15, %v10019_v43  ;;  %v6489_v3 = vpop.f32.mrb[90].mxu1 }
 0xdb9   : > { %v6545_v48 = vpop.f32.mrb[74].mxu0  ;;  %v6490_v51 = vpop.f32.mrb[91].mxu1 }
 0xdba   : > { %v5440_v34 = vadd.f32 %v6544_v40, %v5335_v1  ;;  %v6491_v50 = vadd.f32 %v6490_v51, %v6489_v3  ;;  %v6546_v26 = vpop.f32.mrb[75].mxu0  ;;  %v10249_v3 = vld [vmem:[#allocation52_spill] sm:$0xff] }
 0xdbb   : > { %v6547_v37 = vadd.f32 %v6546_v26, %v6545_v48 }
 0xdbc   : > { %v5478_v49 = vadd.f32 %v5440_v34, %v9581_v27  ;;  %v5340_v7 = vadd.f32 %v6491_v50, %v10019_v43  ;;  %v10250_v50 = vld [vmem:[#allocation51_spill] sm:$0xff] }
 0xdbd   : > { %v6492_v31 = vpop.f32.mrb[92].mxu1 }
 0xdbe   : > { %v6548_v60 = vpop.f32.mrb[76].mxu0  ;;  %v6493_v21 = vpop.f32.mrb[93].mxu1  ;;  %5486 = vst [vmem:[#allocation2] sm:$0xff] %v5478_v49  ;;  %v5445_v5 = vadd.f32 %v6547_v37, %v5340_v7 }
 0xdbf   : > { %v6494_v23 = vadd.f32 %v6493_v21, %v6492_v31  ;;  %v6549_v14 = vpop.f32.mrb[77].mxu0 }
 0xdc0   : > { %v6550_v62 = vadd.f32 %v6549_v14, %v6548_v60  ;;  %v5479_v32 = vadd.f32 %v5445_v5, %v9579_v2 }
 0xdc1   : > { %v5345_v53 = vadd.f32 %v6494_v23, %v10019_v43 }
 0xdc2   : > { %5487 = vst [vmem:[#allocation2 + $0x8] sm:$0xff] %v5479_v32 }
 0xdc3   : > { %v5450_v12 = vadd.f32 %v6550_v62, %v5345_v53 }
 0xdc5   : > { %v5480_v57 = vadd.f32 %v5450_v12, %v9587_v29 }
 0xdc7   : > { %5488 = vst [vmem:[#allocation2 + $0x10] sm:$0xff] %v5480_v57 }
 0xdce   : > { %v6495_v27 = vpop.f32.mrb[94].mxu1 }
 0xdcf   : > { %v6551_v25 = vpop.f32.mrb[78].mxu0  ;;  %v6496_v46 = vpop.f32.mrb[95].mxu1 }
 0xdd0   : > { %v6497_v38 = vadd.f32 %v6496_v46, %v6495_v27  ;;  %v6552_v58 = vpop.f32.mrb[79].mxu0 }
 0xdd1   : > { %v6553_v24 = vadd.f32 %v6552_v58, %v6551_v25 }
 0xdd2   : > { %v5350_v59 = vadd.f32 %v6497_v38, %v10019_v43  ;;  %v6498_v39 = vpop.f32.mrb[96].mxu1 }
 0xdd3   : > { %v6554_v52 = vpop.f32.mrb[80].mxu0  ;;  %v6499_v9 = vpop.f32.mrb[97].mxu1 }
 0xdd4   : > { %v5455_v35 = vadd.f32 %v6553_v24, %v5350_v59  ;;  %v6500_v2 = vadd.f32 %v6499_v9, %v6498_v39  ;;  %v6555_v36 = vpop.f32.mrb[81].mxu0  ;;  %v5595_v39 = vld [vmem:[#allocation20] sm:$0xff] (!%p6194_p0)  ;;  %v5597_v9 = vld [vmem:[#allocation20 + $0x10] sm:$0xff] (!%p6194_p0) }
 0xdd5   : > { %v6556_v45 = vadd.f32 %v6555_v36, %v6554_v52  ;;  %v5596_v52 = vld [vmem:[#allocation20 + $0x8] sm:$0xff] (!%p6194_p0)  ;;  %v5598_v36 = vld [vmem:[#allocation20 + $0x18] sm:$0xff] (!%p6194_p0) }
 0xdd6   : > { %v5481_v55 = vadd.f32 %v5455_v35, %v9585_v0  ;;  %v5355_v29 = vadd.f32 %v6500_v2, %v10019_v43  ;;  %v6501_v18 = vpop.f32.mrb[98].mxu1  ;;  %v8371_v35 = vmov (!%p6194_p0), 0.0|0.0   ;;  %v7451_v2 = vpack.c.bf16 (!%p6194_p0), %v5596_v52, %v5595_v39 }
 0xdd7   : > { %v6557_v20 = vpop.f32.mrb[82].mxu0  ;;  %v6502_v8 = vpop.f32.mrb[99].mxu1  ;;  %7450 = vmatprep.subr.bf16.mxu0 (!%p6194_p0), %v8371_v35 }
 0xdd8   : > { %5489 = vst [vmem:[#allocation2 + $0x18] sm:$0xff] %v5481_v55  ;;  %v5460_v33 = vadd.f32 %v6556_v45, %v5355_v29  ;;  %v6503_v42 = vadd.f32 %v6502_v8, %v6501_v18  ;;  %v6558_v16 = vpop.f32.mrb[83].mxu0  ;;  %7452 = vmatpush3.bf16.msra.mxu0 (!%p6194_p0), %v7451_v2  ;;  %v7454_v45 = vpack.c.bf16 (!%p6194_p0), %v5598_v36, %v5597_v9  ;;  %v5599_v55 = vld [vmem:[#allocation20 + $0x20] sm:$0xff] (!%p6194_p0)  ;;  %v5600_v29 = vld [vmem:[#allocation20 + $0x28] sm:$0xff] (!%p6194_p0) }
 0xdd9   : > { %v6559_v28 = vadd.f32 %v6558_v16, %v6557_v20  ;;  %7453 = vmatprep.subr.bf16.mxu0 (!%p6194_p0), %v8371_v35  ;;  %v7457_v18 = vpack.c.bf16 (!%p6194_p0), %v5600_v29, %v5599_v55  ;;  %v5601_v16 = vld [vmem:[#allocation20 + $0x30] sm:$0xff] (!%p6194_p0) }
 0xdda   : > { %v5482_v22 = vadd.f32 %v5460_v33, %v10247_v47  ;;  %v5360_v63 = vadd.f32 %v6503_v42, %v10019_v43 }
 0xddc   : > { %5490 = vst [vmem:[#allocation2 + $0x20] sm:$0xff] %v5482_v22  ;;  %v5465_v10 = vadd.f32 %v6559_v28, %v5360_v63  ;;  %7455 = vmatpush3.bf16.msra.mxu0 (!%p6194_p0), %v7454_v45  ;;  %v5602_v28 = vld [vmem:[#allocation20 + $0x38] sm:$0xff] (!%p6194_p0)  ;;  %v5603_v22 = vld [vmem:[#allocation20 + $0x40] sm:$0xff] (!%p6194_p0)  ;;  %v5604_v63 = vld [vmem:[#allocation20 + $0x48] sm:$0xff] (!%p6194_p0) }
 0xddd   : > { %7456 = vmatprep.subr.bf16.mxu0 (!%p6194_p0), %v8371_v35  ;;  %v7460_v47 = vpack.c.bf16 (!%p6194_p0), %v5602_v28, %v5601_v16 }
 0xdde   : > { %v5483_v30 = vadd.f32 %v5465_v10, %v10248_v13  ;;  %v7463_v10 = vpack.c.bf16 (!%p6194_p0), %v5604_v63, %v5603_v22  ;;  %v5605_v13 = vld [vmem:[#allocation20 + $0x50] sm:$0xff] (!%p6194_p0) }
 0xde0   : > { %5491 = vst [vmem:[#allocation2 + $0x28] sm:$0xff] %v5483_v30  ;;  %7458 = vmatpush3.bf16.msra.mxu0 (!%p6194_p0), %v7457_v18  ;;  %v5606_v30 = vld [vmem:[#allocation20 + $0x58] sm:$0xff] (!%p6194_p0) }
 0xde1   : > { %7459 = vmatprep.subr.bf16.mxu0 (!%p6194_p0), %v8371_v35 }
 0xde4   : > { %7461 = vmatpush3.bf16.msra.mxu0 (!%p6194_p0), %v7460_v47 }
 0xde5   : > { %7462 = vmatprep.subr.bf16.mxu0 (!%p6194_p0), %v8371_v35 }
 0xde6   : > { %v6504_v0 = vpop.f32.mrb[100].mxu1 }
 0xde7   : > { %v6560_v61 = vpop.f32.mrb[84].mxu0  ;;  %v6505_v6 = vpop.f32.mrb[101].mxu1 }
 0xde8   : > { %v6506_v41 = vadd.f32 %v6505_v6, %v6504_v0  ;;  %v6561_v4 = vpop.f32.mrb[85].mxu0  ;;  %v8373_v0 = vmov (!%p6194_p0), 0.0   ;;  %7464 = vmatpush3.bf16.msra.mxu0 (!%p6194_p0), %v7463_v10  ;;  %v5607_v6 = vld [vmem:[#allocation20 + $0x60] sm:$0xff] (!%p6194_p0) }
 0xde9   : > { %v6562_v54 = vadd.f32 %v6561_v4, %v6560_v61  ;;  %7095 = vmatprep.mubr.msk.f32.mxu0 (!%p6194_p0), %vm8372_vm11, %v8373_v0  ;;  %v7466_v61 = vpack.c.bf16 (!%p6194_p0), %v5606_v30, %v5605_v13  ;;  %7465 = vmatprep.subr.bf16.mxu0 (!%p6194_p0), %v8371_v35 }
 0xdea   : > { %v5365_v44 = vadd.f32 %v6506_v41, %v10019_v43  ;;  %v6507_v17 = vpop.f32.mrb[102].mxu1  ;;  %v5608_v41 = vld [vmem:[#allocation20 + $0x68] sm:$0xff] (!%p6194_p0) }
 0xdeb   : > { %v6563_v56 = vpop.f32.mrb[86].mxu0  ;;  %v6508_v11 = vpop.f32.mrb[103].mxu1  ;;  %v7469_v4 = vpack.c.bf16 (!%p6194_p0), %v5608_v41, %v5607_v6 }
 0xdec   : > { %v5470_v15 = vadd.f32 %v6562_v54, %v5365_v44  ;;  %v6509_v19 = vadd.f32 %v6508_v11, %v6507_v17  ;;  %v6564_v40 = vpop.f32.mrb[87].mxu0  ;;  %7467 = vmatpush3.bf16.msra.mxu0 (!%p6194_p0), %v7466_v61  ;;  %v5609_v54 = vld [vmem:[#allocation20 + $0x70] sm:$0xff] (!%p6194_p0)  ;;  %v5610_v44 = vld [vmem:[#allocation20 + $0x78] sm:$0xff] (!%p6194_p0) }
 0xded   : > { %v6565_v1 = vadd.f32 %v6564_v40, %v6563_v56  ;;  %7468 = vmatprep.subr.bf16.mxu0 (!%p6194_p0), %v8371_v35  ;;  %v7472_v17 = vpack.c.bf16 (!%p6194_p0), %v5610_v44, %v5609_v54  ;;  %v6203_v40 = vld [vmem:[#allocation19] ss:$0 sm:$0xff] (!%p6194_p0) }
 0xdee   : > { %v5484_v48 = vadd.f32 %v5470_v15, %v10249_v3  ;;  %v5370_v51 = vadd.f32 %v6509_v19, %v10019_v43  ;;  %5497 = sbr.rel (%p6194_p0) target bundleno = 4113 (0x1011), region = 108  ;;  %v6204_v3 = vld [vmem:[#allocation19 + $0x1] ss:$0 sm:$0xff] (!%p6194_p0) }
 0xdf0   : > { %5492 = vst [vmem:[#allocation2 + $0x30] sm:$0xff] %v5484_v48  ;;  %v5475_v34 = vadd.f32 %v6565_v1, %v5370_v51  ;;  %7470 = vmatpush3.bf16.msra.mxu0 (!%p6194_p0), %v7469_v4 }
 0xdf1   : > { %7471 = vmatprep.subr.bf16.mxu0 (!%p6194_p0), %v8371_v35 }
 0xdf2   : > { %v5485_v26 = vadd.f32 %v5475_v34, %v10250_v50 }
 0xdf4   : > { %5493 = vst [vmem:[#allocation2 + $0x38] sm:$0xff] %v5485_v26  ;;  %7473 = vmatpush3.bf16.msra.mxu0 (!%p6194_p0), %v7472_v17 }
 0xdfb   : > { %v5501_v43 = vld [vmem:[%s5500_s20] sm:$0x1]  ;;  %v6196_v37 = vld [vmem:[%s5825_s25 + $0x8] sm:$0x1]  ;;  %v6197_v49 = vld [vmem:[%s5827_s14 + $0x10] sm:$0x1] }
 0xdfc   : > { %v5538_v7 = vrot.slane %v6196_v37, 7  ;;  %v6198_v31 = vld [vmem:[%s5829_s11 + $0x18] sm:$0x1]  ;;  %v5541_v60 = vrot.slane %v6197_v49, 6  ;;  %v6199_v21 = vld [vmem:[%s5831_s4 + $0x20] sm:$0x1] }
 0xdfd   : > { %v5544_v5 = vrot.slane %v6198_v31, 5  ;;  %v6200_v14 = vld [vmem:[%s5833_s18 + $0x28] sm:$0x1]  ;;  %v5547_v62 = vrot.slane %v6199_v21, 4  ;;  %v6201_v53 = vld [vmem:[%s5835_s19 + $0x30] sm:$0x1] }
 0xdfe   : > { %v5559_v23 = vsel %vm5558_vm4, %v5501_v43, %v5538_v7  ;;  %v5550_v12 = vrot.slane %v6200_v14, 3  ;;  %v5553_v27 = vrot.slane %v6201_v53, 2  ;;  %v6202_v46 = vld [vmem:[%s5837_s5 + $0x38] sm:$0x1] }
 0xdff   : > { %v5561_v32 = vsel %vm5560_vm5, %v5559_v23, %v5541_v60  ;;  %v5556_v58 = vrot.slane %v6202_v46, 1 }
 0xe00   : > { %v5563_v57 = vsel %vm5562_vm6, %v5561_v32, %v5544_v5 }
 0xe01   : > { %v5565_v25 = vsel %vm5564_vm7, %v5563_v57, %v5547_v62 }
 0xe02   : > { %v5567_v38 = vsel %vm5566_vm8, %v5565_v25, %v5550_v12 }
 0xe03   : > { %v5569_v24 = vsel %vm5568_vm9, %v5567_v38, %v5553_v27 }
 0xe04   : > { %v5571_v59 = vsel %vm5570_vm10, %v5569_v24, %v5556_v58 }
 0xe05   : > { %5574 = vadd.xlane.f32.xlu0 %v5571_v59 }
 0xe92   : > { %v5575_v20 = vpop.xlane.xlu0 %5574 }
 0xe93   : > { %v5576_v8 = vmul.f32 0.0078125, %v5575_v20 }
 0xe95   : > { %v5577_v33 = vsub.f32 %v5571_v59, %v5576_v8 }
 0xe97   : > { %v5578_v42 = vmul.f32 %v5577_v33, %v5577_v33 }
 0xe99   : > { %5579 = vadd.xlane.f32.xlu0 %v5578_v42 }
 0xf26   : > { %v5580_v56 = vpop.xlane.xlu0 %5579 }
 0xf27   : > { %v5581_v11 = vmul.f32 0.0078125, %v5580_v56 }
 0xf29   : > { %v5582_v15 = vadd.f32 1e-05, %v5581_v11 }
 0xf2b   : > { %7893 = vrsqrt.f32 %v5582_v15 }
 0xf35   : > { %v7894_v19 = vpop.eup %7893 }
 0xf36   : > { %v5584_v1 = vmul.f32 %v7894_v19, %v5577_v33 }
 0xf38   : > { %v5589_v48 = vmul.f32 %v6203_v40, %v5584_v1 }
 0xf3a   : > { %v5594_v51 = vadd.f32 %v6204_v3, %v5589_v48 }
 0xf3c   : > { %7096 = vmatmul.mubr.f32.vlgmr.msra.gmra.mrb[0].mxu0 %v5594_v51 }
0x100f   : > { %v5677_v34 = vpop.f32.mrb[0].mxu0 }
0x1010   : > { %5681 = vst [vmem:[%s8983_s23] sm:$0xff] %v5677_v34  ;;  %v7097_v50 = vpop.f32.mrb[1].mxu0 }
0x1011 PF: > { %s10253_s6 = sld [smem:[#allocation37_spill]]  ;;  %s10254_s26 = sld [smem:[#allocation62_spill]] }
0x1012   : > { %s5696_s29 = sshll.u32 %s8983_s23, 4  ;;  %s5683_s28 = scalar_lea.sflag [#allocation7], %s8932_s16  ;;  %s5697_s29 = int_to_ptr.vmem [resolvable:$true] %s5696_s29 }
0x1013   : > { %s8201_s9 = scalar_lea.vmem %s5697_s29, 128  ;;  %p10255_p10 = scmp.ne.s32.totalorder %s10210_s7, 0 }
0x1014   : > { %p8202_p6 = scmp.ne.s32.totalorder %s5697_s29, %s8201_s9  ;;  %s8374_s3 = smov [#allocation22]  }
0x1015   : > { %s8205_s27 = sshll.u32 %s8374_s3, 4  ;;  %s8206_s27 = int_to_ptr.vmem [resolvable:$false] %s8205_s27 }
0x1016   : > { %p8203_p3 = pnand %p8202_p6, %p10255_p10  ;;  %s8207_s2 = scalar_lea.vmem %s8206_s27, 256 }
0x1017   : > { %s6206_s13 = sshll.u32 %s10253_s6, 7  ;;  %p8208_p9 = scmp.lt.s32.totalorder %s5697_s29, %s8206_s27 }
0x1018   : > { %s10045_s12 = scalar_lea.hbm %s10254_s26, %s6206_s13  ;;  %p8204_p8 = pneg %p8203_p3 }
0x1019   : > { %p8209_p5 = scmp.lt.s32.totalorder %s8207_s2, %s8201_s9 }
0x101b   : > { %p8210_p11 = por %p8209_p5, %p8208_p9 }
0x101d   : > { %p8211_p7 = pnand %p8210_p11, %p8204_p8 }
0x101f   : > { %8214 = shalt.err (!%p8211_p7)
}
0x1020   : > { %s8215_s16 = scalar_lea.hbm %s10045_s12, 128  ;;  %s8219_s10 = scalar_lea.hbm %s10254_s26, 256 }
0x1021   : > { %p8216_p13 = scmp.ne.s32.totalorder %s10045_s12, %s8215_s16  ;;  %p8220_p2 = scmp.lt.u32.totalorder %s10045_s12, %s10254_s26 }
0x1022   : > { %p8221_p4 = scmp.lt.u32.totalorder %s8219_s10, %s8215_s16  ;;  %p8223_p6 = scmp.lt.u32.totalorder %s8215_s16, %s10045_s12 }
0x1023   : > { %p8217_p12 = pnand %p8216_p13, %p10255_p10 }
0x1024   : > { %p8222_p0 = por %p8221_p4, %p8220_p2 }
0x1025   : > { %p8218_p1 = pneg %p8217_p12 }
0x1026   : > { %p8224_p3 = por %p8223_p6, %p8222_p0 }
0x1028   : > { %p8225_p8 = pnand %p8224_p3, %p8218_p1 }
0x102a   : > { %8228 = shalt.err (!%p8225_p8)
}
0x102b   : > { %7512 = dma.vmem_to_hbm [thread:$0]  (%p10255_p10), %s5697_s29, 128, %s10045_s12, %s5683_s28  }
0x102c PF: > { %s10256_s1 = sld [smem:[#allocation34_spill]]  ;;  %s10257_s14 = sld [smem:[#allocation41_spill]] }
0x102d   : > { %p7555_p9 = scmp.ge.s32.totalorder %s8349_s17, 2 }
0x1032   : > { %s5708_s11 = sand.u32 1, %s10256_s1   ;;  %p10258_p5 = scmp.ne.s32.totalorder %s10257_s14, 0 }
0x1033   : > { %s5709_s4 = scalar_lea.sflag [#allocation7], %s5708_s11 }
0x1034   : > { %p7547_p11 = pnand %p7555_p9, %p10258_p5 }
0x1036   : > { %8304 = dma.done.wait (!%p7547_p11), %s5709_s4, 128  }
0x1037   : > { %8306 = vsyncadd (!%p7547_p11), %s5709_s4, 4294967168  ;;  %s44_s17 = sadd.s32 1, %s8349_s17   ;;  %s10259_s27 = sld [smem:[#allocation32_spill]] }
0x1038   : > { %p41_p7 = scmp.ge.s32.totalorder %s44_s17, 6   ;;  %s10260_s28 = sld [smem:[#allocation33_spill]] }
0x1039   : > { %s10261_s0 = sld [smem:[#allocation47_spill]]  ;;  %s10262_s7 = sld [smem:[#allocation35_spill]] }
0x103a   : > { %s10263_s12 = sld [smem:[#allocation48_spill]]  ;;  %s10264_s14 = sld [smem:[#allocation38_spill]] }
0x103b   : > { %s10265_s18 = sld [smem:[#allocation45_spill]]  ;;  %s10266_s16 = sld [smem:[#allocation46_spill]] }
0x103c   : > { %s10267_s29 = smov %s8325_s30  ;;  %s10269_s13 = smov %s8341_s15 }
0x103d   :  { %43 = sbr.rel (!%p41_p7) target bundleno = 35 (0x23), region = 225 }
0x103f   : > { %s10268_s30 = smov %s10262_s7 }
0x1041   : > { %s10270_s15 = smov %s10265_s18 }
0x1044   :  { %5714 = vsyncpa [#allocation6], 1 }
0x1045   :  { %5716 = vsyncpa [#allocation6 + $0x1], 1 }
0x1046   :  { %5717 = vsyncpa [#allocation9], 1 }
0x1047   :  { %5719 = vsyncpa [#allocation9 + $0x1], 1 }
0x1048   :  { %5720 = vsyncpa [#allocation12], 1 }
0x1049   :  { %5722 = vsyncpa [#allocation12 + $0x1], 1 }
0x104a   :  { %5723 = vsyncpa [#allocation15], 1 }
0x104b   :  { %5725 = vsyncpa [#allocation15 + $0x1], 1 }
0x104c   :  { %5726 = vsyncpa [#allocation18], 1 }
0x104d   :  { %5728 = vsyncpa [#allocation18 + $0x1], 1 }
0x104e   :  { %5729 = vsyncpa [#allocation21], 1 }
0x104f   :  { %5730 = vsyncpa [#allocation7], 1 }
0x1050   :  { %5732 = vsyncpa [#allocation7 + $0x1], 1 }

</bundles_post_ra>
